<compile_context>
chip_gen: v7x
topology: tpu7x:2x2x1
jax: 0.10.0
libtpu: 0.0.40
codegen_flags: <defaults>
</compile_context>

<pallas_src>
import numpy as np
import jax
import jax.numpy as jnp
from jax import lax
from jax.experimental import pallas as pl
from jax.experimental.pallas import tpu as pltpu

START_TAG = "<START>"
STOP_TAG = "<STOP>"
tag_to_ix = {
    "O": 0, "B-BANK": 1, "I-BANK": 2, "B-PRODUCT": 3, "I-PRODUCT": 4,
    "B-COMMENTS_N": 5, "I-COMMENTS_N": 6, "B-COMMENTS_ADJ": 7,
    "I-COMMENTS_ADJ": 8, START_TAG: 9, STOP_TAG: 10,
}
NT = len(tag_to_ix)          # 11
START_IDX = tag_to_ix[START_TAG]
STOP_IDX = tag_to_ix[STOP_TAG]


# ----------------------------------------------------------------------------
# Pallas kernel: batched BiLSTM features + hidden2tag + CRF Viterbi recursion.
# One grid step processes B sentences (rows are time-major: row = t*B + b).
# ----------------------------------------------------------------------------
def bilstm_crf_kernel(x_ref, wx_ref, wh_ref, b_ref, h0_ref, c0_ref,
                      wtag_ref, btag_ref, trans_ref,
                      feats_ref, bptr_ref, term_ref,
                      h_scr, p_scr):
    f32 = jnp.float32
    TB, _ = x_ref.shape
    H2 = h0_ref.shape[1]          # 2H  ([fwd | bwd])
    H = H2 // 2
    G = wx_ref.shape[1]           # 8H  fused gate width (= 128 lanes here)
    nt = trans_ref.shape[0]
    B = term_ref.shape[0]         # sentences per block
    T = TB // B
    H6 = 6 * H

    # ---- hoisted loads & constants ------------------------------------------
    wh = wh_ref[...]                                   # (2H, 8H) block-diagonal
    trans = trans_ref[...]                             # (NT, NT), trans[next, prev]

    lane_g = lax.broadcasted_iota(jnp.int32, (1, G), 1)
    # forward-direction gate columns are H-wide blocks 0, 2, 4, 6
    fwd_mask = ((lane_g < H)
                | ((lane_g >= 2 * H) & (lane_g < 3 * H))
                | ((lane_g >= 4 * H) & (lane_g < 5 * H))
                | ((lane_g >= 6 * H) & (lane_g < 7 * H)))
    lane_h2 = lax.broadcasted_iota(jnp.int32, (1, H2), 1)
    left_mask = lane_h2 < H                            # fwd half of hidden

    # ---- fused input projection: ONE matmul for all steps & both dirs --------
    xproj = jnp.dot(x_ref[...], wx_ref[...], preferred_element_type=f32) + b_ref[...]

    h = jnp.broadcast_to(h0_ref[...], (B, H2))         # [h_f | h_b]
    c = jnp.broadcast_to(c0_ref[...], (B, H2))         # [c_f | c_b]

    # ---- recurrence: one matmul, one sigmoid, two tanh per step --------------
    for t in range(T):
        rt = T - 1 - t
        xin = jnp.where(fwd_mask,
                        xproj[t * B:(t + 1) * B, :],    # fwd gates see token t
                        xproj[rt * B:(rt + 1) * B, :])  # bwd gates see token T-1-t
        pre = xin + jnp.dot(h, wh, preferred_element_type=f32)   # (B, 8H)
        sg = jax.nn.sigmoid(pre[:, :H6])               # i_f i_b f_f f_b o_f o_b
        g = jnp.tanh(pre[:, H6:])                      # g_f g_b
        i = sg[:, :H2]
        f = sg[:, H2:2 * H2]
        o = sg[:, 2 * H2:3 * H2]
        c = f * c + i * g
        h = o * jnp.tanh(c)
        h_scr[t * B:(t + 1) * B, :] = h                # scratch slab write

    # hidden[token r, b] = [h_f(step r) | h_b(step T-1-r)]
    hid = h_scr[...]                                   # (T*B, 2H)
    hid_rev = jnp.concatenate(
        [hid[(T - 1 - t) * B:(T - t) * B, :] for t in range(T)], axis=0)
    hidden = jnp.where(left_mask, hid, hid_rev)

    # ---- hidden2tag: single (T*B, 2H) @ (2H, NT) matmul -----------------------
    feats = jnp.dot(hidden, wtag_ref[...], preferred_element_type=f32) + btag_ref[...]
    feats_ref[...] = feats

    # ---- CRF Viterbi forward recursion (batched over sentences) --------------
    lane_nt = lax.broadcasted_iota(jnp.int32, (1, nt), 1)
    prev = jnp.where(lane_nt == START_IDX, 0.0, -10000.0).astype(f32)
    prev = jnp.broadcast_to(prev, (B, nt))
    for t in range(T):
        p_scr[t * B:(t + 1) * B, :] = prev             # record state for backptrs
        cols = [jnp.max(prev + trans[j:j + 1, :], axis=1, keepdims=True)
                for j in range(nt)]                    # max over prev, per next tag
        vit = jnp.concatenate(cols, axis=1)            # (B, NT)
        prev = vit + feats[t * B:(t + 1) * B, :]
    term_ref[...] = prev + trans[STOP_IDX:STOP_IDX + 1, :]

    # ---- backpointers: one batched pass, off the serial chain ----------------
    P = p_scr[...]                                     # (T*B, NT)
    iota_f = lax.broadcasted_iota(jnp.int32, (TB, nt), 1).astype(f32)
    bp_cols = []
    for j in range(nt):
        s = P + trans[j:j + 1, :]
        m = jnp.max(s, axis=1, keepdims=True)
        # first-index tie-breaking (matches torch/np argmax)
        bp_cols.append(jnp.min(jnp.where(s == m, iota_f, float(nt)),
                               axis=1, keepdims=True))
    bptr_ref[...] = jnp.concatenate(bp_cols, axis=1).astype(jnp.int32)


# ----------------------------------------------------------------------------
# Wrapper around pallas_call.
# ----------------------------------------------------------------------------
def bilstm_crf_forward(embeds, kp, *, block_sents):
    """embeds: (B_total, T, E). Returns feats (B,T,NT), bptrs (B,T,NT), term (B,NT)."""
    Btot, T, E = embeds.shape
    H = kp["h0"].shape[1] // 2
    nt = kp["trans"].shape[0]
    B = block_sents
    assert Btot % B == 0
    nblk = Btot // B
    TB = T * B

    # time-major layout inside each block: row = t*B + b_local
    x = embeds.reshape(nblk, B, T, E).transpose(0, 2, 1, 3).reshape(nblk, TB, E)

    weights = [kp["wx"], kp["wh"], kp["b"], kp["h0"], kp["c0"],
               kp["wtag"], kp["btag"], kp["trans"]]

    def wspec(shape):
        return pl.BlockSpec(shape, lambda i: (0, 0))   # resident across grid steps

    in_specs = [pl.BlockSpec((None, TB, E), lambda i: (i, 0, 0))]
    in_specs += [wspec(w.shape) for w in weights]
    out_specs = [pl.BlockSpec((None, TB, nt), lambda i: (i, 0, 0)),
                 pl.BlockSpec((None, TB, nt), lambda i: (i, 0, 0)),
                 pl.BlockSpec((None, B, nt), lambda i: (i, 0, 0))]
    out_shapes = (jax.ShapeDtypeStruct((nblk, TB, nt), jnp.float32),   # feats
                  jax.ShapeDtypeStruct((nblk, TB, nt), jnp.int32),     # backptrs
                  jax.ShapeDtypeStruct((nblk, B, nt), jnp.float32))    # terminal

    inputs = [x] + weights
    in_bytes = sum(int(np.prod(a.shape)) * jnp.dtype(a.dtype).itemsize for a in inputs)
    out_bytes = sum(int(np.prod(s.shape)) * np.dtype(s.dtype).itemsize for s in out_shapes)
    flops = (2 * Btot * T * E * 8 * H          # fused input projection
             + 2 * Btot * T * 2 * H * 8 * H    # fused recurrent matmuls
             + 2 * Btot * T * 2 * H * nt       # hidden2tag
             + 4 * Btot * T * nt * nt)         # Viterbi adds / reductions
    cost = pl.CostEstimate(flops=flops,
                           transcendentals=10 * H * Btot * T,
                           bytes_accessed=in_bytes + out_bytes)

    feats, bptrs, term = pl.pallas_call(
        bilstm_crf_kernel,
        out_shape=out_shapes,
        grid=(nblk,),
        in_specs=in_specs,
        out_specs=out_specs,
        scratch_shapes=[pltpu.VMEM((TB, 2 * H), jnp.float32),   # hidden slab
                        pltpu.VMEM((TB, nt), jnp.float32)],     # viterbi state slab
        compiler_params=pltpu.CompilerParams(
            dimension_semantics=("parallel",)),
        cost_estimate=cost,
    )(*inputs)

    feats = feats.reshape(nblk, T, B, nt).transpose(0, 2, 1, 3).reshape(Btot, T, nt)
    bptrs = bptrs.reshape(nblk, T, B, nt).transpose(0, 2, 1, 3).reshape(Btot, T, nt)
    term = term.reshape(Btot, nt)
    return feats, bptrs, term


def viterbi_backtrack(bptrs, term):
    # Scalar backtracking over the tiny (T, NT) int table -> plain host glue.
    best = int(np.argmax(term))
    score = float(term[best])
    path = [best]
    for t in range(bptrs.shape[0] - 1, -1, -1):
        best = int(bptrs[t, best])
        path.append(best)
    start = path.pop()
    assert start == START_IDX
    path.reverse()
    return score, path


# ----------------------------------------------------------------------------
# Parameter init (PyTorch-shaped) and repacking into the fused kernel layout.
# ----------------------------------------------------------------------------
def init_params(key, vocab, E, H, nt):
    keys = jax.random.split(key, 16)
    k = 1.0 / np.sqrt(H)

    def unif(kk, shape, scale):
        return jax.random.uniform(kk, shape, jnp.float32, -scale, scale)

    p = dict(
        emb=jax.random.normal(keys[0], (vocab, E), jnp.float32),
        w_ih_f=unif(keys[1], (4 * H, E), k), w_hh_f=unif(keys[2], (4 * H, H), k),
        b_ih_f=unif(keys[3], (4 * H,), k), b_hh_f=unif(keys[4], (4 * H,), k),
        w_ih_b=unif(keys[5], (4 * H, E), k), w_hh_b=unif(keys[6], (4 * H, H), k),
        b_ih_b=unif(keys[7], (4 * H,), k), b_hh_b=unif(keys[8], (4 * H,), k),
    )
    kt = 1.0 / np.sqrt(2 * H)
    p["w_tag"] = unif(keys[9], (nt, 2 * H), kt)
    p["b_tag"] = unif(keys[10], (nt,), kt)
    trans = jax.random.normal(keys[11], (nt, nt), jnp.float32)
    trans = trans.at[START_IDX, :].set(-10000.0)
    trans = trans.at[:, STOP_IDX].set(-10000.0)
    p["trans"] = trans
    p["h0"] = jax.random.normal(keys[12], (2, H), jnp.float32)   # init_hidden()
    p["c0"] = jax.random.normal(keys[13], (2, H), jnp.float32)
    return p


def pack_kernel_params(p, H):
    """Repack PyTorch-shaped weights into the fused kernel layout.

    Gate column blocks (width H each): i_f,i_b,f_f,f_b,o_f,o_b,g_f,g_b
    (PyTorch gate order along 4H is i,f,g,o -> gate index 0,1,2,3)."""
    order = [(0, 'f'), (0, 'b'), (1, 'f'), (1, 'b'),
             (3, 'f'), (3, 'b'), (2, 'f'), (2, 'b')]
    wih = {'f': p["w_ih_f"], 'b': p["w_ih_b"]}
    whh = {'f': p["w_hh_f"], 'b': p["w_hh_b"]}
    bih = {'f': p["b_ih_f"], 'b': p["b_ih_b"]}
    bhh = {'f': p["b_hh_f"], 'b': p["b_hh_b"]}

    def gate(w, k):
        return w[k * H:(k + 1) * H, :]

    def bgate(b, k):
        return b[k * H:(k + 1) * H]

    wx = jnp.concatenate([gate(wih[d], k).T for (k, d) in order], axis=1)    # (E, 8H)
    b_cat = jnp.concatenate([bgate(bih[d], k) + bgate(bhh[d], k)
                             for (k, d) in order]).reshape(1, 8 * H)
    zH = jnp.zeros((H, H), jnp.float32)
    row_f = jnp.concatenate([gate(whh['f'], k).T if d == 'f' else zH
                             for (k, d) in order], axis=1)                   # (H, 8H)
    row_b = jnp.concatenate([gate(whh['b'], k).T if d == 'b' else zH
                             for (k, d) in order], axis=1)                   # (H, 8H)
    wh = jnp.concatenate([row_f, row_b], axis=0)                             # (2H, 8H)

    return dict(
        wx=wx, wh=wh, b=b_cat,
        h0=p["h0"].reshape(1, 2 * H), c0=p["c0"].reshape(1, 2 * H),
        wtag=p["w_tag"].T, btag=p["b_tag"].reshape(1, -1),
        trans=p["trans"])


# ----------------------------------------------------------------------------
# Pure-numpy reference (mirrors the PyTorch forward(): BiLSTM + Viterbi decode).
# ----------------------------------------------------------------------------
def reference_forward(embeds_np, p):
    H = p["h0"].shape[1]
    T = embeds_np.shape[0]

    def np32(x):
        return np.asarray(x, np.float32)

    def sigmoid(x):
        return 1.0 / (1.0 + np.exp(-x))

    def run(xs, w_ih, w_hh, b_ih, b_hh, h, c):
        outs = []
        for t in range(xs.shape[0]):
            pre = xs[t] @ w_ih.T + h @ w_hh.T + b_ih + b_hh      # gates i,f,g,o
            i = sigmoid(pre[:H])
            f = sigmoid(pre[H:2 * H])
            g = np.tanh(pre[2 * H:3 * H])
            o = sigmoid(pre[3 * H:])
            c = f * c + i * g
            h = o * np.tanh(c)
            outs.append(h)
        return np.stack(outs)

    x = np32(embeds_np)
    fwd = run(x, np32(p["w_ih_f"]), np32(p["w_hh_f"]), np32(p["b_ih_f"]),
              np32(p["b_hh_f"]), np32(p["h0"])[0], np32(p["c0"])[0])
    bwd = run(x[::-1], np32(p["w_ih_b"]), np32(p["w_hh_b"]), np32(p["b_ih_b"]),
              np32(p["b_hh_b"]), np32(p["h0"])[1], np32(p["c0"])[1])[::-1]
    hidden = np.concatenate([fwd, bwd], axis=1)
    feats = hidden @ np32(p["w_tag"]).T + np32(p["b_tag"])

    trans = np32(p["trans"])
    nt = trans.shape[0]
    prev = np.full((nt,), -10000.0, np.float32)
    prev[START_IDX] = 0.0
    bptrs = []
    for t in range(T):
        ntv = prev[None, :] + trans                   # ntv[next, prev]
        bp = np.argmax(ntv, axis=1)
        vit = ntv[np.arange(nt), bp]
        bptrs.append(bp)
        prev = vit + feats[t]
    term = prev + trans[STOP_IDX]
    best = int(np.argmax(term))
    score = float(term[best])
    path = [best]
    for bp in reversed(bptrs):
        best = int(bp[best])
        path.append(best)
    start = path.pop()
    assert start == START_IDX
    path.reverse()
    return feats, score, path


if __name__ == "__main__":
    vocab_size, embedding_dim, hidden_dim, T = 30, 16, 32, 8
    H = hidden_dim // 2
    B_total, B_blk = 16, 8          # 16 sentences, 8 per grid step (2 parallel steps)

    key = jax.random.PRNGKey(0)
    pkey, skey = jax.random.split(key)
    params = init_params(pkey, vocab_size, embedding_dim, H, NT)
    sentences = jax.random.randint(skey, (B_total, T), 0, vocab_size)
    embeds = jnp.take(params["emb"], sentences, axis=0)   # (B, T, E) embedding lookup (glue)

    kparams = pack_kernel_params(params, H)
    feats, bptrs, term = bilstm_crf_forward(embeds, kparams, block_sents=B_blk)
    jax.block_until_ready((feats, bptrs, term))

    feats_np = np.asarray(feats)
    bptrs_np = np.asarray(bptrs)
    term_np = np.asarray(term)
    embeds_np = np.asarray(embeds)

    for b in range(B_total):
        score, path = viterbi_backtrack(bptrs_np[b], term_np[b])
        ref_feats, ref_score, ref_path = reference_forward(embeds_np[b], params)
        assert np.allclose(feats_np[b], ref_feats, atol=3e-3, rtol=3e-3), \
            f"lstm feature mismatch (sentence {b})"
        assert abs(score - ref_score) < 5e-2, f"viterbi score mismatch (sentence {b})"
        assert path == ref_path, f"viterbi path mismatch (sentence {b})"

    print("KERNEL_OK")
</pallas_src>

<mosaic_0001>
module attributes {stable_mosaic.version = 11 : i64} {
  func.func @bilstm_crf_kernel(%arg0: i32, %arg1: memref<1x64x16xf32, #tpu.memory_space<vmem>>, %arg2: memref<16x128xf32, #tpu.memory_space<vmem>>, %arg3: memref<32x128xf32, #tpu.memory_space<vmem>>, %arg4: memref<1x128xf32, #tpu.memory_space<vmem>>, %arg5: memref<1x32xf32, #tpu.memory_space<vmem>>, %arg6: memref<1x32xf32, #tpu.memory_space<vmem>>, %arg7: memref<32x11xf32, #tpu.memory_space<vmem>>, %arg8: memref<1x11xf32, #tpu.memory_space<vmem>>, %arg9: memref<11x11xf32, #tpu.memory_space<vmem>>, %arg10: memref<1x64x11xf32, #tpu.memory_space<vmem>>, %arg11: memref<1x64x11xi32, #tpu.memory_space<vmem>>, %arg12: memref<1x8x11xf32, #tpu.memory_space<vmem>>, %arg13: memref<64x32xf32, #tpu.memory_space<vmem>>, %arg14: memref<64x11xf32, #tpu.memory_space<vmem>>) attributes {dimension_semantics = [#tpu.dimension_semantics<parallel>], iteration_bounds = array<i64: 2>, scalar_prefetch = 0 : i64, scratch_operands = 2 : i64, tpu.core_type = #tpu.core_type<tc>, window_params = [{transform_indices = @transform_0, window_bounds = array<i64: 1, 64, 16>}, {pipeline_mode = #tpu.pipeline_mode<synchronous>, transform_indices = @transform_1, window_bounds = array<i64: 16, 128>}, {pipeline_mode = #tpu.pipeline_mode<synchronous>, transform_indices = @transform_2, window_bounds = array<i64: 32, 128>}, {pipeline_mode = #tpu.pipeline_mode<synchronous>, transform_indices = @transform_3, window_bounds = array<i64: 1, 128>}, {pipeline_mode = #tpu.pipeline_mode<synchronous>, transform_indices = @transform_4, window_bounds = array<i64: 1, 32>}, {pipeline_mode = #tpu.pipeline_mode<synchronous>, transform_indices = @transform_5, window_bounds = array<i64: 1, 32>}, {pipeline_mode = #tpu.pipeline_mode<synchronous>, transform_indices = @transform_6, window_bounds = array<i64: 32, 11>}, {pipeline_mode = #tpu.pipeline_mode<synchronous>, transform_indices = @transform_7, window_bounds = array<i64: 1, 11>}, {pipeline_mode = #tpu.pipeline_mode<synchronous>, transform_indices = @transform_8, window_bounds = array<i64: 11, 11>}, {transform_indices = @transform_9, window_bounds = array<i64: 1, 64, 11>}, {transform_indices = @transform_10, window_bounds = array<i64: 1, 64, 11>}, {transform_indices = @transform_11, window_bounds = array<i64: 1, 8, 11>}]} {
    %c0 = arith.constant 0 : index
    %c0_0 = arith.constant 0 : index
    %0 = vector.load %arg3[%c0, %c0_0] : memref<32x128xf32, #tpu.memory_space<vmem>>, vector<32x128xf32>
    %c0_1 = arith.constant 0 : index
    %c0_2 = arith.constant 0 : index
    %1 = vector.load %arg9[%c0_1, %c0_2] : memref<11x11xf32, #tpu.memory_space<vmem>>, vector<11x11xf32>
    %2 = tpu.iota {dimensions = array<i32: 1>} : vector<1x128xi32>
    %c16_i32 = arith.constant 16 : i32
    %3 = vector.broadcast %c16_i32 : i32 to vector<1x128xi32>
    %4 = arith.cmpi slt, %2, %3 : vector<1x128xi32>
    %c32_i32 = arith.constant 32 : i32
    %5 = vector.broadcast %c32_i32 : i32 to vector<1x128xi32>
    %6 = arith.cmpi sge, %2, %5 : vector<1x128xi32>
    %c48_i32 = arith.constant 48 : i32
    %7 = vector.broadcast %c48_i32 : i32 to vector<1x128xi32>
    %8 = arith.cmpi slt, %2, %7 : vector<1x128xi32>
    %9 = arith.andi %6, %8 : vector<1x128xi1>
    %10 = arith.ori %4, %9 : vector<1x128xi1>
    %c64_i32 = arith.constant 64 : i32
    %11 = vector.broadcast %c64_i32 : i32 to vector<1x128xi32>
    %12 = arith.cmpi sge, %2, %11 : vector<1x128xi32>
    %c80_i32 = arith.constant 80 : i32
    %13 = vector.broadcast %c80_i32 : i32 to vector<1x128xi32>
    %14 = arith.cmpi slt, %2, %13 : vector<1x128xi32>
    %15 = arith.andi %12, %14 : vector<1x128xi1>
    %16 = arith.ori %10, %15 : vector<1x128xi1>
    %c96_i32 = arith.constant 96 : i32
    %17 = vector.broadcast %c96_i32 : i32 to vector<1x128xi32>
    %18 = arith.cmpi sge, %2, %17 : vector<1x128xi32>
    %c112_i32 = arith.constant 112 : i32
    %19 = vector.broadcast %c112_i32 : i32 to vector<1x128xi32>
    %20 = arith.cmpi slt, %2, %19 : vector<1x128xi32>
    %21 = arith.andi %18, %20 : vector<1x128xi1>
    %22 = arith.ori %16, %21 : vector<1x128xi1>
    %23 = tpu.iota {dimensions = array<i32: 1>} : vector<1x32xi32>
    %c16_i32_3 = arith.constant 16 : i32
    %24 = vector.broadcast %c16_i32_3 : i32 to vector<1x32xi32>
    %25 = arith.cmpi slt, %23, %24 : vector<1x32xi32>
    %c0_4 = arith.constant 0 : index
    %c0_5 = arith.constant 0 : index
    %c0_6 = arith.constant 0 : index
    %26 = vector.load %arg1[%c0_4, %c0_5, %c0_6] : memref<1x64x16xf32, #tpu.memory_space<vmem>>, vector<1x64x16xf32>
    %27 = vector.shape_cast %26 : vector<1x64x16xf32> to vector<64x16xf32>
    %c0_7 = arith.constant 0 : index
    %c0_8 = arith.constant 0 : index
    %28 = vector.load %arg2[%c0_7, %c0_8] : memref<16x128xf32, #tpu.memory_space<vmem>>, vector<16x128xf32>
    %cst = arith.constant dense<0.000000e+00> : vector<64x128xf32>
    %29 = tpu.matmul %27, %28, %cst {dimension_numbers = #tpu.dot_dimension_numbers<[1], [0], [0], [1], [0, 0, 1, 1], [], []>} : vector<64x16xf32>, vector<16x128xf32>, vector<64x128xf32> -> vector<64x128xf32>
    %c0_9 = arith.constant 0 : index
    %c0_10 = arith.constant 0 : index
    %30 = vector.load %arg4[%c0_9, %c0_10] : memref<1x128xf32, #tpu.memory_space<vmem>>, vector<1x128xf32>
    %31 = vector.broadcast %30 : vector<1x128xf32> to vector<64x128xf32>
    %32 = arith.addf %29, %31 : vector<64x128xf32>
    %c0_11 = arith.constant 0 : index
    %c0_12 = arith.constant 0 : index
    %33 = vector.load %arg5[%c0_11, %c0_12] : memref<1x32xf32, #tpu.memory_space<vmem>>, vector<1x32xf32>
    %34 = vector.shape_cast %33 : vector<1x32xf32> to vector<1x32xf32>
    %35 = vector.broadcast %34 : vector<1x32xf32> to vector<8x32xf32>
    %c0_13 = arith.constant 0 : index
    %c0_14 = arith.constant 0 : index
    %36 = vector.load %arg6[%c0_13, %c0_14] : memref<1x32xf32, #tpu.memory_space<vmem>>, vector<1x32xf32>
    %37 = vector.shape_cast %36 : vector<1x32xf32> to vector<1x32xf32>
    %38 = vector.broadcast %37 : vector<1x32xf32> to vector<8x32xf32>
    %39 = vector.extract_strided_slice %32 {offsets = [0, 0], sizes = [8, 128], strides = [1, 1]} : vector<64x128xf32> to vector<8x128xf32>
    %40 = vector.extract_strided_slice %32 {offsets = [56, 0], sizes = [8, 128], strides = [1, 1]} : vector<64x128xf32> to vector<8x128xf32>
    %41 = vector.shape_cast %22 : vector<1x128xi1> to vector<1x128xi1>
    %42 = vector.broadcast %41 : vector<1x128xi1> to vector<8x128xi1>
    %43 = arith.select %42, %39, %40 : vector<8x128xi1>, vector<8x128xf32>
    %cst_15 = arith.constant dense<0.000000e+00> : vector<8x128xf32>
    %44 = tpu.matmul %35, %0, %cst_15 {dimension_numbers = #tpu.dot_dimension_numbers<[1], [0], [0], [1], [0, 0, 1, 1], [], []>} : vector<8x32xf32>, vector<32x128xf32>, vector<8x128xf32> -> vector<8x128xf32>
    %45 = arith.addf %43, %44 : vector<8x128xf32>
    %46 = vector.extract_strided_slice %45 {offsets = [0, 0], sizes = [8, 96], strides = [1, 1]} : vector<8x128xf32> to vector<8x96xf32>
    %47 = arith.negf %46 : vector<8x96xf32>
    %48 = math.exp %47 : vector<8x96xf32>
    %cst_16 = arith.constant 1.000000e+00 : f32
    %49 = vector.broadcast %cst_16 : f32 to vector<8x96xf32>
    %50 = arith.addf %49, %48 : vector<8x96xf32>
    %51 = arith.divf %49, %50 : vector<8x96xf32>
    %52 = vector.extract_strided_slice %45 {offsets = [0, 96], sizes = [8, 32], strides = [1, 1]} : vector<8x128xf32> to vector<8x32xf32>
    %53 = math.tanh %52 : vector<8x32xf32>
    %54 = vector.extract_strided_slice %51 {offsets = [0, 0], sizes = [8, 32], strides = [1, 1]} : vector<8x96xf32> to vector<8x32xf32>
    %55 = vector.extract_strided_slice %51 {offsets = [0, 32], sizes = [8, 32], strides = [1, 1]} : vector<8x96xf32> to vector<8x32xf32>
    %56 = vector.extract_strided_slice %51 {offsets = [0, 64], sizes = [8, 32], strides = [1, 1]} : vector<8x96xf32> to vector<8x32xf32>
    %57 = arith.mulf %55, %38 : vector<8x32xf32>
    %58 = arith.mulf %54, %53 : vector<8x32xf32>
    %59 = arith.addf %57, %58 : vector<8x32xf32>
    %60 = math.tanh %59 : vector<8x32xf32>
    %61 = arith.mulf %56, %60 : vector<8x32xf32>
    %c0_17 = arith.constant 0 : index
    %c0_18 = arith.constant 0 : index
    %62 = vector.load %arg13[%c0_17, %c0_18] : memref<64x32xf32, #tpu.memory_space<vmem>>, vector<8x32xf32>
    tpu.vector_store %arg13[%c0_17, %c0_18], %61 {strides = array<i32>} : memref<64x32xf32, #tpu.memory_space<vmem>>, vector<8x32xf32>,
    %63 = vector.extract_strided_slice %32 {offsets = [8, 0], sizes = [8, 128], strides = [1, 1]} : vector<64x128xf32> to vector<8x128xf32>
    %64 = vector.extract_strided_slice %32 {offsets = [48, 0], sizes = [8, 128], strides = [1, 1]} : vector<64x128xf32> to vector<8x128xf32>
    %65 = vector.shape_cast %22 : vector<1x128xi1> to vector<1x128xi1>
    %66 = vector.broadcast %65 : vector<1x128xi1> to vector<8x128xi1>
    %67 = arith.select %66, %63, %64 : vector<8x128xi1>, vector<8x128xf32>
    %cst_19 = arith.constant dense<0.000000e+00> : vector<8x128xf32>
    %68 = tpu.matmul %61, %0, %cst_19 {dimension_numbers = #tpu.dot_dimension_numbers<[1], [0], [0], [1], [0, 0, 1, 1], [], []>} : vector<8x32xf32>, vector<32x128xf32>, vector<8x128xf32> -> vector<8x128xf32>
    %69 = arith.addf %67, %68 : vector<8x128xf32>
    %70 = vector.extract_strided_slice %69 {offsets = [0, 0], sizes = [8, 96], strides = [1, 1]} : vector<8x128xf32> to vector<8x96xf32>
    %71 = arith.negf %70 : vector<8x96xf32>
    %72 = math.exp %71 : vector<8x96xf32>
    %cst_20 = arith.constant 1.000000e+00 : f32
    %73 = vector.broadcast %cst_20 : f32 to vector<8x96xf32>
    %74 = arith.addf %73, %72 : vector<8x96xf32>
    %75 = arith.divf %73, %74 : vector<8x96xf32>
    %76 = vector.extract_strided_slice %69 {offsets = [0, 96], sizes = [8, 32], strides = [1, 1]} : vector<8x128xf32> to vector<8x32xf32>
    %77 = math.tanh %76 : vector<8x32xf32>
    %78 = vector.extract_strided_slice %75 {offsets = [0, 0], sizes = [8, 32], strides = [1, 1]} : vector<8x96xf32> to vector<8x32xf32>
    %79 = vector.extract_strided_slice %75 {offsets = [0, 32], sizes = [8, 32], strides = [1, 1]} : vector<8x96xf32> to vector<8x32xf32>
    %80 = vector.extract_strided_slice %75 {offsets = [0, 64], sizes = [8, 32], strides = [1, 1]} : vector<8x96xf32> to vector<8x32xf32>
    %81 = arith.mulf %79, %59 : vector<8x32xf32>
    %82 = arith.mulf %78, %77 : vector<8x32xf32>
    %83 = arith.addf %81, %82 : vector<8x32xf32>
    %84 = math.tanh %83 : vector<8x32xf32>
    %85 = arith.mulf %80, %84 : vector<8x32xf32>
    %c8 = arith.constant 8 : index
    %c0_21 = arith.constant 0 : index
    %86 = vector.load %arg13[%c8, %c0_21] : memref<64x32xf32, #tpu.memory_space<vmem>>, vector<8x32xf32>
    tpu.vector_store %arg13[%c8, %c0_21], %85 {strides = array<i32>} : memref<64x32xf32, #tpu.memory_space<vmem>>, vector<8x32xf32>,
    %87 = vector.extract_strided_slice %32 {offsets = [16, 0], sizes = [8, 128], strides = [1, 1]} : vector<64x128xf32> to vector<8x128xf32>
    %88 = vector.extract_strided_slice %32 {offsets = [40, 0], sizes = [8, 128], strides = [1, 1]} : vector<64x128xf32> to vector<8x128xf32>
    %89 = vector.shape_cast %22 : vector<1x128xi1> to vector<1x128xi1>
    %90 = vector.broadcast %89 : vector<1x128xi1> to vector<8x128xi1>
    %91 = arith.select %90, %87, %88 : vector<8x128xi1>, vector<8x128xf32>
    %cst_22 = arith.constant dense<0.000000e+00> : vector<8x128xf32>
    %92 = tpu.matmul %85, %0, %cst_22 {dimension_numbers = #tpu.dot_dimension_numbers<[1], [0], [0], [1], [0, 0, 1, 1], [], []>} : vector<8x32xf32>, vector<32x128xf32>, vector<8x128xf32> -> vector<8x128xf32>
    %93 = arith.addf %91, %92 : vector<8x128xf32>
    %94 = vector.extract_strided_slice %93 {offsets = [0, 0], sizes = [8, 96], strides = [1, 1]} : vector<8x128xf32> to vector<8x96xf32>
    %95 = arith.negf %94 : vector<8x96xf32>
    %96 = math.exp %95 : vector<8x96xf32>
    %cst_23 = arith.constant 1.000000e+00 : f32
    %97 = vector.broadcast %cst_23 : f32 to vector<8x96xf32>
    %98 = arith.addf %97, %96 : vector<8x96xf32>
    %99 = arith.divf %97, %98 : vector<8x96xf32>
    %100 = vector.extract_strided_slice %93 {offsets = [0, 96], sizes = [8, 32], strides = [1, 1]} : vector<8x128xf32> to vector<8x32xf32>
    %101 = math.tanh %100 : vector<8x32xf32>
    %102 = vector.extract_strided_slice %99 {offsets = [0, 0], sizes = [8, 32], strides = [1, 1]} : vector<8x96xf32> to vector<8x32xf32>
    %103 = vector.extract_strided_slice %99 {offsets = [0, 32], sizes = [8, 32], strides = [1, 1]} : vector<8x96xf32> to vector<8x32xf32>
    %104 = vector.extract_strided_slice %99 {offsets = [0, 64], sizes = [8, 32], strides = [1, 1]} : vector<8x96xf32> to vector<8x32xf32>
    %105 = arith.mulf %103, %83 : vector<8x32xf32>
    %106 = arith.mulf %102, %101 : vector<8x32xf32>
    %107 = arith.addf %105, %106 : vector<8x32xf32>
    %108 = math.tanh %107 : vector<8x32xf32>
    %109 = arith.mulf %104, %108 : vector<8x32xf32>
    %c16 = arith.constant 16 : index
    %c0_24 = arith.constant 0 : index
    %110 = vector.load %arg13[%c16, %c0_24] : memref<64x32xf32, #tpu.memory_space<vmem>>, vector<8x32xf32>
    tpu.vector_store %arg13[%c16, %c0_24], %109 {strides = array<i32>} : memref<64x32xf32, #tpu.memory_space<vmem>>, vector<8x32xf32>,
    %111 = vector.extract_strided_slice %32 {offsets = [24, 0], sizes = [8, 128], strides = [1, 1]} : vector<64x128xf32> to vector<8x128xf32>
    %112 = vector.extract_strided_slice %32 {offsets = [32, 0], sizes = [8, 128], strides = [1, 1]} : vector<64x128xf32> to vector<8x128xf32>
    %113 = vector.shape_cast %22 : vector<1x128xi1> to vector<1x128xi1>
    %114 = vector.broadcast %113 : vector<1x128xi1> to vector<8x128xi1>
    %115 = arith.select %114, %111, %112 : vector<8x128xi1>, vector<8x128xf32>
    %cst_25 = arith.constant dense<0.000000e+00> : vector<8x128xf32>
    %116 = tpu.matmul %109, %0, %cst_25 {dimension_numbers = #tpu.dot_dimension_numbers<[1], [0], [0], [1], [0, 0, 1, 1], [], []>} : vector<8x32xf32>, vector<32x128xf32>, vector<8x128xf32> -> vector<8x128xf32>
    %117 = arith.addf %115, %116 : vector<8x128xf32>
    %118 = vector.extract_strided_slice %117 {offsets = [0, 0], sizes = [8, 96], strides = [1, 1]} : vector<8x128xf32> to vector<8x96xf32>
    %119 = arith.negf %118 : vector<8x96xf32>
    %120 = math.exp %119 : vector<8x96xf32>
    %cst_26 = arith.constant 1.000000e+00 : f32
    %121 = vector.broadcast %cst_26 : f32 to vector<8x96xf32>
    %122 = arith.addf %121, %120 : vector<8x96xf32>
    %123 = arith.divf %121, %122 : vector<8x96xf32>
    %124 = vector.extract_strided_slice %117 {offsets = [0, 96], sizes = [8, 32], strides = [1, 1]} : vector<8x128xf32> to vector<8x32xf32>
    %125 = math.tanh %124 : vector<8x32xf32>
    %126 = vector.extract_strided_slice %123 {offsets = [0, 0], sizes = [8, 32], strides = [1, 1]} : vector<8x96xf32> to vector<8x32xf32>
    %127 = vector.extract_strided_slice %123 {offsets = [0, 32], sizes = [8, 32], strides = [1, 1]} : vector<8x96xf32> to vector<8x32xf32>
    %128 = vector.extract_strided_slice %123 {offsets = [0, 64], sizes = [8, 32], strides = [1, 1]} : vector<8x96xf32> to vector<8x32xf32>
    %129 = arith.mulf %127, %107 : vector<8x32xf32>
    %130 = arith.mulf %126, %125 : vector<8x32xf32>
    %131 = arith.addf %129, %130 : vector<8x32xf32>
    %132 = math.tanh %131 : vector<8x32xf32>
    %133 = arith.mulf %128, %132 : vector<8x32xf32>
    %c24 = arith.constant 24 : index
    %c0_27 = arith.constant 0 : index
    %134 = vector.load %arg13[%c24, %c0_27] : memref<64x32xf32, #tpu.memory_space<vmem>>, vector<8x32xf32>
    tpu.vector_store %arg13[%c24, %c0_27], %133 {strides = array<i32>} : memref<64x32xf32, #tpu.memory_space<vmem>>, vector<8x32xf32>,
    %135 = vector.extract_strided_slice %32 {offsets = [32, 0], sizes = [8, 128], strides = [1, 1]} : vector<64x128xf32> to vector<8x128xf32>
    %136 = vector.extract_strided_slice %32 {offsets = [24, 0], sizes = [8, 128], strides = [1, 1]} : vector<64x128xf32> to vector<8x128xf32>
    %137 = vector.shape_cast %22 : vector<1x128xi1> to vector<1x128xi1>
    %138 = vector.broadcast %137 : vector<1x128xi1> to vector<8x128xi1>
    %139 = arith.select %138, %135, %136 : vector<8x128xi1>, vector<8x128xf32>
    %cst_28 = arith.constant dense<0.000000e+00> : vector<8x128xf32>
    %140 = tpu.matmul %133, %0, %cst_28 {dimension_numbers = #tpu.dot_dimension_numbers<[1], [0], [0], [1], [0, 0, 1, 1], [], []>} : vector<8x32xf32>, vector<32x128xf32>, vector<8x128xf32> -> vector<8x128xf32>
    %141 = arith.addf %139, %140 : vector<8x128xf32>
    %142 = vector.extract_strided_slice %141 {offsets = [0, 0], sizes = [8, 96], strides = [1, 1]} : vector<8x128xf32> to vector<8x96xf32>
    %143 = arith.negf %142 : vector<8x96xf32>
    %144 = math.exp %143 : vector<8x96xf32>
    %cst_29 = arith.constant 1.000000e+00 : f32
    %145 = vector.broadcast %cst_29 : f32 to vector<8x96xf32>
    %146 = arith.addf %145, %144 : vector<8x96xf32>
    %147 = arith.divf %145, %146 : vector<8x96xf32>
    %148 = vector.extract_strided_slice %141 {offsets = [0, 96], sizes = [8, 32], strides = [1, 1]} : vector<8x128xf32> to vector<8x32xf32>
    %149 = math.tanh %148 : vector<8x32xf32>
    %150 = vector.extract_strided_slice %147 {offsets = [0, 0], sizes = [8, 32], strides = [1, 1]} : vector<8x96xf32> to vector<8x32xf32>
    %151 = vector.extract_strided_slice %147 {offsets = [0, 32], sizes = [8, 32], strides = [1, 1]} : vector<8x96xf32> to vector<8x32xf32>
    %152 = vector.extract_strided_slice %147 {offsets = [0, 64], sizes = [8, 32], strides = [1, 1]} : vector<8x96xf32> to vector<8x32xf32>
    %153 = arith.mulf %151, %131 : vector<8x32xf32>
    %154 = arith.mulf %150, %149 : vector<8x32xf32>
    %155 = arith.addf %153, %154 : vector<8x32xf32>
    %156 = math.tanh %155 : vector<8x32xf32>
    %157 = arith.mulf %152, %156 : vector<8x32xf32>
    %c32 = arith.constant 32 : index
    %c0_30 = arith.constant 0 : index
    %158 = vector.load %arg13[%c32, %c0_30] : memref<64x32xf32, #tpu.memory_space<vmem>>, vector<8x32xf32>
    tpu.vector_store %arg13[%c32, %c0_30], %157 {strides = array<i32>} : memref<64x32xf32, #tpu.memory_space<vmem>>, vector<8x32xf32>,
    %159 = vector.extract_strided_slice %32 {offsets = [40, 0], sizes = [8, 128], strides = [1, 1]} : vector<64x128xf32> to vector<8x128xf32>
    %160 = vector.extract_strided_slice %32 {offsets = [16, 0], sizes = [8, 128], strides = [1, 1]} : vector<64x128xf32> to vector<8x128xf32>
    %161 = vector.shape_cast %22 : vector<1x128xi1> to vector<1x128xi1>
    %162 = vector.broadcast %161 : vector<1x128xi1> to vector<8x128xi1>
    %163 = arith.select %162, %159, %160 : vector<8x128xi1>, vector<8x128xf32>
    %cst_31 = arith.constant dense<0.000000e+00> : vector<8x128xf32>
    %164 = tpu.matmul %157, %0, %cst_31 {dimension_numbers = #tpu.dot_dimension_numbers<[1], [0], [0], [1], [0, 0, 1, 1], [], []>} : vector<8x32xf32>, vector<32x128xf32>, vector<8x128xf32> -> vector<8x128xf32>
    %165 = arith.addf %163, %164 : vector<8x128xf32>
    %166 = vector.extract_strided_slice %165 {offsets = [0, 0], sizes = [8, 96], strides = [1, 1]} : vector<8x128xf32> to vector<8x96xf32>
    %167 = arith.negf %166 : vector<8x96xf32>
    %168 = math.exp %167 : vector<8x96xf32>
    %cst_32 = arith.constant 1.000000e+00 : f32
    %169 = vector.broadcast %cst_32 : f32 to vector<8x96xf32>
    %170 = arith.addf %169, %168 : vector<8x96xf32>
    %171 = arith.divf %169, %170 : vector<8x96xf32>
    %172 = vector.extract_strided_slice %165 {offsets = [0, 96], sizes = [8, 32], strides = [1, 1]} : vector<8x128xf32> to vector<8x32xf32>
    %173 = math.tanh %172 : vector<8x32xf32>
    %174 = vector.extract_strided_slice %171 {offsets = [0, 0], sizes = [8, 32], strides = [1, 1]} : vector<8x96xf32> to vector<8x32xf32>
    %175 = vector.extract_strided_slice %171 {offsets = [0, 32], sizes = [8, 32], strides = [1, 1]} : vector<8x96xf32> to vector<8x32xf32>
    %176 = vector.extract_strided_slice %171 {offsets = [0, 64], sizes = [8, 32], strides = [1, 1]} : vector<8x96xf32> to vector<8x32xf32>
    %177 = arith.mulf %175, %155 : vector<8x32xf32>
    %178 = arith.mulf %174, %173 : vector<8x32xf32>
    %179 = arith.addf %177, %178 : vector<8x32xf32>
    %180 = math.tanh %179 : vector<8x32xf32>
    %181 = arith.mulf %176, %180 : vector<8x32xf32>
    %c40 = arith.constant 40 : index
    %c0_33 = arith.constant 0 : index
    %182 = vector.load %arg13[%c40, %c0_33] : memref<64x32xf32, #tpu.memory_space<vmem>>, vector<8x32xf32>
    tpu.vector_store %arg13[%c40, %c0_33], %181 {strides = array<i32>} : memref<64x32xf32, #tpu.memory_space<vmem>>, vector<8x32xf32>,
    %183 = vector.extract_strided_slice %32 {offsets = [48, 0], sizes = [8, 128], strides = [1, 1]} : vector<64x128xf32> to vector<8x128xf32>
    %184 = vector.extract_strided_slice %32 {offsets = [8, 0], sizes = [8, 128], strides = [1, 1]} : vector<64x128xf32> to vector<8x128xf32>
    %185 = vector.shape_cast %22 : vector<1x128xi1> to vector<1x128xi1>
    %186 = vector.broadcast %185 : vector<1x128xi1> to vector<8x128xi1>
    %187 = arith.select %186, %183, %184 : vector<8x128xi1>, vector<8x128xf32>
    %cst_34 = arith.constant dense<0.000000e+00> : vector<8x128xf32>
    %188 = tpu.matmul %181, %0, %cst_34 {dimension_numbers = #tpu.dot_dimension_numbers<[1], [0], [0], [1], [0, 0, 1, 1], [], []>} : vector<8x32xf32>, vector<32x128xf32>, vector<8x128xf32> -> vector<8x128xf32>
    %189 = arith.addf %187, %188 : vector<8x128xf32>
    %190 = vector.extract_strided_slice %189 {offsets = [0, 0], sizes = [8, 96], strides = [1, 1]} : vector<8x128xf32> to vector<8x96xf32>
    %191 = arith.negf %190 : vector<8x96xf32>
    %192 = math.exp %191 : vector<8x96xf32>
    %cst_35 = arith.constant 1.000000e+00 : f32
    %193 = vector.broadcast %cst_35 : f32 to vector<8x96xf32>
    %194 = arith.addf %193, %192 : vector<8x96xf32>
    %195 = arith.divf %193, %194 : vector<8x96xf32>
    %196 = vector.extract_strided_slice %189 {offsets = [0, 96], sizes = [8, 32], strides = [1, 1]} : vector<8x128xf32> to vector<8x32xf32>
    %197 = math.tanh %196 : vector<8x32xf32>
    %198 = vector.extract_strided_slice %195 {offsets = [0, 0], sizes = [8, 32], strides = [1, 1]} : vector<8x96xf32> to vector<8x32xf32>
    %199 = vector.extract_strided_slice %195 {offsets = [0, 32], sizes = [8, 32], strides = [1, 1]} : vector<8x96xf32> to vector<8x32xf32>
    %200 = vector.extract_strided_slice %195 {offsets = [0, 64], sizes = [8, 32], strides = [1, 1]} : vector<8x96xf32> to vector<8x32xf32>
    %201 = arith.mulf %199, %179 : vector<8x32xf32>
    %202 = arith.mulf %198, %197 : vector<8x32xf32>
    %203 = arith.addf %201, %202 : vector<8x32xf32>
    %204 = math.tanh %203 : vector<8x32xf32>
    %205 = arith.mulf %200, %204 : vector<8x32xf32>
    %c48 = arith.constant 48 : index
    %c0_36 = arith.constant 0 : index
    %206 = vector.load %arg13[%c48, %c0_36] : memref<64x32xf32, #tpu.memory_space<vmem>>, vector<8x32xf32>
    tpu.vector_store %arg13[%c48, %c0_36], %205 {strides = array<i32>} : memref<64x32xf32, #tpu.memory_space<vmem>>, vector<8x32xf32>,
    %207 = vector.extract_strided_slice %32 {offsets = [56, 0], sizes = [8, 128], strides = [1, 1]} : vector<64x128xf32> to vector<8x128xf32>
    %208 = vector.extract_strided_slice %32 {offsets = [0, 0], sizes = [8, 128], strides = [1, 1]} : vector<64x128xf32> to vector<8x128xf32>
    %209 = vector.shape_cast %22 : vector<1x128xi1> to vector<1x128xi1>
    %210 = vector.broadcast %209 : vector<1x128xi1> to vector<8x128xi1>
    %211 = arith.select %210, %207, %208 : vector<8x128xi1>, vector<8x128xf32>
    %cst_37 = arith.constant dense<0.000000e+00> : vector<8x128xf32>
    %212 = tpu.matmul %205, %0, %cst_37 {dimension_numbers = #tpu.dot_dimension_numbers<[1], [0], [0], [1], [0, 0, 1, 1], [], []>} : vector<8x32xf32>, vector<32x128xf32>, vector<8x128xf32> -> vector<8x128xf32>
    %213 = arith.addf %211, %212 : vector<8x128xf32>
    %214 = vector.extract_strided_slice %213 {offsets = [0, 0], sizes = [8, 96], strides = [1, 1]} : vector<8x128xf32> to vector<8x96xf32>
    %215 = arith.negf %214 : vector<8x96xf32>
    %216 = math.exp %215 : vector<8x96xf32>
    %cst_38 = arith.constant 1.000000e+00 : f32
    %217 = vector.broadcast %cst_38 : f32 to vector<8x96xf32>
    %218 = arith.addf %217, %216 : vector<8x96xf32>
    %219 = arith.divf %217, %218 : vector<8x96xf32>
    %220 = vector.extract_strided_slice %213 {offsets = [0, 96], sizes = [8, 32], strides = [1, 1]} : vector<8x128xf32> to vector<8x32xf32>
    %221 = math.tanh %220 : vector<8x32xf32>
    %222 = vector.extract_strided_slice %219 {offsets = [0, 0], sizes = [8, 32], strides = [1, 1]} : vector<8x96xf32> to vector<8x32xf32>
    %223 = vector.extract_strided_slice %219 {offsets = [0, 32], sizes = [8, 32], strides = [1, 1]} : vector<8x96xf32> to vector<8x32xf32>
    %224 = vector.extract_strided_slice %219 {offsets = [0, 64], sizes = [8, 32], strides = [1, 1]} : vector<8x96xf32> to vector<8x32xf32>
    %225 = arith.mulf %223, %203 : vector<8x32xf32>
    %226 = arith.mulf %222, %221 : vector<8x32xf32>
    %227 = arith.addf %225, %226 : vector<8x32xf32>
    %228 = math.tanh %227 : vector<8x32xf32>
    %229 = arith.mulf %224, %228 : vector<8x32xf32>
    %c56 = arith.constant 56 : index
    %c0_39 = arith.constant 0 : index
    %230 = vector.load %arg13[%c56, %c0_39] : memref<64x32xf32, #tpu.memory_space<vmem>>, vector<8x32xf32>
    tpu.vector_store %arg13[%c56, %c0_39], %229 {strides = array<i32>} : memref<64x32xf32, #tpu.memory_space<vmem>>, vector<8x32xf32>,
    %c0_40 = arith.constant 0 : index
    %c0_41 = arith.constant 0 : index
    %231 = vector.load %arg13[%c0_40, %c0_41] : memref<64x32xf32, #tpu.memory_space<vmem>>, vector<64x32xf32>
    %232 = vector.extract_strided_slice %231 {offsets = [56, 0], sizes = [8, 32], strides = [1, 1]} : vector<64x32xf32> to vector<8x32xf32>
    %233 = vector.extract_strided_slice %231 {offsets = [48, 0], sizes = [8, 32], strides = [1, 1]} : vector<64x32xf32> to vector<8x32xf32>
    %234 = vector.extract_strided_slice %231 {offsets = [40, 0], sizes = [8, 32], strides = [1, 1]} : vector<64x32xf32> to vector<8x32xf32>
    %235 = vector.extract_strided_slice %231 {offsets = [32, 0], sizes = [8, 32], strides = [1, 1]} : vector<64x32xf32> to vector<8x32xf32>
    %236 = vector.extract_strided_slice %231 {offsets = [24, 0], sizes = [8, 32], strides = [1, 1]} : vector<64x32xf32> to vector<8x32xf32>
    %237 = vector.extract_strided_slice %231 {offsets = [16, 0], sizes = [8, 32], strides = [1, 1]} : vector<64x32xf32> to vector<8x32xf32>
    %238 = vector.extract_strided_slice %231 {offsets = [8, 0], sizes = [8, 32], strides = [1, 1]} : vector<64x32xf32> to vector<8x32xf32>
    %239 = vector.extract_strided_slice %231 {offsets = [0, 0], sizes = [8, 32], strides = [1, 1]} : vector<64x32xf32> to vector<8x32xf32>
    %240 = tpu.concatenate %232, %233, %234, %235, %236, %237, %238, %239 in 0 : vector<8x32xf32>, vector<8x32xf32>, vector<8x32xf32>, vector<8x32xf32>, vector<8x32xf32>, vector<8x32xf32>, vector<8x32xf32>, vector<8x32xf32> -> vector<64x32xf32>
    %241 = vector.shape_cast %25 : vector<1x32xi1> to vector<1x32xi1>
    %242 = vector.broadcast %241 : vector<1x32xi1> to vector<64x32xi1>
    %243 = arith.select %242, %231, %240 : vector<64x32xi1>, vector<64x32xf32>
    %c0_42 = arith.constant 0 : index
    %c0_43 = arith.constant 0 : index
    %244 = vector.load %arg7[%c0_42, %c0_43] : memref<32x11xf32, #tpu.memory_space<vmem>>, vector<32x11xf32>
    %cst_44 = arith.constant dense<0.000000e+00> : vector<64x11xf32>
    %245 = tpu.matmul %243, %244, %cst_44 {dimension_numbers = #tpu.dot_dimension_numbers<[1], [0], [0], [1], [0, 0, 1, 1], [], []>} : vector<64x32xf32>, vector<32x11xf32>, vector<64x11xf32> -> vector<64x11xf32>
    %c0_45 = arith.constant 0 : index
    %c0_46 = arith.constant 0 : index
    %246 = vector.load %arg8[%c0_45, %c0_46] : memref<1x11xf32, #tpu.memory_space<vmem>>, vector<1x11xf32>
    %247 = vector.broadcast %246 : vector<1x11xf32> to vector<64x11xf32>
    %248 = arith.addf %245, %247 : vector<64x11xf32>
    %c0_47 = arith.constant 0 : index
    %c0_48 = arith.constant 0 : index
    %c0_49 = arith.constant 0 : index
    %249 = vector.load %arg10[%c0_47, %c0_48, %c0_49] : memref<1x64x11xf32, #tpu.memory_space<vmem>>, vector<1x64x11xf32>
    %250 = vector.shape_cast %249 : vector<1x64x11xf32> to vector<64x11xf32>
    %251 = vector.shape_cast %248 : vector<64x11xf32> to vector<1x64x11xf32>
    tpu.vector_store %arg10[%c0_47, %c0_48, %c0_49], %251 {strides = array<i32>} : memref<1x64x11xf32, #tpu.memory_space<vmem>>, vector<1x64x11xf32>,
    %252 = tpu.iota {dimensions = array<i32: 1>} : vector<1x11xi32>
    %c9_i32 = arith.constant 9 : i32
    %253 = vector.broadcast %c9_i32 : i32 to vector<1x11xi32>
    %254 = arith.cmpi eq, %252, %253 : vector<1x11xi32>
    %cst_50 = arith.constant 0.000000e+00 : f32
    %cst_51 = arith.constant -1.000000e+04 : f32
    %255 = vector.broadcast %cst_50 : f32 to vector<1x11xf32>
    %256 = vector.broadcast %cst_51 : f32 to vector<1x11xf32>
    %257 = arith.select %254, %255, %256 : vector<1x11xi1>, vector<1x11xf32>
    %258 = vector.shape_cast %257 : vector<1x11xf32> to vector<1x11xf32>
    %259 = vector.broadcast %258 : vector<1x11xf32> to vector<8x11xf32>
    %c0_52 = arith.constant 0 : index
    %c0_53 = arith.constant 0 : index
    %260 = vector.load %arg14[%c0_52, %c0_53] : memref<64x11xf32, #tpu.memory_space<vmem>>, vector<8x11xf32>
    tpu.vector_store %arg14[%c0_52, %c0_53], %259 {strides = array<i32>} : memref<64x11xf32, #tpu.memory_space<vmem>>, vector<8x11xf32>,
    %261 = vector.extract_strided_slice %1 {offsets = [0, 0], sizes = [1, 11], strides = [1, 1]} : vector<11x11xf32> to vector<1x11xf32>
    %262 = vector.broadcast %261 : vector<1x11xf32> to vector<8x11xf32>
    %263 = arith.addf %259, %262 : vector<8x11xf32>
    %cst_54 = arith.constant dense<0xFF800000> : vector<8xf32>
    %264 = vector.multi_reduction <maximumf>, %263, %cst_54 [1] : vector<8x11xf32> to vector<8xf32>
    %265 = vector.shape_cast %264 : vector<8xf32> to vector<8x1xf32>
    %266 = vector.extract_strided_slice %1 {offsets = [1, 0], sizes = [1, 11], strides = [1, 1]} : vector<11x11xf32> to vector<1x11xf32>
    %267 = vector.broadcast %266 : vector<1x11xf32> to vector<8x11xf32>
    %268 = arith.addf %259, %267 : vector<8x11xf32>
    %cst_55 = arith.constant dense<0xFF800000> : vector<8xf32>
    %269 = vector.multi_reduction <maximumf>, %268, %cst_55 [1] : vector<8x11xf32> to vector<8xf32>
    %270 = vector.shape_cast %269 : vector<8xf32> to vector<8x1xf32>
    %271 = vector.extract_strided_slice %1 {offsets = [2, 0], sizes = [1, 11], strides = [1, 1]} : vector<11x11xf32> to vector<1x11xf32>
    %272 = vector.broadcast %271 : vector<1x11xf32> to vector<8x11xf32>
    %273 = arith.addf %259, %272 : vector<8x11xf32>
    %cst_56 = arith.constant dense<0xFF800000> : vector<8xf32>
    %274 = vector.multi_reduction <maximumf>, %273, %cst_56 [1] : vector<8x11xf32> to vector<8xf32>
    %275 = vector.shape_cast %274 : vector<8xf32> to vector<8x1xf32>
    %276 = vector.extract_strided_slice %1 {offsets = [3, 0], sizes = [1, 11], strides = [1, 1]} : vector<11x11xf32> to vector<1x11xf32>
    %277 = vector.broadcast %276 : vector<1x11xf32> to vector<8x11xf32>
    %278 = arith.addf %259, %277 : vector<8x11xf32>
    %cst_57 = arith.constant dense<0xFF800000> : vector<8xf32>
    %279 = vector.multi_reduction <maximumf>, %278, %cst_57 [1] : vector<8x11xf32> to vector<8xf32>
    %280 = vector.shape_cast %279 : vector<8xf32> to vector<8x1xf32>
    %281 = vector.extract_strided_slice %1 {offsets = [4, 0], sizes = [1, 11], strides = [1, 1]} : vector<11x11xf32> to vector<1x11xf32>
    %282 = vector.broadcast %281 : vector<1x11xf32> to vector<8x11xf32>
    %283 = arith.addf %259, %282 : vector<8x11xf32>
    %cst_58 = arith.constant dense<0xFF800000> : vector<8xf32>
    %284 = vector.multi_reduction <maximumf>, %283, %cst_58 [1] : vector<8x11xf32> to vector<8xf32>
    %285 = vector.shape_cast %284 : vector<8xf32> to vector<8x1xf32>
    %286 = vector.extract_strided_slice %1 {offsets = [5, 0], sizes = [1, 11], strides = [1, 1]} : vector<11x11xf32> to vector<1x11xf32>
    %287 = vector.broadcast %286 : vector<1x11xf32> to vector<8x11xf32>
    %288 = arith.addf %259, %287 : vector<8x11xf32>
    %cst_59 = arith.constant dense<0xFF800000> : vector<8xf32>
    %289 = vector.multi_reduction <maximumf>, %288, %cst_59 [1] : vector<8x11xf32> to vector<8xf32>
    %290 = vector.shape_cast %289 : vector<8xf32> to vector<8x1xf32>
    %291 = vector.extract_strided_slice %1 {offsets = [6, 0], sizes = [1, 11], strides = [1, 1]} : vector<11x11xf32> to vector<1x11xf32>
    %292 = vector.broadcast %291 : vector<1x11xf32> to vector<8x11xf32>
    %293 = arith.addf %259, %292 : vector<8x11xf32>
    %cst_60 = arith.constant dense<0xFF800000> : vector<8xf32>
    %294 = vector.multi_reduction <maximumf>, %293, %cst_60 [1] : vector<8x11xf32> to vector<8xf32>
    %295 = vector.shape_cast %294 : vector<8xf32> to vector<8x1xf32>
    %296 = vector.extract_strided_slice %1 {offsets = [7, 0], sizes = [1, 11], strides = [1, 1]} : vector<11x11xf32> to vector<1x11xf32>
    %297 = vector.broadcast %296 : vector<1x11xf32> to vector<8x11xf32>
    %298 = arith.addf %259, %297 : vector<8x11xf32>
    %cst_61 = arith.constant dense<0xFF800000> : vector<8xf32>
    %299 = vector.multi_reduction <maximumf>, %298, %cst_61 [1] : vector<8x11xf32> to vector<8xf32>
    %300 = vector.shape_cast %299 : vector<8xf32> to vector<8x1xf32>
    %301 = vector.extract_strided_slice %1 {offsets = [8, 0], sizes = [1, 11], strides = [1, 1]} : vector<11x11xf32> to vector<1x11xf32>
    %302 = vector.broadcast %301 : vector<1x11xf32> to vector<8x11xf32>
    %303 = arith.addf %259, %302 : vector<8x11xf32>
    %cst_62 = arith.constant dense<0xFF800000> : vector<8xf32>
    %304 = vector.multi_reduction <maximumf>, %303, %cst_62 [1] : vector<8x11xf32> to vector<8xf32>
    %305 = vector.shape_cast %304 : vector<8xf32> to vector<8x1xf32>
    %306 = vector.extract_strided_slice %1 {offsets = [9, 0], sizes = [1, 11], strides = [1, 1]} : vector<11x11xf32> to vector<1x11xf32>
    %307 = vector.broadcast %306 : vector<1x11xf32> to vector<8x11xf32>
    %308 = arith.addf %259, %307 : vector<8x11xf32>
    %cst_63 = arith.constant dense<0xFF800000> : vector<8xf32>
    %309 = vector.multi_reduction <maximumf>, %308, %cst_63 [1] : vector<8x11xf32> to vector<8xf32>
    %310 = vector.shape_cast %309 : vector<8xf32> to vector<8x1xf32>
    %311 = vector.extract_strided_slice %1 {offsets = [10, 0], sizes = [1, 11], strides = [1, 1]} : vector<11x11xf32> to vector<1x11xf32>
    %312 = vector.broadcast %311 : vector<1x11xf32> to vector<8x11xf32>
    %313 = arith.addf %259, %312 : vector<8x11xf32>
    %cst_64 = arith.constant dense<0xFF800000> : vector<8xf32>
    %314 = vector.multi_reduction <maximumf>, %313, %cst_64 [1] : vector<8x11xf32> to vector<8xf32>
    %315 = vector.shape_cast %314 : vector<8xf32> to vector<8x1xf32>
    %316 = tpu.concatenate %265, %270, %275, %280, %285, %290, %295, %300, %305, %310, %315 in 1 : vector<8x1xf32>, vector<8x1xf32>, vector<8x1xf32>, vector<8x1xf32>, vector<8x1xf32>, vector<8x1xf32>, vector<8x1xf32>, vector<8x1xf32>, vector<8x1xf32>, vector<8x1xf32>, vector<8x1xf32> -> vector<8x11xf32>
    %317 = vector.extract_strided_slice %248 {offsets = [0, 0], sizes = [8, 11], strides = [1, 1]} : vector<64x11xf32> to vector<8x11xf32>
    %318 = arith.addf %316, %317 : vector<8x11xf32>
    %c8_65 = arith.constant 8 : index
    %c0_66 = arith.constant 0 : index
    %319 = vector.load %arg14[%c8_65, %c0_66] : memref<64x11xf32, #tpu.memory_space<vmem>>, vector<8x11xf32>
    tpu.vector_store %arg14[%c8_65, %c0_66], %318 {strides = array<i32>} : memref<64x11xf32, #tpu.memory_space<vmem>>, vector<8x11xf32>,
    %320 = vector.extract_strided_slice %1 {offsets = [0, 0], sizes = [1, 11], strides = [1, 1]} : vector<11x11xf32> to vector<1x11xf32>
    %321 = vector.broadcast %320 : vector<1x11xf32> to vector<8x11xf32>
    %322 = arith.addf %318, %321 : vector<8x11xf32>
    %cst_67 = arith.constant dense<0xFF800000> : vector<8xf32>
    %323 = vector.multi_reduction <maximumf>, %322, %cst_67 [1] : vector<8x11xf32> to vector<8xf32>
    %324 = vector.shape_cast %323 : vector<8xf32> to vector<8x1xf32>
    %325 = vector.extract_strided_slice %1 {offsets = [1, 0], sizes = [1, 11], strides = [1, 1]} : vector<11x11xf32> to vector<1x11xf32>
    %326 = vector.broadcast %325 : vector<1x11xf32> to vector<8x11xf32>
    %327 = arith.addf %318, %326 : vector<8x11xf32>
    %cst_68 = arith.constant dense<0xFF800000> : vector<8xf32>
    %328 = vector.multi_reduction <maximumf>, %327, %cst_68 [1] : vector<8x11xf32> to vector<8xf32>
    %329 = vector.shape_cast %328 : vector<8xf32> to vector<8x1xf32>
    %330 = vector.extract_strided_slice %1 {offsets = [2, 0], sizes = [1, 11], strides = [1, 1]} : vector<11x11xf32> to vector<1x11xf32>
    %331 = vector.broadcast %330 : vector<1x11xf32> to vector<8x11xf32>
    %332 = arith.addf %318, %331 : vector<8x11xf32>
    %cst_69 = arith.constant dense<0xFF800000> : vector<8xf32>
    %333 = vector.multi_reduction <maximumf>, %332, %cst_69 [1] : vector<8x11xf32> to vector<8xf32>
    %334 = vector.shape_cast %333 : vector<8xf32> to vector<8x1xf32>
    %335 = vector.extract_strided_slice %1 {offsets = [3, 0], sizes = [1, 11], strides = [1, 1]} : vector<11x11xf32> to vector<1x11xf32>
    %336 = vector.broadcast %335 : vector<1x11xf32> to vector<8x11xf32>
    %337 = arith.addf %318, %336 : vector<8x11xf32>
    %cst_70 = arith.constant dense<0xFF800000> : vector<8xf32>
    %338 = vector.multi_reduction <maximumf>, %337, %cst_70 [1] : vector<8x11xf32> to vector<8xf32>
    %339 = vector.shape_cast %338 : vector<8xf32> to vector<8x1xf32>
    %340 = vector.extract_strided_slice %1 {offsets = [4, 0], sizes = [1, 11], strides = [1, 1]} : vector<11x11xf32> to vector<1x11xf32>
    %341 = vector.broadcast %340 : vector<1x11xf32> to vector<8x11xf32>
    %342 = arith.addf %318, %341 : vector<8x11xf32>
    %cst_71 = arith.constant dense<0xFF800000> : vector<8xf32>
    %343 = vector.multi_reduction <maximumf>, %342, %cst_71 [1] : vector<8x11xf32> to vector<8xf32>
    %344 = vector.shape_cast %343 : vector<8xf32> to vector<8x1xf32>
    %345 = vector.extract_strided_slice %1 {offsets = [5, 0], sizes = [1, 11], strides = [1, 1]} : vector<11x11xf32> to vector<1x11xf32>
    %346 = vector.broadcast %345 : vector<1x11xf32> to vector<8x11xf32>
    %347 = arith.addf %318, %346 : vector<8x11xf32>
    %cst_72 = arith.constant dense<0xFF800000> : vector<8xf32>
    %348 = vector.multi_reduction <maximumf>, %347, %cst_72 [1] : vector<8x11xf32> to vector<8xf32>
    %349 = vector.shape_cast %348 : vector<8xf32> to vector<8x1xf32>
    %350 = vector.extract_strided_slice %1 {offsets = [6, 0], sizes = [1, 11], strides = [1, 1]} : vector<11x11xf32> to vector<1x11xf32>
    %351 = vector.broadcast %350 : vector<1x11xf32> to vector<8x11xf32>
    %352 = arith.addf %318, %351 : vector<8x11xf32>
    %cst_73 = arith.constant dense<0xFF800000> : vector<8xf32>
    %353 = vector.multi_reduction <maximumf>, %352, %cst_73 [1] : vector<8x11xf32> to vector<8xf32>
    %354 = vector.shape_cast %353 : vector<8xf32> to vector<8x1xf32>
    %355 = vector.extract_strided_slice %1 {offsets = [7, 0], sizes = [1, 11], strides = [1, 1]} : vector<11x11xf32> to vector<1x11xf32>
    %356 = vector.broadcast %355 : vector<1x11xf32> to vector<8x11xf32>
    %357 = arith.addf %318, %356 : vector<8x11xf32>
    %cst_74 = arith.constant dense<0xFF800000> : vector<8xf32>
    %358 = vector.multi_reduction <maximumf>, %357, %cst_74 [1] : vector<8x11xf32> to vector<8xf32>
    %359 = vector.shape_cast %358 : vector<8xf32> to vector<8x1xf32>
    %360 = vector.extract_strided_slice %1 {offsets = [8, 0], sizes = [1, 11], strides = [1, 1]} : vector<11x11xf32> to vector<1x11xf32>
    %361 = vector.broadcast %360 : vector<1x11xf32> to vector<8x11xf32>
    %362 = arith.addf %318, %361 : vector<8x11xf32>
    %cst_75 = arith.constant dense<0xFF800000> : vector<8xf32>
    %363 = vector.multi_reduction <maximumf>, %362, %cst_75 [1] : vector<8x11xf32> to vector<8xf32>
    %364 = vector.shape_cast %363 : vector<8xf32> to vector<8x1xf32>
    %365 = vector.extract_strided_slice %1 {offsets = [9, 0], sizes = [1, 11], strides = [1, 1]} : vector<11x11xf32> to vector<1x11xf32>
    %366 = vector.broadcast %365 : vector<1x11xf32> to vector<8x11xf32>
    %367 = arith.addf %318, %366 : vector<8x11xf32>
    %cst_76 = arith.constant dense<0xFF800000> : vector<8xf32>
    %368 = vector.multi_reduction <maximumf>, %367, %cst_76 [1] : vector<8x11xf32> to vector<8xf32>
    %369 = vector.shape_cast %368 : vector<8xf32> to vector<8x1xf32>
    %370 = vector.extract_strided_slice %1 {offsets = [10, 0], sizes = [1, 11], strides = [1, 1]} : vector<11x11xf32> to vector<1x11xf32>
    %371 = vector.broadcast %370 : vector<1x11xf32> to vector<8x11xf32>
    %372 = arith.addf %318, %371 : vector<8x11xf32>
    %cst_77 = arith.constant dense<0xFF800000> : vector<8xf32>
    %373 = vector.multi_reduction <maximumf>, %372, %cst_77 [1] : vector<8x11xf32> to vector<8xf32>
    %374 = vector.shape_cast %373 : vector<8xf32> to vector<8x1xf32>
    %375 = tpu.concatenate %324, %329, %334, %339, %344, %349, %354, %359, %364, %369, %374 in 1 : vector<8x1xf32>, vector<8x1xf32>, vector<8x1xf32>, vector<8x1xf32>, vector<8x1xf32>, vector<8x1xf32>, vector<8x1xf32>, vector<8x1xf32>, vector<8x1xf32>, vector<8x1xf32>, vector<8x1xf32> -> vector<8x11xf32>
    %376 = vector.extract_strided_slice %248 {offsets = [8, 0], sizes = [8, 11], strides = [1, 1]} : vector<64x11xf32> to vector<8x11xf32>
    %377 = arith.addf %375, %376 : vector<8x11xf32>
    %c16_78 = arith.constant 16 : index
    %c0_79 = arith.constant 0 : index
    %378 = vector.load %arg14[%c16_78, %c0_79] : memref<64x11xf32, #tpu.memory_space<vmem>>, vector<8x11xf32>
    tpu.vector_store %arg14[%c16_78, %c0_79], %377 {strides = array<i32>} : memref<64x11xf32, #tpu.memory_space<vmem>>, vector<8x11xf32>,
    %379 = vector.extract_strided_slice %1 {offsets = [0, 0], sizes = [1, 11], strides = [1, 1]} : vector<11x11xf32> to vector<1x11xf32>
    %380 = vector.broadcast %379 : vector<1x11xf32> to vector<8x11xf32>
    %381 = arith.addf %377, %380 : vector<8x11xf32>
    %cst_80 = arith.constant dense<0xFF800000> : vector<8xf32>
    %382 = vector.multi_reduction <maximumf>, %381, %cst_80 [1] : vector<8x11xf32> to vector<8xf32>
    %383 = vector.shape_cast %382 : vector<8xf32> to vector<8x1xf32>
    %384 = vector.extract_strided_slice %1 {offsets = [1, 0], sizes = [1, 11], strides = [1, 1]} : vector<11x11xf32> to vector<1x11xf32>
    %385 = vector.broadcast %384 : vector<1x11xf32> to vector<8x11xf32>
    %386 = arith.addf %377, %385 : vector<8x11xf32>
    %cst_81 = arith.constant dense<0xFF800000> : vector<8xf32>
    %387 = vector.multi_reduction <maximumf>, %386, %cst_81 [1] : vector<8x11xf32> to vector<8xf32>
    %388 = vector.shape_cast %387 : vector<8xf32> to vector<8x1xf32>
    %389 = vector.extract_strided_slice %1 {offsets = [2, 0], sizes = [1, 11], strides = [1, 1]} : vector<11x11xf32> to vector<1x11xf32>
    %390 = vector.broadcast %389 : vector<1x11xf32> to vector<8x11xf32>
    %391 = arith.addf %377, %390 : vector<8x11xf32>
    %cst_82 = arith.constant dense<0xFF800000> : vector<8xf32>
    %392 = vector.multi_reduction <maximumf>, %391, %cst_82 [1] : vector<8x11xf32> to vector<8xf32>
    %393 = vector.shape_cast %392 : vector<8xf32> to vector<8x1xf32>
    %394 = vector.extract_strided_slice %1 {offsets = [3, 0], sizes = [1, 11], strides = [1, 1]} : vector<11x11xf32> to vector<1x11xf32>
    %395 = vector.broadcast %394 : vector<1x11xf32> to vector<8x11xf32>
    %396 = arith.addf %377, %395 : vector<8x11xf32>
    %cst_83 = arith.constant dense<0xFF800000> : vector<8xf32>
    %397 = vector.multi_reduction <maximumf>, %396, %cst_83 [1] : vector<8x11xf32> to vector<8xf32>
    %398 = vector.shape_cast %397 : vector<8xf32> to vector<8x1xf32>
    %399 = vector.extract_strided_slice %1 {offsets = [4, 0], sizes = [1, 11], strides = [1, 1]} : vector<11x11xf32> to vector<1x11xf32>
    %400 = vector.broadcast %399 : vector<1x11xf32> to vector<8x11xf32>
    %401 = arith.addf %377, %400 : vector<8x11xf32>
    %cst_84 = arith.constant dense<0xFF800000> : vector<8xf32>
    %402 = vector.multi_reduction <maximumf>, %401, %cst_84 [1] : vector<8x11xf32> to vector<8xf32>
    %403 = vector.shape_cast %402 : vector<8xf32> to vector<8x1xf32>
    %404 = vector.extract_strided_slice %1 {offsets = [5, 0], sizes = [1, 11], strides = [1, 1]} : vector<11x11xf32> to vector<1x11xf32>
    %405 = vector.broadcast %404 : vector<1x11xf32> to vector<8x11xf32>
    %406 = arith.addf %377, %405 : vector<8x11xf32>
    %cst_85 = arith.constant dense<0xFF800000> : vector<8xf32>
    %407 = vector.multi_reduction <maximumf>, %406, %cst_85 [1] : vector<8x11xf32> to vector<8xf32>
    %408 = vector.shape_cast %407 : vector<8xf32> to vector<8x1xf32>
    %409 = vector.extract_strided_slice %1 {offsets = [6, 0], sizes = [1, 11], strides = [1, 1]} : vector<11x11xf32> to vector<1x11xf32>
    %410 = vector.broadcast %409 : vector<1x11xf32> to vector<8x11xf32>
    %411 = arith.addf %377, %410 : vector<8x11xf32>
    %cst_86 = arith.constant dense<0xFF800000> : vector<8xf32>
    %412 = vector.multi_reduction <maximumf>, %411, %cst_86 [1] : vector<8x11xf32> to vector<8xf32>
    %413 = vector.shape_cast %412 : vector<8xf32> to vector<8x1xf32>
    %414 = vector.extract_strided_slice %1 {offsets = [7, 0], sizes = [1, 11], strides = [1, 1]} : vector<11x11xf32> to vector<1x11xf32>
    %415 = vector.broadcast %414 : vector<1x11xf32> to vector<8x11xf32>
    %416 = arith.addf %377, %415 : vector<8x11xf32>
    %cst_87 = arith.constant dense<0xFF800000> : vector<8xf32>
    %417 = vector.multi_reduction <maximumf>, %416, %cst_87 [1] : vector<8x11xf32> to vector<8xf32>
    %418 = vector.shape_cast %417 : vector<8xf32> to vector<8x1xf32>
    %419 = vector.extract_strided_slice %1 {offsets = [8, 0], sizes = [1, 11], strides = [1, 1]} : vector<11x11xf32> to vector<1x11xf32>
    %420 = vector.broadcast %419 : vector<1x11xf32> to vector<8x11xf32>
    %421 = arith.addf %377, %420 : vector<8x11xf32>
    %cst_88 = arith.constant dense<0xFF800000> : vector<8xf32>
    %422 = vector.multi_reduction <maximumf>, %421, %cst_88 [1] : vector<8x11xf32> to vector<8xf32>
    %423 = vector.shape_cast %422 : vector<8xf32> to vector<8x1xf32>
    %424 = vector.extract_strided_slice %1 {offsets = [9, 0], sizes = [1, 11], strides = [1, 1]} : vector<11x11xf32> to vector<1x11xf32>
    %425 = vector.broadcast %424 : vector<1x11xf32> to vector<8x11xf32>
    %426 = arith.addf %377, %425 : vector<8x11xf32>
    %cst_89 = arith.constant dense<0xFF800000> : vector<8xf32>
    %427 = vector.multi_reduction <maximumf>, %426, %cst_89 [1] : vector<8x11xf32> to vector<8xf32>
    %428 = vector.shape_cast %427 : vector<8xf32> to vector<8x1xf32>
    %429 = vector.extract_strided_slice %1 {offsets = [10, 0], sizes = [1, 11], strides = [1, 1]} : vector<11x11xf32> to vector<1x11xf32>
    %430 = vector.broadcast %429 : vector<1x11xf32> to vector<8x11xf32>
    %431 = arith.addf %377, %430 : vector<8x11xf32>
    %cst_90 = arith.constant dense<0xFF800000> : vector<8xf32>
    %432 = vector.multi_reduction <maximumf>, %431, %cst_90 [1] : vector<8x11xf32> to vector<8xf32>
    %433 = vector.shape_cast %432 : vector<8xf32> to vector<8x1xf32>
    %434 = tpu.concatenate %383, %388, %393, %398, %403, %408, %413, %418, %423, %428, %433 in 1 : vector<8x1xf32>, vector<8x1xf32>, vector<8x1xf32>, vector<8x1xf32>, vector<8x1xf32>, vector<8x1xf32>, vector<8x1xf32>, vector<8x1xf32>, vector<8x1xf32>, vector<8x1xf32>, vector<8x1xf32> -> vector<8x11xf32>
    %435 = vector.extract_strided_slice %248 {offsets = [16, 0], sizes = [8, 11], strides = [1, 1]} : vector<64x11xf32> to vector<8x11xf32>
    %436 = arith.addf %434, %435 : vector<8x11xf32>
    %c24_91 = arith.constant 24 : index
    %c0_92 = arith.constant 0 : index
    %437 = vector.load %arg14[%c24_91, %c0_92] : memref<64x11xf32, #tpu.memory_space<vmem>>, vector<8x11xf32>
    tpu.vector_store %arg14[%c24_91, %c0_92], %436 {strides = array<i32>} : memref<64x11xf32, #tpu.memory_space<vmem>>, vector<8x11xf32>,
    %438 = vector.extract_strided_slice %1 {offsets = [0, 0], sizes = [1, 11], strides = [1, 1]} : vector<11x11xf32> to vector<1x11xf32>
    %439 = vector.broadcast %438 : vector<1x11xf32> to vector<8x11xf32>
    %440 = arith.addf %436, %439 : vector<8x11xf32>
    %cst_93 = arith.constant dense<0xFF800000> : vector<8xf32>
    %441 = vector.multi_reduction <maximumf>, %440, %cst_93 [1] : vector<8x11xf32> to vector<8xf32>
    %442 = vector.shape_cast %441 : vector<8xf32> to vector<8x1xf32>
    %443 = vector.extract_strided_slice %1 {offsets = [1, 0], sizes = [1, 11], strides = [1, 1]} : vector<11x11xf32> to vector<1x11xf32>
    %444 = vector.broadcast %443 : vector<1x11xf32> to vector<8x11xf32>
    %445 = arith.addf %436, %444 : vector<8x11xf32>
    %cst_94 = arith.constant dense<0xFF800000> : vector<8xf32>
    %446 = vector.multi_reduction <maximumf>, %445, %cst_94 [1] : vector<8x11xf32> to vector<8xf32>
    %447 = vector.shape_cast %446 : vector<8xf32> to vector<8x1xf32>
    %448 = vector.extract_strided_slice %1 {offsets = [2, 0], sizes = [1, 11], strides = [1, 1]} : vector<11x11xf32> to vector<1x11xf32>
    %449 = vector.broadcast %448 : vector<1x11xf32> to vector<8x11xf32>
    %450 = arith.addf %436, %449 : vector<8x11xf32>
    %cst_95 = arith.constant dense<0xFF800000> : vector<8xf32>
    %451 = vector.multi_reduction <maximumf>, %450, %cst_95 [1] : vector<8x11xf32> to vector<8xf32>
    %452 = vector.shape_cast %451 : vector<8xf32> to vector<8x1xf32>
    %453 = vector.extract_strided_slice %1 {offsets = [3, 0], sizes = [1, 11], strides = [1, 1]} : vector<11x11xf32> to vector<1x11xf32>
    %454 = vector.broadcast %453 : vector<1x11xf32> to vector<8x11xf32>
    %455 = arith.addf %436, %454 : vector<8x11xf32>
    %cst_96 = arith.constant dense<0xFF800000> : vector<8xf32>
    %456 = vector.multi_reduction <maximumf>, %455, %cst_96 [1] : vector<8x11xf32> to vector<8xf32>
    %457 = vector.shape_cast %456 : vector<8xf32> to vector<8x1xf32>
    %458 = vector.extract_strided_slice %1 {offsets = [4, 0], sizes = [1, 11], strides = [1, 1]} : vector<11x11xf32> to vector<1x11xf32>
    %459 = vector.broadcast %458 : vector<1x11xf32> to vector<8x11xf32>
    %460 = arith.addf %436, %459 : vector<8x11xf32>
    %cst_97 = arith.constant dense<0xFF800000> : vector<8xf32>
    %461 = vector.multi_reduction <maximumf>, %460, %cst_97 [1] : vector<8x11xf32> to vector<8xf32>
    %462 = vector.shape_cast %461 : vector<8xf32> to vector<8x1xf32>
    %463 = vector.extract_strided_slice %1 {offsets = [5, 0], sizes = [1, 11], strides = [1, 1]} : vector<11x11xf32> to vector<1x11xf32>
    %464 = vector.broadcast %463 : vector<1x11xf32> to vector<8x11xf32>
    %465 = arith.addf %436, %464 : vector<8x11xf32>
    %cst_98 = arith.constant dense<0xFF800000> : vector<8xf32>
    %466 = vector.multi_reduction <maximumf>, %465, %cst_98 [1] : vector<8x11xf32> to vector<8xf32>
    %467 = vector.shape_cast %466 : vector<8xf32> to vector<8x1xf32>
    %468 = vector.extract_strided_slice %1 {offsets = [6, 0], sizes = [1, 11], strides = [1, 1]} : vector<11x11xf32> to vector<1x11xf32>
    %469 = vector.broadcast %468 : vector<1x11xf32> to vector<8x11xf32>
    %470 = arith.addf %436, %469 : vector<8x11xf32>
    %cst_99 = arith.constant dense<0xFF800000> : vector<8xf32>
    %471 = vector.multi_reduction <maximumf>, %470, %cst_99 [1] : vector<8x11xf32> to vector<8xf32>
    %472 = vector.shape_cast %471 : vector<8xf32> to vector<8x1xf32>
    %473 = vector.extract_strided_slice %1 {offsets = [7, 0], sizes = [1, 11], strides = [1, 1]} : vector<11x11xf32> to vector<1x11xf32>
    %474 = vector.broadcast %473 : vector<1x11xf32> to vector<8x11xf32>
    %475 = arith.addf %436, %474 : vector<8x11xf32>
    %cst_100 = arith.constant dense<0xFF800000> : vector<8xf32>
    %476 = vector.multi_reduction <maximumf>, %475, %cst_100 [1] : vector<8x11xf32> to vector<8xf32>
    %477 = vector.shape_cast %476 : vector<8xf32> to vector<8x1xf32>
    %478 = vector.extract_strided_slice %1 {offsets = [8, 0], sizes = [1, 11], strides = [1, 1]} : vector<11x11xf32> to vector<1x11xf32>
    %479 = vector.broadcast %478 : vector<1x11xf32> to vector<8x11xf32>
    %480 = arith.addf %436, %479 : vector<8x11xf32>
    %cst_101 = arith.constant dense<0xFF800000> : vector<8xf32>
    %481 = vector.multi_reduction <maximumf>, %480, %cst_101 [1] : vector<8x11xf32> to vector<8xf32>
    %482 = vector.shape_cast %481 : vector<8xf32> to vector<8x1xf32>
    %483 = vector.extract_strided_slice %1 {offsets = [9, 0], sizes = [1, 11], strides = [1, 1]} : vector<11x11xf32> to vector<1x11xf32>
    %484 = vector.broadcast %483 : vector<1x11xf32> to vector<8x11xf32>
    %485 = arith.addf %436, %484 : vector<8x11xf32>
    %cst_102 = arith.constant dense<0xFF800000> : vector<8xf32>
    %486 = vector.multi_reduction <maximumf>, %485, %cst_102 [1] : vector<8x11xf32> to vector<8xf32>
    %487 = vector.shape_cast %486 : vector<8xf32> to vector<8x1xf32>
    %488 = vector.extract_strided_slice %1 {offsets = [10, 0], sizes = [1, 11], strides = [1, 1]} : vector<11x11xf32> to vector<1x11xf32>
    %489 = vector.broadcast %488 : vector<1x11xf32> to vector<8x11xf32>
    %490 = arith.addf %436, %489 : vector<8x11xf32>
    %cst_103 = arith.constant dense<0xFF800000> : vector<8xf32>
    %491 = vector.multi_reduction <maximumf>, %490, %cst_103 [1] : vector<8x11xf32> to vector<8xf32>
    %492 = vector.shape_cast %491 : vector<8xf32> to vector<8x1xf32>
    %493 = tpu.concatenate %442, %447, %452, %457, %462, %467, %472, %477, %482, %487, %492 in 1 : vector<8x1xf32>, vector<8x1xf32>, vector<8x1xf32>, vector<8x1xf32>, vector<8x1xf32>, vector<8x1xf32>, vector<8x1xf32>, vector<8x1xf32>, vector<8x1xf32>, vector<8x1xf32>, vector<8x1xf32> -> vector<8x11xf32>
    %494 = vector.extract_strided_slice %248 {offsets = [24, 0], sizes = [8, 11], strides = [1, 1]} : vector<64x11xf32> to vector<8x11xf32>
    %495 = arith.addf %493, %494 : vector<8x11xf32>
    %c32_104 = arith.constant 32 : index
    %c0_105 = arith.constant 0 : index
    %496 = vector.load %arg14[%c32_104, %c0_105] : memref<64x11xf32, #tpu.memory_space<vmem>>, vector<8x11xf32>
    tpu.vector_store %arg14[%c32_104, %c0_105], %495 {strides = array<i32>} : memref<64x11xf32, #tpu.memory_space<vmem>>, vector<8x11xf32>,
    %497 = vector.extract_strided_slice %1 {offsets = [0, 0], sizes = [1, 11], strides = [1, 1]} : vector<11x11xf32> to vector<1x11xf32>
    %498 = vector.broadcast %497 : vector<1x11xf32> to vector<8x11xf32>
    %499 = arith.addf %495, %498 : vector<8x11xf32>
    %cst_106 = arith.constant dense<0xFF800000> : vector<8xf32>
    %500 = vector.multi_reduction <maximumf>, %499, %cst_106 [1] : vector<8x11xf32> to vector<8xf32>
    %501 = vector.shape_cast %500 : vector<8xf32> to vector<8x1xf32>
    %502 = vector.extract_strided_slice %1 {offsets = [1, 0], sizes = [1, 11], strides = [1, 1]} : vector<11x11xf32> to vector<1x11xf32>
    %503 = vector.broadcast %502 : vector<1x11xf32> to vector<8x11xf32>
    %504 = arith.addf %495, %503 : vector<8x11xf32>
    %cst_107 = arith.constant dense<0xFF800000> : vector<8xf32>
    %505 = vector.multi_reduction <maximumf>, %504, %cst_107 [1] : vector<8x11xf32> to vector<8xf32>
    %506 = vector.shape_cast %505 : vector<8xf32> to vector<8x1xf32>
    %507 = vector.extract_strided_slice %1 {offsets = [2, 0], sizes = [1, 11], strides = [1, 1]} : vector<11x11xf32> to vector<1x11xf32>
    %508 = vector.broadcast %507 : vector<1x11xf32> to vector<8x11xf32>
    %509 = arith.addf %495, %508 : vector<8x11xf32>
    %cst_108 = arith.constant dense<0xFF800000> : vector<8xf32>
    %510 = vector.multi_reduction <maximumf>, %509, %cst_108 [1] : vector<8x11xf32> to vector<8xf32>
    %511 = vector.shape_cast %510 : vector<8xf32> to vector<8x1xf32>
    %512 = vector.extract_strided_slice %1 {offsets = [3, 0], sizes = [1, 11], strides = [1, 1]} : vector<11x11xf32> to vector<1x11xf32>
    %513 = vector.broadcast %512 : vector<1x11xf32> to vector<8x11xf32>
    %514 = arith.addf %495, %513 : vector<8x11xf32>
    %cst_109 = arith.constant dense<0xFF800000> : vector<8xf32>
    %515 = vector.multi_reduction <maximumf>, %514, %cst_109 [1] : vector<8x11xf32> to vector<8xf32>
    %516 = vector.shape_cast %515 : vector<8xf32> to vector<8x1xf32>
    %517 = vector.extract_strided_slice %1 {offsets = [4, 0], sizes = [1, 11], strides = [1, 1]} : vector<11x11xf32> to vector<1x11xf32>
    %518 = vector.broadcast %517 : vector<1x11xf32> to vector<8x11xf32>
    %519 = arith.addf %495, %518 : vector<8x11xf32>
    %cst_110 = arith.constant dense<0xFF800000> : vector<8xf32>
    %520 = vector.multi_reduction <maximumf>, %519, %cst_110 [1] : vector<8x11xf32> to vector<8xf32>
    %521 = vector.shape_cast %520 : vector<8xf32> to vector<8x1xf32>
    %522 = vector.extract_strided_slice %1 {offsets = [5, 0], sizes = [1, 11], strides = [1, 1]} : vector<11x11xf32> to vector<1x11xf32>
    %523 = vector.broadcast %522 : vector<1x11xf32> to vector<8x11xf32>
    %524 = arith.addf %495, %523 : vector<8x11xf32>
    %cst_111 = arith.constant dense<0xFF800000> : vector<8xf32>
    %525 = vector.multi_reduction <maximumf>, %524, %cst_111 [1] : vector<8x11xf32> to vector<8xf32>
    %526 = vector.shape_cast %525 : vector<8xf32> to vector<8x1xf32>
    %527 = vector.extract_strided_slice %1 {offsets = [6, 0], sizes = [1, 11], strides = [1, 1]} : vector<11x11xf32> to vector<1x11xf32>
    %528 = vector.broadcast %527 : vector<1x11xf32> to vector<8x11xf32>
    %529 = arith.addf %495, %528 : vector<8x11xf32>
    %cst_112 = arith.constant dense<0xFF800000> : vector<8xf32>
    %530 = vector.multi_reduction <maximumf>, %529, %cst_112 [1] : vector<8x11xf32> to vector<8xf32>
    %531 = vector.shape_cast %530 : vector<8xf32> to vector<8x1xf32>
    %532 = vector.extract_strided_slice %1 {offsets = [7, 0], sizes = [1, 11], strides = [1, 1]} : vector<11x11xf32> to vector<1x11xf32>
    %533 = vector.broadcast %532 : vector<1x11xf32> to vector<8x11xf32>
    %534 = arith.addf %495, %533 : vector<8x11xf32>
    %cst_113 = arith.constant dense<0xFF800000> : vector<8xf32>
    %535 = vector.multi_reduction <maximumf>, %534, %cst_113 [1] : vector<8x11xf32> to vector<8xf32>
    %536 = vector.shape_cast %535 : vector<8xf32> to vector<8x1xf32>
    %537 = vector.extract_strided_slice %1 {offsets = [8, 0], sizes = [1, 11], strides = [1, 1]} : vector<11x11xf32> to vector<1x11xf32>
    %538 = vector.broadcast %537 : vector<1x11xf32> to vector<8x11xf32>
    %539 = arith.addf %495, %538 : vector<8x11xf32>
    %cst_114 = arith.constant dense<0xFF800000> : vector<8xf32>
    %540 = vector.multi_reduction <maximumf>, %539, %cst_114 [1] : vector<8x11xf32> to vector<8xf32>
    %541 = vector.shape_cast %540 : vector<8xf32> to vector<8x1xf32>
    %542 = vector.extract_strided_slice %1 {offsets = [9, 0], sizes = [1, 11], strides = [1, 1]} : vector<11x11xf32> to vector<1x11xf32>
    %543 = vector.broadcast %542 : vector<1x11xf32> to vector<8x11xf32>
    %544 = arith.addf %495, %543 : vector<8x11xf32>
    %cst_115 = arith.constant dense<0xFF800000> : vector<8xf32>
    %545 = vector.multi_reduction <maximumf>, %544, %cst_115 [1] : vector<8x11xf32> to vector<8xf32>
    %546 = vector.shape_cast %545 : vector<8xf32> to vector<8x1xf32>
    %547 = vector.extract_strided_slice %1 {offsets = [10, 0], sizes = [1, 11], strides = [1, 1]} : vector<11x11xf32> to vector<1x11xf32>
    %548 = vector.broadcast %547 : vector<1x11xf32> to vector<8x11xf32>
    %549 = arith.addf %495, %548 : vector<8x11xf32>
    %cst_116 = arith.constant dense<0xFF800000> : vector<8xf32>
    %550 = vector.multi_reduction <maximumf>, %549, %cst_116 [1] : vector<8x11xf32> to vector<8xf32>
    %551 = vector.shape_cast %550 : vector<8xf32> to vector<8x1xf32>
    %552 = tpu.concatenate %501, %506, %511, %516, %521, %526, %531, %536, %541, %546, %551 in 1 : vector<8x1xf32>, vector<8x1xf32>, vector<8x1xf32>, vector<8x1xf32>, vector<8x1xf32>, vector<8x1xf32>, vector<8x1xf32>, vector<8x1xf32>, vector<8x1xf32>, vector<8x1xf32>, vector<8x1xf32> -> vector<8x11xf32>
    %553 = vector.extract_strided_slice %248 {offsets = [32, 0], sizes = [8, 11], strides = [1, 1]} : vector<64x11xf32> to vector<8x11xf32>
    %554 = arith.addf %552, %553 : vector<8x11xf32>
    %c40_117 = arith.constant 40 : index
    %c0_118 = arith.constant 0 : index
    %555 = vector.load %arg14[%c40_117, %c0_118] : memref<64x11xf32, #tpu.memory_space<vmem>>, vector<8x11xf32>
    tpu.vector_store %arg14[%c40_117, %c0_118], %554 {strides = array<i32>} : memref<64x11xf32, #tpu.memory_space<vmem>>, vector<8x11xf32>,
    %556 = vector.extract_strided_slice %1 {offsets = [0, 0], sizes = [1, 11], strides = [1, 1]} : vector<11x11xf32> to vector<1x11xf32>
    %557 = vector.broadcast %556 : vector<1x11xf32> to vector<8x11xf32>
    %558 = arith.addf %554, %557 : vector<8x11xf32>
    %cst_119 = arith.constant dense<0xFF800000> : vector<8xf32>
    %559 = vector.multi_reduction <maximumf>, %558, %cst_119 [1] : vector<8x11xf32> to vector<8xf32>
    %560 = vector.shape_cast %559 : vector<8xf32> to vector<8x1xf32>
    %561 = vector.extract_strided_slice %1 {offsets = [1, 0], sizes = [1, 11], strides = [1, 1]} : vector<11x11xf32> to vector<1x11xf32>
    %562 = vector.broadcast %561 : vector<1x11xf32> to vector<8x11xf32>
    %563 = arith.addf %554, %562 : vector<8x11xf32>
    %cst_120 = arith.constant dense<0xFF800000> : vector<8xf32>
    %564 = vector.multi_reduction <maximumf>, %563, %cst_120 [1] : vector<8x11xf32> to vector<8xf32>
    %565 = vector.shape_cast %564 : vector<8xf32> to vector<8x1xf32>
    %566 = vector.extract_strided_slice %1 {offsets = [2, 0], sizes = [1, 11], strides = [1, 1]} : vector<11x11xf32> to vector<1x11xf32>
    %567 = vector.broadcast %566 : vector<1x11xf32> to vector<8x11xf32>
    %568 = arith.addf %554, %567 : vector<8x11xf32>
    %cst_121 = arith.constant dense<0xFF800000> : vector<8xf32>
    %569 = vector.multi_reduction <maximumf>, %568, %cst_121 [1] : vector<8x11xf32> to vector<8xf32>
    %570 = vector.shape_cast %569 : vector<8xf32> to vector<8x1xf32>
    %571 = vector.extract_strided_slice %1 {offsets = [3, 0], sizes = [1, 11], strides = [1, 1]} : vector<11x11xf32> to vector<1x11xf32>
    %572 = vector.broadcast %571 : vector<1x11xf32> to vector<8x11xf32>
    %573 = arith.addf %554, %572 : vector<8x11xf32>
    %cst_122 = arith.constant dense<0xFF800000> : vector<8xf32>
    %574 = vector.multi_reduction <maximumf>, %573, %cst_122 [1] : vector<8x11xf32> to vector<8xf32>
    %575 = vector.shape_cast %574 : vector<8xf32> to vector<8x1xf32>
    %576 = vector.extract_strided_slice %1 {offsets = [4, 0], sizes = [1, 11], strides = [1, 1]} : vector<11x11xf32> to vector<1x11xf32>
    %577 = vector.broadcast %576 : vector<1x11xf32> to vector<8x11xf32>
    %578 = arith.addf %554, %577 : vector<8x11xf32>
    %cst_123 = arith.constant dense<0xFF800000> : vector<8xf32>
    %579 = vector.multi_reduction <maximumf>, %578, %cst_123 [1] : vector<8x11xf32> to vector<8xf32>
    %580 = vector.shape_cast %579 : vector<8xf32> to vector<8x1xf32>
    %581 = vector.extract_strided_slice %1 {offsets = [5, 0], sizes = [1, 11], strides = [1, 1]} : vector<11x11xf32> to vector<1x11xf32>
    %582 = vector.broadcast %581 : vector<1x11xf32> to vector<8x11xf32>
    %583 = arith.addf %554, %582 : vector<8x11xf32>
    %cst_124 = arith.constant dense<0xFF800000> : vector<8xf32>
    %584 = vector.multi_reduction <maximumf>, %583, %cst_124 [1] : vector<8x11xf32> to vector<8xf32>
    %585 = vector.shape_cast %584 : vector<8xf32> to vector<8x1xf32>
    %586 = vector.extract_strided_slice %1 {offsets = [6, 0], sizes = [1, 11], strides = [1, 1]} : vector<11x11xf32> to vector<1x11xf32>
    %587 = vector.broadcast %586 : vector<1x11xf32> to vector<8x11xf32>
    %588 = arith.addf %554, %587 : vector<8x11xf32>
    %cst_125 = arith.constant dense<0xFF800000> : vector<8xf32>
    %589 = vector.multi_reduction <maximumf>, %588, %cst_125 [1] : vector<8x11xf32> to vector<8xf32>
    %590 = vector.shape_cast %589 : vector<8xf32> to vector<8x1xf32>
    %591 = vector.extract_strided_slice %1 {offsets = [7, 0], sizes = [1, 11], strides = [1, 1]} : vector<11x11xf32> to vector<1x11xf32>
    %592 = vector.broadcast %591 : vector<1x11xf32> to vector<8x11xf32>
    %593 = arith.addf %554, %592 : vector<8x11xf32>
    %cst_126 = arith.constant dense<0xFF800000> : vector<8xf32>
    %594 = vector.multi_reduction <maximumf>, %593, %cst_126 [1] : vector<8x11xf32> to vector<8xf32>
    %595 = vector.shape_cast %594 : vector<8xf32> to vector<8x1xf32>
    %596 = vector.extract_strided_slice %1 {offsets = [8, 0], sizes = [1, 11], strides = [1, 1]} : vector<11x11xf32> to vector<1x11xf32>
    %597 = vector.broadcast %596 : vector<1x11xf32> to vector<8x11xf32>
    %598 = arith.addf %554, %597 : vector<8x11xf32>
    %cst_127 = arith.constant dense<0xFF800000> : vector<8xf32>
    %599 = vector.multi_reduction <maximumf>, %598, %cst_127 [1] : vector<8x11xf32> to vector<8xf32>
    %600 = vector.shape_cast %599 : vector<8xf32> to vector<8x1xf32>
    %601 = vector.extract_strided_slice %1 {offsets = [9, 0], sizes = [1, 11], strides = [1, 1]} : vector<11x11xf32> to vector<1x11xf32>
    %602 = vector.broadcast %601 : vector<1x11xf32> to vector<8x11xf32>
    %603 = arith.addf %554, %602 : vector<8x11xf32>
    %cst_128 = arith.constant dense<0xFF800000> : vector<8xf32>
    %604 = vector.multi_reduction <maximumf>, %603, %cst_128 [1] : vector<8x11xf32> to vector<8xf32>
    %605 = vector.shape_cast %604 : vector<8xf32> to vector<8x1xf32>
    %606 = vector.extract_strided_slice %1 {offsets = [10, 0], sizes = [1, 11], strides = [1, 1]} : vector<11x11xf32> to vector<1x11xf32>
    %607 = vector.broadcast %606 : vector<1x11xf32> to vector<8x11xf32>
    %608 = arith.addf %554, %607 : vector<8x11xf32>
    %cst_129 = arith.constant dense<0xFF800000> : vector<8xf32>
    %609 = vector.multi_reduction <maximumf>, %608, %cst_129 [1] : vector<8x11xf32> to vector<8xf32>
    %610 = vector.shape_cast %609 : vector<8xf32> to vector<8x1xf32>
    %611 = tpu.concatenate %560, %565, %570, %575, %580, %585, %590, %595, %600, %605, %610 in 1 : vector<8x1xf32>, vector<8x1xf32>, vector<8x1xf32>, vector<8x1xf32>, vector<8x1xf32>, vector<8x1xf32>, vector<8x1xf32>, vector<8x1xf32>, vector<8x1xf32>, vector<8x1xf32>, vector<8x1xf32> -> vector<8x11xf32>
    %612 = vector.extract_strided_slice %248 {offsets = [40, 0], sizes = [8, 11], strides = [1, 1]} : vector<64x11xf32> to vector<8x11xf32>
    %613 = arith.addf %611, %612 : vector<8x11xf32>
    %c48_130 = arith.constant 48 : index
    %c0_131 = arith.constant 0 : index
    %614 = vector.load %arg14[%c48_130, %c0_131] : memref<64x11xf32, #tpu.memory_space<vmem>>, vector<8x11xf32>
    tpu.vector_store %arg14[%c48_130, %c0_131], %613 {strides = array<i32>} : memref<64x11xf32, #tpu.memory_space<vmem>>, vector<8x11xf32>,
    %615 = vector.extract_strided_slice %1 {offsets = [0, 0], sizes = [1, 11], strides = [1, 1]} : vector<11x11xf32> to vector<1x11xf32>
    %616 = vector.broadcast %615 : vector<1x11xf32> to vector<8x11xf32>
    %617 = arith.addf %613, %616 : vector<8x11xf32>
    %cst_132 = arith.constant dense<0xFF800000> : vector<8xf32>
    %618 = vector.multi_reduction <maximumf>, %617, %cst_132 [1] : vector<8x11xf32> to vector<8xf32>
    %619 = vector.shape_cast %618 : vector<8xf32> to vector<8x1xf32>
    %620 = vector.extract_strided_slice %1 {offsets = [1, 0], sizes = [1, 11], strides = [1, 1]} : vector<11x11xf32> to vector<1x11xf32>
    %621 = vector.broadcast %620 : vector<1x11xf32> to vector<8x11xf32>
    %622 = arith.addf %613, %621 : vector<8x11xf32>
    %cst_133 = arith.constant dense<0xFF800000> : vector<8xf32>
    %623 = vector.multi_reduction <maximumf>, %622, %cst_133 [1] : vector<8x11xf32> to vector<8xf32>
    %624 = vector.shape_cast %623 : vector<8xf32> to vector<8x1xf32>
    %625 = vector.extract_strided_slice %1 {offsets = [2, 0], sizes = [1, 11], strides = [1, 1]} : vector<11x11xf32> to vector<1x11xf32>
    %626 = vector.broadcast %625 : vector<1x11xf32> to vector<8x11xf32>
    %627 = arith.addf %613, %626 : vector<8x11xf32>
    %cst_134 = arith.constant dense<0xFF800000> : vector<8xf32>
    %628 = vector.multi_reduction <maximumf>, %627, %cst_134 [1] : vector<8x11xf32> to vector<8xf32>
    %629 = vector.shape_cast %628 : vector<8xf32> to vector<8x1xf32>
    %630 = vector.extract_strided_slice %1 {offsets = [3, 0], sizes = [1, 11], strides = [1, 1]} : vector<11x11xf32> to vector<1x11xf32>
    %631 = vector.broadcast %630 : vector<1x11xf32> to vector<8x11xf32>
    %632 = arith.addf %613, %631 : vector<8x11xf32>
    %cst_135 = arith.constant dense<0xFF800000> : vector<8xf32>
    %633 = vector.multi_reduction <maximumf>, %632, %cst_135 [1] : vector<8x11xf32> to vector<8xf32>
    %634 = vector.shape_cast %633 : vector<8xf32> to vector<8x1xf32>
    %635 = vector.extract_strided_slice %1 {offsets = [4, 0], sizes = [1, 11], strides = [1, 1]} : vector<11x11xf32> to vector<1x11xf32>
    %636 = vector.broadcast %635 : vector<1x11xf32> to vector<8x11xf32>
    %637 = arith.addf %613, %636 : vector<8x11xf32>
    %cst_136 = arith.constant dense<0xFF800000> : vector<8xf32>
    %638 = vector.multi_reduction <maximumf>, %637, %cst_136 [1] : vector<8x11xf32> to vector<8xf32>
    %639 = vector.shape_cast %638 : vector<8xf32> to vector<8x1xf32>
    %640 = vector.extract_strided_slice %1 {offsets = [5, 0], sizes = [1, 11], strides = [1, 1]} : vector<11x11xf32> to vector<1x11xf32>
    %641 = vector.broadcast %640 : vector<1x11xf32> to vector<8x11xf32>
    %642 = arith.addf %613, %641 : vector<8x11xf32>
    %cst_137 = arith.constant dense<0xFF800000> : vector<8xf32>
    %643 = vector.multi_reduction <maximumf>, %642, %cst_137 [1] : vector<8x11xf32> to vector<8xf32>
    %644 = vector.shape_cast %643 : vector<8xf32> to vector<8x1xf32>
    %645 = vector.extract_strided_slice %1 {offsets = [6, 0], sizes = [1, 11], strides = [1, 1]} : vector<11x11xf32> to vector<1x11xf32>
    %646 = vector.broadcast %645 : vector<1x11xf32> to vector<8x11xf32>
    %647 = arith.addf %613, %646 : vector<8x11xf32>
    %cst_138 = arith.constant dense<0xFF800000> : vector<8xf32>
    %648 = vector.multi_reduction <maximumf>, %647, %cst_138 [1] : vector<8x11xf32> to vector<8xf32>
    %649 = vector.shape_cast %648 : vector<8xf32> to vector<8x1xf32>
    %650 = vector.extract_strided_slice %1 {offsets = [7, 0], sizes = [1, 11], strides = [1, 1]} : vector<11x11xf32> to vector<1x11xf32>
    %651 = vector.broadcast %650 : vector<1x11xf32> to vector<8x11xf32>
    %652 = arith.addf %613, %651 : vector<8x11xf32>
    %cst_139 = arith.constant dense<0xFF800000> : vector<8xf32>
    %653 = vector.multi_reduction <maximumf>, %652, %cst_139 [1] : vector<8x11xf32> to vector<8xf32>
    %654 = vector.shape_cast %653 : vector<8xf32> to vector<8x1xf32>
    %655 = vector.extract_strided_slice %1 {offsets = [8, 0], sizes = [1, 11], strides = [1, 1]} : vector<11x11xf32> to vector<1x11xf32>
    %656 = vector.broadcast %655 : vector<1x11xf32> to vector<8x11xf32>
    %657 = arith.addf %613, %656 : vector<8x11xf32>
    %cst_140 = arith.constant dense<0xFF800000> : vector<8xf32>
    %658 = vector.multi_reduction <maximumf>, %657, %cst_140 [1] : vector<8x11xf32> to vector<8xf32>
    %659 = vector.shape_cast %658 : vector<8xf32> to vector<8x1xf32>
    %660 = vector.extract_strided_slice %1 {offsets = [9, 0], sizes = [1, 11], strides = [1, 1]} : vector<11x11xf32> to vector<1x11xf32>
    %661 = vector.broadcast %660 : vector<1x11xf32> to vector<8x11xf32>
    %662 = arith.addf %613, %661 : vector<8x11xf32>
    %cst_141 = arith.constant dense<0xFF800000> : vector<8xf32>
    %663 = vector.multi_reduction <maximumf>, %662, %cst_141 [1] : vector<8x11xf32> to vector<8xf32>
    %664 = vector.shape_cast %663 : vector<8xf32> to vector<8x1xf32>
    %665 = vector.extract_strided_slice %1 {offsets = [10, 0], sizes = [1, 11], strides = [1, 1]} : vector<11x11xf32> to vector<1x11xf32>
    %666 = vector.broadcast %665 : vector<1x11xf32> to vector<8x11xf32>
    %667 = arith.addf %613, %666 : vector<8x11xf32>
    %cst_142 = arith.constant dense<0xFF800000> : vector<8xf32>
    %668 = vector.multi_reduction <maximumf>, %667, %cst_142 [1] : vector<8x11xf32> to vector<8xf32>
    %669 = vector.shape_cast %668 : vector<8xf32> to vector<8x1xf32>
    %670 = tpu.concatenate %619, %624, %629, %634, %639, %644, %649, %654, %659, %664, %669 in 1 : vector<8x1xf32>, vector<8x1xf32>, vector<8x1xf32>, vector<8x1xf32>, vector<8x1xf32>, vector<8x1xf32>, vector<8x1xf32>, vector<8x1xf32>, vector<8x1xf32>, vector<8x1xf32>, vector<8x1xf32> -> vector<8x11xf32>
    %671 = vector.extract_strided_slice %248 {offsets = [48, 0], sizes = [8, 11], strides = [1, 1]} : vector<64x11xf32> to vector<8x11xf32>
    %672 = arith.addf %670, %671 : vector<8x11xf32>
    %c56_143 = arith.constant 56 : index
    %c0_144 = arith.constant 0 : index
    %673 = vector.load %arg14[%c56_143, %c0_144] : memref<64x11xf32, #tpu.memory_space<vmem>>, vector<8x11xf32>
    tpu.vector_store %arg14[%c56_143, %c0_144], %672 {strides = array<i32>} : memref<64x11xf32, #tpu.memory_space<vmem>>, vector<8x11xf32>,
    %674 = vector.extract_strided_slice %1 {offsets = [0, 0], sizes = [1, 11], strides = [1, 1]} : vector<11x11xf32> to vector<1x11xf32>
    %675 = vector.broadcast %674 : vector<1x11xf32> to vector<8x11xf32>
    %676 = arith.addf %672, %675 : vector<8x11xf32>
    %cst_145 = arith.constant dense<0xFF800000> : vector<8xf32>
    %677 = vector.multi_reduction <maximumf>, %676, %cst_145 [1] : vector<8x11xf32> to vector<8xf32>
    %678 = vector.shape_cast %677 : vector<8xf32> to vector<8x1xf32>
    %679 = vector.extract_strided_slice %1 {offsets = [1, 0], sizes = [1, 11], strides = [1, 1]} : vector<11x11xf32> to vector<1x11xf32>
    %680 = vector.broadcast %679 : vector<1x11xf32> to vector<8x11xf32>
    %681 = arith.addf %672, %680 : vector<8x11xf32>
    %cst_146 = arith.constant dense<0xFF800000> : vector<8xf32>
    %682 = vector.multi_reduction <maximumf>, %681, %cst_146 [1] : vector<8x11xf32> to vector<8xf32>
    %683 = vector.shape_cast %682 : vector<8xf32> to vector<8x1xf32>
    %684 = vector.extract_strided_slice %1 {offsets = [2, 0], sizes = [1, 11], strides = [1, 1]} : vector<11x11xf32> to vector<1x11xf32>
    %685 = vector.broadcast %684 : vector<1x11xf32> to vector<8x11xf32>
    %686 = arith.addf %672, %685 : vector<8x11xf32>
    %cst_147 = arith.constant dense<0xFF800000> : vector<8xf32>
    %687 = vector.multi_reduction <maximumf>, %686, %cst_147 [1] : vector<8x11xf32> to vector<8xf32>
    %688 = vector.shape_cast %687 : vector<8xf32> to vector<8x1xf32>
    %689 = vector.extract_strided_slice %1 {offsets = [3, 0], sizes = [1, 11], strides = [1, 1]} : vector<11x11xf32> to vector<1x11xf32>
    %690 = vector.broadcast %689 : vector<1x11xf32> to vector<8x11xf32>
    %691 = arith.addf %672, %690 : vector<8x11xf32>
    %cst_148 = arith.constant dense<0xFF800000> : vector<8xf32>
    %692 = vector.multi_reduction <maximumf>, %691, %cst_148 [1] : vector<8x11xf32> to vector<8xf32>
    %693 = vector.shape_cast %692 : vector<8xf32> to vector<8x1xf32>
    %694 = vector.extract_strided_slice %1 {offsets = [4, 0], sizes = [1, 11], strides = [1, 1]} : vector<11x11xf32> to vector<1x11xf32>
    %695 = vector.broadcast %694 : vector<1x11xf32> to vector<8x11xf32>
    %696 = arith.addf %672, %695 : vector<8x11xf32>
    %cst_149 = arith.constant dense<0xFF800000> : vector<8xf32>
    %697 = vector.multi_reduction <maximumf>, %696, %cst_149 [1] : vector<8x11xf32> to vector<8xf32>
    %698 = vector.shape_cast %697 : vector<8xf32> to vector<8x1xf32>
    %699 = vector.extract_strided_slice %1 {offsets = [5, 0], sizes = [1, 11], strides = [1, 1]} : vector<11x11xf32> to vector<1x11xf32>
    %700 = vector.broadcast %699 : vector<1x11xf32> to vector<8x11xf32>
    %701 = arith.addf %672, %700 : vector<8x11xf32>
    %cst_150 = arith.constant dense<0xFF800000> : vector<8xf32>
    %702 = vector.multi_reduction <maximumf>, %701, %cst_150 [1] : vector<8x11xf32> to vector<8xf32>
    %703 = vector.shape_cast %702 : vector<8xf32> to vector<8x1xf32>
    %704 = vector.extract_strided_slice %1 {offsets = [6, 0], sizes = [1, 11], strides = [1, 1]} : vector<11x11xf32> to vector<1x11xf32>
    %705 = vector.broadcast %704 : vector<1x11xf32> to vector<8x11xf32>
    %706 = arith.addf %672, %705 : vector<8x11xf32>
    %cst_151 = arith.constant dense<0xFF800000> : vector<8xf32>
    %707 = vector.multi_reduction <maximumf>, %706, %cst_151 [1] : vector<8x11xf32> to vector<8xf32>
    %708 = vector.shape_cast %707 : vector<8xf32> to vector<8x1xf32>
    %709 = vector.extract_strided_slice %1 {offsets = [7, 0], sizes = [1, 11], strides = [1, 1]} : vector<11x11xf32> to vector<1x11xf32>
    %710 = vector.broadcast %709 : vector<1x11xf32> to vector<8x11xf32>
    %711 = arith.addf %672, %710 : vector<8x11xf32>
    %cst_152 = arith.constant dense<0xFF800000> : vector<8xf32>
    %712 = vector.multi_reduction <maximumf>, %711, %cst_152 [1] : vector<8x11xf32> to vector<8xf32>
    %713 = vector.shape_cast %712 : vector<8xf32> to vector<8x1xf32>
    %714 = vector.extract_strided_slice %1 {offsets = [8, 0], sizes = [1, 11], strides = [1, 1]} : vector<11x11xf32> to vector<1x11xf32>
    %715 = vector.broadcast %714 : vector<1x11xf32> to vector<8x11xf32>
    %716 = arith.addf %672, %715 : vector<8x11xf32>
    %cst_153 = arith.constant dense<0xFF800000> : vector<8xf32>
    %717 = vector.multi_reduction <maximumf>, %716, %cst_153 [1] : vector<8x11xf32> to vector<8xf32>
    %718 = vector.shape_cast %717 : vector<8xf32> to vector<8x1xf32>
    %719 = vector.extract_strided_slice %1 {offsets = [9, 0], sizes = [1, 11], strides = [1, 1]} : vector<11x11xf32> to vector<1x11xf32>
    %720 = vector.broadcast %719 : vector<1x11xf32> to vector<8x11xf32>
    %721 = arith.addf %672, %720 : vector<8x11xf32>
    %cst_154 = arith.constant dense<0xFF800000> : vector<8xf32>
    %722 = vector.multi_reduction <maximumf>, %721, %cst_154 [1] : vector<8x11xf32> to vector<8xf32>
    %723 = vector.shape_cast %722 : vector<8xf32> to vector<8x1xf32>
    %724 = vector.extract_strided_slice %1 {offsets = [10, 0], sizes = [1, 11], strides = [1, 1]} : vector<11x11xf32> to vector<1x11xf32>
    %725 = vector.broadcast %724 : vector<1x11xf32> to vector<8x11xf32>
    %726 = arith.addf %672, %725 : vector<8x11xf32>
    %cst_155 = arith.constant dense<0xFF800000> : vector<8xf32>
    %727 = vector.multi_reduction <maximumf>, %726, %cst_155 [1] : vector<8x11xf32> to vector<8xf32>
    %728 = vector.shape_cast %727 : vector<8xf32> to vector<8x1xf32>
    %729 = tpu.concatenate %678, %683, %688, %693, %698, %703, %708, %713, %718, %723, %728 in 1 : vector<8x1xf32>, vector<8x1xf32>, vector<8x1xf32>, vector<8x1xf32>, vector<8x1xf32>, vector<8x1xf32>, vector<8x1xf32>, vector<8x1xf32>, vector<8x1xf32>, vector<8x1xf32>, vector<8x1xf32> -> vector<8x11xf32>
    %730 = vector.extract_strided_slice %248 {offsets = [56, 0], sizes = [8, 11], strides = [1, 1]} : vector<64x11xf32> to vector<8x11xf32>
    %731 = arith.addf %729, %730 : vector<8x11xf32>
    %732 = vector.extract_strided_slice %1 {offsets = [10, 0], sizes = [1, 11], strides = [1, 1]} : vector<11x11xf32> to vector<1x11xf32>
    %733 = vector.broadcast %732 : vector<1x11xf32> to vector<8x11xf32>
    %734 = arith.addf %731, %733 : vector<8x11xf32>
    %c0_156 = arith.constant 0 : index
    %c0_157 = arith.constant 0 : index
    %c0_158 = arith.constant 0 : index
    %735 = vector.load %arg12[%c0_156, %c0_157, %c0_158] : memref<1x8x11xf32, #tpu.memory_space<vmem>>, vector<1x8x11xf32>
    %736 = vector.shape_cast %735 : vector<1x8x11xf32> to vector<8x11xf32>
    %737 = vector.shape_cast %734 : vector<8x11xf32> to vector<1x8x11xf32>
    tpu.vector_store %arg12[%c0_156, %c0_157, %c0_158], %737 {strides = array<i32>} : memref<1x8x11xf32, #tpu.memory_space<vmem>>, vector<1x8x11xf32>,
    %c0_159 = arith.constant 0 : index
    %c0_160 = arith.constant 0 : index
    %738 = vector.load %arg14[%c0_159, %c0_160] : memref<64x11xf32, #tpu.memory_space<vmem>>, vector<64x11xf32>
    %739 = tpu.iota {dimensions = array<i32: 1>} : vector<64x11xi32>
    %740 = arith.sitofp %739 : vector<64x11xi32> to vector<64x11xf32>
    %741 = vector.extract_strided_slice %1 {offsets = [0, 0], sizes = [1, 11], strides = [1, 1]} : vector<11x11xf32> to vector<1x11xf32>
    %742 = vector.broadcast %741 : vector<1x11xf32> to vector<64x11xf32>
    %743 = arith.addf %738, %742 : vector<64x11xf32>
    %cst_161 = arith.constant dense<0xFF800000> : vector<64xf32>
    %744 = vector.multi_reduction <maximumf>, %743, %cst_161 [1] : vector<64x11xf32> to vector<64xf32>
    %745 = vector.shape_cast %744 : vector<64xf32> to vector<64x1xf32>
    %746 = vector.broadcast %745 : vector<64x1xf32> to vector<64x11xf32>
    %747 = arith.cmpf oeq, %743, %746 : vector<64x11xf32>
    %cst_162 = arith.constant 1.100000e+01 : f32
    %748 = vector.broadcast %cst_162 : f32 to vector<64x11xf32>
    %749 = arith.select %747, %740, %748 : vector<64x11xi1>, vector<64x11xf32>
    %cst_163 = arith.constant dense<0x7F800000> : vector<64xf32>
    %750 = vector.multi_reduction <minimumf>, %749, %cst_163 [1] : vector<64x11xf32> to vector<64xf32>
    %751 = vector.shape_cast %750 : vector<64xf32> to vector<64x1xf32>
    %752 = vector.extract_strided_slice %1 {offsets = [1, 0], sizes = [1, 11], strides = [1, 1]} : vector<11x11xf32> to vector<1x11xf32>
    %753 = vector.broadcast %752 : vector<1x11xf32> to vector<64x11xf32>
    %754 = arith.addf %738, %753 : vector<64x11xf32>
    %cst_164 = arith.constant dense<0xFF800000> : vector<64xf32>
    %755 = vector.multi_reduction <maximumf>, %754, %cst_164 [1] : vector<64x11xf32> to vector<64xf32>
    %756 = vector.shape_cast %755 : vector<64xf32> to vector<64x1xf32>
    %757 = vector.broadcast %756 : vector<64x1xf32> to vector<64x11xf32>
    %758 = arith.cmpf oeq, %754, %757 : vector<64x11xf32>
    %cst_165 = arith.constant 1.100000e+01 : f32
    %759 = vector.broadcast %cst_165 : f32 to vector<64x11xf32>
    %760 = arith.select %758, %740, %759 : vector<64x11xi1>, vector<64x11xf32>
    %cst_166 = arith.constant dense<0x7F800000> : vector<64xf32>
    %761 = vector.multi_reduction <minimumf>, %760, %cst_166 [1] : vector<64x11xf32> to vector<64xf32>
    %762 = vector.shape_cast %761 : vector<64xf32> to vector<64x1xf32>
    %763 = vector.extract_strided_slice %1 {offsets = [2, 0], sizes = [1, 11], strides = [1, 1]} : vector<11x11xf32> to vector<1x11xf32>
    %764 = vector.broadcast %763 : vector<1x11xf32> to vector<64x11xf32>
    %765 = arith.addf %738, %764 : vector<64x11xf32>
    %cst_167 = arith.constant dense<0xFF800000> : vector<64xf32>
    %766 = vector.multi_reduction <maximumf>, %765, %cst_167 [1] : vector<64x11xf32> to vector<64xf32>
    %767 = vector.shape_cast %766 : vector<64xf32> to vector<64x1xf32>
    %768 = vector.broadcast %767 : vector<64x1xf32> to vector<64x11xf32>
    %769 = arith.cmpf oeq, %765, %768 : vector<64x11xf32>
    %cst_168 = arith.constant 1.100000e+01 : f32
    %770 = vector.broadcast %cst_168 : f32 to vector<64x11xf32>
    %771 = arith.select %769, %740, %770 : vector<64x11xi1>, vector<64x11xf32>
    %cst_169 = arith.constant dense<0x7F800000> : vector<64xf32>
    %772 = vector.multi_reduction <minimumf>, %771, %cst_169 [1] : vector<64x11xf32> to vector<64xf32>
    %773 = vector.shape_cast %772 : vector<64xf32> to vector<64x1xf32>
    %774 = vector.extract_strided_slice %1 {offsets = [3, 0], sizes = [1, 11], strides = [1, 1]} : vector<11x11xf32> to vector<1x11xf32>
    %775 = vector.broadcast %774 : vector<1x11xf32> to vector<64x11xf32>
    %776 = arith.addf %738, %775 : vector<64x11xf32>
    %cst_170 = arith.constant dense<0xFF800000> : vector<64xf32>
    %777 = vector.multi_reduction <maximumf>, %776, %cst_170 [1] : vector<64x11xf32> to vector<64xf32>
    %778 = vector.shape_cast %777 : vector<64xf32> to vector<64x1xf32>
    %779 = vector.broadcast %778 : vector<64x1xf32> to vector<64x11xf32>
    %780 = arith.cmpf oeq, %776, %779 : vector<64x11xf32>
    %cst_171 = arith.constant 1.100000e+01 : f32
    %781 = vector.broadcast %cst_171 : f32 to vector<64x11xf32>
    %782 = arith.select %780, %740, %781 : vector<64x11xi1>, vector<64x11xf32>
    %cst_172 = arith.constant dense<0x7F800000> : vector<64xf32>
    %783 = vector.multi_reduction <minimumf>, %782, %cst_172 [1] : vector<64x11xf32> to vector<64xf32>
    %784 = vector.shape_cast %783 : vector<64xf32> to vector<64x1xf32>
    %785 = vector.extract_strided_slice %1 {offsets = [4, 0], sizes = [1, 11], strides = [1, 1]} : vector<11x11xf32> to vector<1x11xf32>
    %786 = vector.broadcast %785 : vector<1x11xf32> to vector<64x11xf32>
    %787 = arith.addf %738, %786 : vector<64x11xf32>
    %cst_173 = arith.constant dense<0xFF800000> : vector<64xf32>
    %788 = vector.multi_reduction <maximumf>, %787, %cst_173 [1] : vector<64x11xf32> to vector<64xf32>
    %789 = vector.shape_cast %788 : vector<64xf32> to vector<64x1xf32>
    %790 = vector.broadcast %789 : vector<64x1xf32> to vector<64x11xf32>
    %791 = arith.cmpf oeq, %787, %790 : vector<64x11xf32>
    %cst_174 = arith.constant 1.100000e+01 : f32
    %792 = vector.broadcast %cst_174 : f32 to vector<64x11xf32>
    %793 = arith.select %791, %740, %792 : vector<64x11xi1>, vector<64x11xf32>
    %cst_175 = arith.constant dense<0x7F800000> : vector<64xf32>
    %794 = vector.multi_reduction <minimumf>, %793, %cst_175 [1] : vector<64x11xf32> to vector<64xf32>
    %795 = vector.shape_cast %794 : vector<64xf32> to vector<64x1xf32>
    %796 = vector.extract_strided_slice %1 {offsets = [5, 0], sizes = [1, 11], strides = [1, 1]} : vector<11x11xf32> to vector<1x11xf32>
    %797 = vector.broadcast %796 : vector<1x11xf32> to vector<64x11xf32>
    %798 = arith.addf %738, %797 : vector<64x11xf32>
    %cst_176 = arith.constant dense<0xFF800000> : vector<64xf32>
    %799 = vector.multi_reduction <maximumf>, %798, %cst_176 [1] : vector<64x11xf32> to vector<64xf32>
    %800 = vector.shape_cast %799 : vector<64xf32> to vector<64x1xf32>
    %801 = vector.broadcast %800 : vector<64x1xf32> to vector<64x11xf32>
    %802 = arith.cmpf oeq, %798, %801 : vector<64x11xf32>
    %cst_177 = arith.constant 1.100000e+01 : f32
    %803 = vector.broadcast %cst_177 : f32 to vector<64x11xf32>
    %804 = arith.select %802, %740, %803 : vector<64x11xi1>, vector<64x11xf32>
    %cst_178 = arith.constant dense<0x7F800000> : vector<64xf32>
    %805 = vector.multi_reduction <minimumf>, %804, %cst_178 [1] : vector<64x11xf32> to vector<64xf32>
    %806 = vector.shape_cast %805 : vector<64xf32> to vector<64x1xf32>
    %807 = vector.extract_strided_slice %1 {offsets = [6, 0], sizes = [1, 11], strides = [1, 1]} : vector<11x11xf32> to vector<1x11xf32>
    %808 = vector.broadcast %807 : vector<1x11xf32> to vector<64x11xf32>
    %809 = arith.addf %738, %808 : vector<64x11xf32>
    %cst_179 = arith.constant dense<0xFF800000> : vector<64xf32>
    %810 = vector.multi_reduction <maximumf>, %809, %cst_179 [1] : vector<64x11xf32> to vector<64xf32>
    %811 = vector.shape_cast %810 : vector<64xf32> to vector<64x1xf32>
    %812 = vector.broadcast %811 : vector<64x1xf32> to vector<64x11xf32>
    %813 = arith.cmpf oeq, %809, %812 : vector<64x11xf32>
    %cst_180 = arith.constant 1.100000e+01 : f32
    %814 = vector.broadcast %cst_180 : f32 to vector<64x11xf32>
    %815 = arith.select %813, %740, %814 : vector<64x11xi1>, vector<64x11xf32>
    %cst_181 = arith.constant dense<0x7F800000> : vector<64xf32>
    %816 = vector.multi_reduction <minimumf>, %815, %cst_181 [1] : vector<64x11xf32> to vector<64xf32>
    %817 = vector.shape_cast %816 : vector<64xf32> to vector<64x1xf32>
    %818 = vector.extract_strided_slice %1 {offsets = [7, 0], sizes = [1, 11], strides = [1, 1]} : vector<11x11xf32> to vector<1x11xf32>
    %819 = vector.broadcast %818 : vector<1x11xf32> to vector<64x11xf32>
    %820 = arith.addf %738, %819 : vector<64x11xf32>
    %cst_182 = arith.constant dense<0xFF800000> : vector<64xf32>
    %821 = vector.multi_reduction <maximumf>, %820, %cst_182 [1] : vector<64x11xf32> to vector<64xf32>
    %822 = vector.shape_cast %821 : vector<64xf32> to vector<64x1xf32>
    %823 = vector.broadcast %822 : vector<64x1xf32> to vector<64x11xf32>
    %824 = arith.cmpf oeq, %820, %823 : vector<64x11xf32>
    %cst_183 = arith.constant 1.100000e+01 : f32
    %825 = vector.broadcast %cst_183 : f32 to vector<64x11xf32>
    %826 = arith.select %824, %740, %825 : vector<64x11xi1>, vector<64x11xf32>
    %cst_184 = arith.constant dense<0x7F800000> : vector<64xf32>
    %827 = vector.multi_reduction <minimumf>, %826, %cst_184 [1] : vector<64x11xf32> to vector<64xf32>
    %828 = vector.shape_cast %827 : vector<64xf32> to vector<64x1xf32>
    %829 = vector.extract_strided_slice %1 {offsets = [8, 0], sizes = [1, 11], strides = [1, 1]} : vector<11x11xf32> to vector<1x11xf32>
    %830 = vector.broadcast %829 : vector<1x11xf32> to vector<64x11xf32>
    %831 = arith.addf %738, %830 : vector<64x11xf32>
    %cst_185 = arith.constant dense<0xFF800000> : vector<64xf32>
    %832 = vector.multi_reduction <maximumf>, %831, %cst_185 [1] : vector<64x11xf32> to vector<64xf32>
    %833 = vector.shape_cast %832 : vector<64xf32> to vector<64x1xf32>
    %834 = vector.broadcast %833 : vector<64x1xf32> to vector<64x11xf32>
    %835 = arith.cmpf oeq, %831, %834 : vector<64x11xf32>
    %cst_186 = arith.constant 1.100000e+01 : f32
    %836 = vector.broadcast %cst_186 : f32 to vector<64x11xf32>
    %837 = arith.select %835, %740, %836 : vector<64x11xi1>, vector<64x11xf32>
    %cst_187 = arith.constant dense<0x7F800000> : vector<64xf32>
    %838 = vector.multi_reduction <minimumf>, %837, %cst_187 [1] : vector<64x11xf32> to vector<64xf32>
    %839 = vector.shape_cast %838 : vector<64xf32> to vector<64x1xf32>
    %840 = vector.extract_strided_slice %1 {offsets = [9, 0], sizes = [1, 11], strides = [1, 1]} : vector<11x11xf32> to vector<1x11xf32>
    %841 = vector.broadcast %840 : vector<1x11xf32> to vector<64x11xf32>
    %842 = arith.addf %738, %841 : vector<64x11xf32>
    %cst_188 = arith.constant dense<0xFF800000> : vector<64xf32>
    %843 = vector.multi_reduction <maximumf>, %842, %cst_188 [1] : vector<64x11xf32> to vector<64xf32>
    %844 = vector.shape_cast %843 : vector<64xf32> to vector<64x1xf32>
    %845 = vector.broadcast %844 : vector<64x1xf32> to vector<64x11xf32>
    %846 = arith.cmpf oeq, %842, %845 : vector<64x11xf32>
    %cst_189 = arith.constant 1.100000e+01 : f32
    %847 = vector.broadcast %cst_189 : f32 to vector<64x11xf32>
    %848 = arith.select %846, %740, %847 : vector<64x11xi1>, vector<64x11xf32>
    %cst_190 = arith.constant dense<0x7F800000> : vector<64xf32>
    %849 = vector.multi_reduction <minimumf>, %848, %cst_190 [1] : vector<64x11xf32> to vector<64xf32>
    %850 = vector.shape_cast %849 : vector<64xf32> to vector<64x1xf32>
    %851 = vector.extract_strided_slice %1 {offsets = [10, 0], sizes = [1, 11], strides = [1, 1]} : vector<11x11xf32> to vector<1x11xf32>
    %852 = vector.broadcast %851 : vector<1x11xf32> to vector<64x11xf32>
    %853 = arith.addf %738, %852 : vector<64x11xf32>
    %cst_191 = arith.constant dense<0xFF800000> : vector<64xf32>
    %854 = vector.multi_reduction <maximumf>, %853, %cst_191 [1] : vector<64x11xf32> to vector<64xf32>
    %855 = vector.shape_cast %854 : vector<64xf32> to vector<64x1xf32>
    %856 = vector.broadcast %855 : vector<64x1xf32> to vector<64x11xf32>
    %857 = arith.cmpf oeq, %853, %856 : vector<64x11xf32>
    %cst_192 = arith.constant 1.100000e+01 : f32
    %858 = vector.broadcast %cst_192 : f32 to vector<64x11xf32>
    %859 = arith.select %857, %740, %858 : vector<64x11xi1>, vector<64x11xf32>
    %cst_193 = arith.constant dense<0x7F800000> : vector<64xf32>
    %860 = vector.multi_reduction <minimumf>, %859, %cst_193 [1] : vector<64x11xf32> to vector<64xf32>
    %861 = vector.shape_cast %860 : vector<64xf32> to vector<64x1xf32>
    %862 = tpu.concatenate %751, %762, %773, %784, %795, %806, %817, %828, %839, %850, %861 in 1 : vector<64x1xf32>, vector<64x1xf32>, vector<64x1xf32>, vector<64x1xf32>, vector<64x1xf32>, vector<64x1xf32>, vector<64x1xf32>, vector<64x1xf32>, vector<64x1xf32>, vector<64x1xf32>, vector<64x1xf32> -> vector<64x11xf32>
    %863 = arith.fptosi %862 : vector<64x11xf32> to vector<64x11xi32>
    %c0_194 = arith.constant 0 : index
    %c0_195 = arith.constant 0 : index
    %c0_196 = arith.constant 0 : index
    %864 = vector.load %arg11[%c0_194, %c0_195, %c0_196] : memref<1x64x11xi32, #tpu.memory_space<vmem>>, vector<1x64x11xi32>
    %865 = vector.shape_cast %864 : vector<1x64x11xi32> to vector<64x11xi32>
    %866 = vector.shape_cast %863 : vector<64x11xi32> to vector<1x64x11xi32>
    tpu.vector_store %arg11[%c0_194, %c0_195, %c0_196], %866 {strides = array<i32>} : memref<1x64x11xi32, #tpu.memory_space<vmem>>, vector<1x64x11xi32>,
    return
  }
  func.func @transform_0(%arg0: i32) -> (i32, i32, i32) {
    %c0_i32 = arith.constant 0 : i32
    %c0_i32_0 = arith.constant 0 : i32
    %c0_i32_1 = arith.constant 0 : i32
    return %arg0, %c0_i32, %c0_i32_0 : i32, i32, i32
  }
  func.func @transform_1(%arg0: i32) -> (i32, i32) {
    %c0_i32 = arith.constant 0 : i32
    %c0_i32_0 = arith.constant 0 : i32
    %c0_i32_1 = arith.constant 0 : i32
    return %c0_i32, %c0_i32_0 : i32, i32
  }
  func.func @transform_2(%arg0: i32) -> (i32, i32) {
    %c0_i32 = arith.constant 0 : i32
    %c0_i32_0 = arith.constant 0 : i32
    %c0_i32_1 = arith.constant 0 : i32
    return %c0_i32, %c0_i32_0 : i32, i32
  }
  func.func @transform_3(%arg0: i32) -> (i32, i32) {
    %c0_i32 = arith.constant 0 : i32
    %c0_i32_0 = arith.constant 0 : i32
    %c0_i32_1 = arith.constant 0 : i32
    return %c0_i32, %c0_i32_0 : i32, i32
  }
  func.func @transform_4(%arg0: i32) -> (i32, i32) {
    %c0_i32 = arith.constant 0 : i32
    %c0_i32_0 = arith.constant 0 : i32
    %c0_i32_1 = arith.constant 0 : i32
    return %c0_i32, %c0_i32_0 : i32, i32
  }
  func.func @transform_5(%arg0: i32) -> (i32, i32) {
    %c0_i32 = arith.constant 0 : i32
    %c0_i32_0 = arith.constant 0 : i32
    %c0_i32_1 = arith.constant 0 : i32
    return %c0_i32, %c0_i32_0 : i32, i32
  }
  func.func @transform_6(%arg0: i32) -> (i32, i32) {
    %c0_i32 = arith.constant 0 : i32
    %c0_i32_0 = arith.constant 0 : i32
    %c0_i32_1 = arith.constant 0 : i32
    return %c0_i32, %c0_i32_0 : i32, i32
  }
  func.func @transform_7(%arg0: i32) -> (i32, i32) {
    %c0_i32 = arith.constant 0 : i32
    %c0_i32_0 = arith.constant 0 : i32
    %c0_i32_1 = arith.constant 0 : i32
    return %c0_i32, %c0_i32_0 : i32, i32
  }
  func.func @transform_8(%arg0: i32) -> (i32, i32) {
    %c0_i32 = arith.constant 0 : i32
    %c0_i32_0 = arith.constant 0 : i32
    %c0_i32_1 = arith.constant 0 : i32
    return %c0_i32, %c0_i32_0 : i32, i32
  }
  func.func @transform_9(%arg0: i32) -> (i32, i32, i32) {
    %c0_i32 = arith.constant 0 : i32
    %c0_i32_0 = arith.constant 0 : i32
    %c0_i32_1 = arith.constant 0 : i32
    return %arg0, %c0_i32, %c0_i32_0 : i32, i32, i32
  }
  func.func @transform_10(%arg0: i32) -> (i32, i32, i32) {
    %c0_i32 = arith.constant 0 : i32
    %c0_i32_0 = arith.constant 0 : i32
    %c0_i32_1 = arith.constant 0 : i32
    return %arg0, %c0_i32, %c0_i32_0 : i32, i32, i32
  }
  func.func @transform_11(%arg0: i32) -> (i32, i32, i32) {
    %c0_i32 = arith.constant 0 : i32
    %c0_i32_0 = arith.constant 0 : i32
    %c0_i32_1 = arith.constant 0 : i32
    return %arg0, %c0_i32, %c0_i32_0 : i32, i32, i32
  }
}

</mosaic_0001>

<bundles_post_ra>
// kernel: tpu_custom_call.1
= control target key start
LH: loop header
LB: loop body
LE: loop exit
PB: predicated region body
PF: predicated region fallthrough
CT: control target
= control target key end

     0   :  { %s5459_s0 = inlined_call_operand.vmem [shape: f32[2,64,16], index: 0, kind: input, shape index: {}]   ;;  %s5460_s1 = inlined_call_operand.vmem [shape: f32[16,128], index: 1, kind: input, shape index: {}]   ;;  %s5461_s2 = inlined_call_operand.vmem [shape: f32[32,128], index: 2, kind: input, shape index: {}]   ;;  %s5462_s3 = inlined_call_operand.vmem [shape: f32[1,128], index: 3, kind: input, shape index: {}]   ;;  %s5463_s4 = inlined_call_operand.vmem [shape: f32[1,32], index: 4, kind: input, shape index: {}]   ;;  %s5464_s5 = inlined_call_operand.vmem [shape: f32[1,32], index: 5, kind: input, shape index: {}]   ;;  %s5465_s6 = inlined_call_operand.vmem [shape: f32[32,11], index: 6, kind: input, shape index: {}]   ;;  %s5466_s7 = inlined_call_operand.vmem [shape: f32[1,11], index: 7, kind: input, shape index: {}]   ;;  %s5467_s8 = inlined_call_operand.vmem [shape: f32[11,11], index: 8, kind: input, shape index: {}]   ;;  %s5468_s9 = inlined_call_operand.vmem [shape: f32[2,64,11], index: 9, kind: output, shape index: {0}]   ;;  %s5469_s10 = inlined_call_operand.vmem [shape: s32[2,64,11], index: 10, kind: output, shape index: {1}]   ;;  %s5470_s11 = inlined_call_operand.hbm [shape: f32[2,8,11], index: 11, kind: output, shape index: {2}]  }
   0x1   :  { %5489 = sst [smem:[#allocation52_spill]] %s5459_s0 }
   0x2   :  { %17 = vsyncpa [#allocation5], 0 }
   0x3   :  { %19 = vsyncpa [#allocation5 + $0x1], 0  ;;  %s3691_s17 = smov 0   ;;  %s3693_s18 = smov 0  }
   0x4   :  { %s3695_s19 = smov 0   ;;  %s3697_s20 = smov 0  }
   0x5 LB: > { %s3712_s21 = sadd.s32 4294967295, %s3621_s20   ;;  %s3129_s22 = sadd.s32 4294967294, %s3621_s20   ;;  %s3621_s20 = sphi %s3697_s20, %s5587_s20   ;;  %s3617_s19 = sphi %s3695_s19, %s5586_s19   ;;  %s3613_s18 = sphi %s3693_s18, %s5585_s18   ;;  %s3609_s17 = sphi %s3691_s17, %s5584_s17  }
   0x6   : > { %s3716_s23 = sadd.s32 1, %s3621_s20   ;;  %s278_s24 = sadd.s32 1, %s3617_s19 }
   0x7   : > { %s275_s25 = ssub.s32 %s3621_s20, %s3716_s23  ;;  %p288_p0 = scmp.ne.s32.totalorder %s3617_s19, %s3613_s18 }
   0x8   : > { %p276_p1 = scmp.eq.s32.totalorder %s275_s25, 0  ;;  %p289_p2 = scmp.eq.s32.totalorder %s3712_s21, 1 }
   0x9   : > { %p294_p3 = scmp.ne.s32.totalorder %s3613_s18, %s3609_s17  ;;  %p295_p4 = scmp.eq.s32.totalorder %s3129_s22, 1 }
   0xa   : > { %s3727_s26 = scalar_select %p276_p1, %s3617_s19, %s278_s24  }
   0xb   : > { %p3729_p5 = por %p289_p2, %p288_p0  ;;  %p3733_p6 = por %p295_p4, %p294_p3 }
   0xc   : > { %p3132_p7 = scmp.ge.s32.totalorder %s3621_s20, 1  ;;  %p345_p8 = scmp.lt.s32.totalorder %s3621_s20, 3 }
   0xe   : > { %p346_p9 = pnand %p3132_p7, %p345_p8 }
  0x10   : > { %349 = sbr.rel (%p346_p9) target bundleno = 7867 (0x1ebb), region = 56 }
  0x17   : > { %v439_v0 = vld [vmem:[%s5460_s1] sm:$0xff]  ;;  %v440_v1 = vld [vmem:[%s5460_s1 + $0x8] sm:$0xff]  ;;  %p395_p10 = scmp.lt.s32.totalorder %s3712_s21, 1  ;;  %vm448_vm0 = vcmask 130048   ;;  %s5492_s0 = sld [smem:[#allocation52_spill]]  ;;  %v3623_v5 = vmov 0.0|0.0   ;;  %v416_v20 = vlaneseq }
  0x18   : > { %v3369_v2 = vpack.c.bf16 %v440_v1, %v439_v0  ;;  %v410_v3 = vld [vmem:[%s5461_s2] sm:$0xff]  ;;  %v411_v4 = vld [vmem:[%s5461_s2 + $0x8] sm:$0xff]  ;;  %v412_v7 = vld [vmem:[%s5461_s2 + $0x10] sm:$0xff]  ;;  %vm3624_vm1 = vmmov 0   ;;  %v3625_v18 = vmov 0.0   ;;  %vm593_vm2 = vcmask 261120  }
  0x19   : > { %s396_s14 = scalar_select %p395_p10, %s3712_s21, 1  ;;  %v3760_v6 = vpack.c.bf16 %v411_v4, %v410_v3  ;;  %v413_v8 = vld [vmem:[%s5461_s2 + $0x18] sm:$0xff]  ;;  %v3149_v19 = vld [vmem:[%s5463_s4] ss:$0 sm:$0xff]  ;;  %v3802_v21 = vand.u32 127, %v416_v20  ;;  %v3626_v29 = vmov 0  }
  0x1a   : > { %3429 = vmatprep.subr.bf16.mxu1 %v3369_v2  ;;  %3370 = vmatprep.subr.bf16.mxu0 %v3369_v2  ;;  %v3775_v17 = vpack.c.bf16 %v413_v8, %v412_v7  ;;  %v3140_v22 = vld [vmem:[%s5462_s3] ss:$0 sm:$0xff]  ;;  %s5471_s16 = smov 64   ;;  %s392_s22 = sand.u32 1, %s3613_s18  }
  0x1b   : > { %3430 = vmatpush3.bf16.msra.mxu1 %v3369_v2  ;;  %3372 = vmatpush3.bf16.msra.mxu0 %v3369_v2  ;;  %s3753_s25 = sshll.u32 %s396_s14, 6  ;;  %vm419_vm3 = vcmp.ge.s32.totalorder %v3802_v21, 32  ;;  %vm420_vm4 = vcmp.lt.s32.totalorder %v3802_v21, 48  ;;  %vm418_vm5 = vcmp.lt.s32.totalorder %v3802_v21, 16  ;;  %vm423_vm7 = vcmp.ge.s32.totalorder %v3802_v21, 64  ;;  %s3133_s14 = sshll.u32 %s392_s22, 3 }
  0x1c   : > { %3373 = vmatprep.subr.bf16.mxu1 %v3623_v5  ;;  %3385 = vmatprep.subr.bf16.mxu0 %v3623_v5  ;;  %vm421_vm6 = vmand %vm419_vm3, %vm420_vm4  ;;  %vm424_vm8 = vcmp.lt.s32.totalorder %v3802_v21, 80  ;;  %vm427_vm11 = vcmp.ge.s32.totalorder %v3802_v21, 96  ;;  %vm428_vm12 = vcmp.lt.s32.totalorder %v3802_v21, 112  ;;  %v3150_v53 = vld [vmem:[%s5464_s5] ss:$0 sm:$0xff]  ;;  %vm1578_vm3 = vcmask 89088  }
  0x1d   : > { %s399_s12 = scalar_lea.vmem %s5492_s0, %s3753_s25  ;;  %vm422_vm9 = vmor %vm418_vm5, %vm421_vm6  ;;  %vm1678_vm4 = vcmask 7168   ;;  %vm1680_vm6 = vcmask 15360   ;;  %s394_s24 = scalar_lea.vmem [#allocation4], %s3133_s14 }
  0x1e   : > { %v431_v9 = vld [vmem:[%s399_s12] sm:$0xff]  ;;  %v432_v11 = vld [vmem:[%s399_s12 + $0x8] sm:$0xff]  ;;  %v433_v13 = vld [vmem:[%s399_s12 + $0x10] sm:$0xff]  ;;  %s3020_s29 = sshll.u32 %s394_s24, 4  ;;  %s5359_s14 = scalar_lea.vmem %s5469_s10, %s3753_s25  ;;  %s5353_s29 = int_to_ptr.vmem [resolvable:$true] %s3020_s29 }
  0x1f   : > { %v435_v10 = vld [vmem:[%s399_s12 + $0x20] sm:$0xff]  ;;  %3249 = vmatprep.mubr.msk.f32.mxu0 %vm448_vm0, %v431_v9  ;;  %v436_v12 = vld [vmem:[%s399_s12 + $0x28] sm:$0xff]  ;;  %v437_v14 = vld [vmem:[%s399_s12 + $0x30] sm:$0xff]  ;;  %s3559_s30 = scalar_lea.vmem %s5353_s29, 128 }
  0x20   : > { %3255 = vmatprep.mubr.msk.f32.mxu1 %vm448_vm0, %v435_v10  ;;  %3250 = vmatmul.mubr.msk.f32.vlgmr.msra.gmra.mrb[0].mxu0 %vm448_vm0, %v432_v11  ;;  %v434_v15 = vld [vmem:[%s399_s12 + $0x18] sm:$0xff]  ;;  %vm425_vm10 = vmand %vm423_vm7, %vm424_vm8  ;;  %vm1682_vm7 = vcmask 23552   ;;  %vm1684_vm8 = vcmask 31744   ;;  %p3560_p11 = scmp.ne.s32.totalorder %s5353_s29, %s3559_s30 }
  0x21   : > { %3256 = vmatmul.mubr.msk.f32.vlgmr.msra.gmra.mrb[0].mxu1 %vm448_vm0, %v436_v12  ;;  %3252 = vmatprep.mubr.msk.f32.mxu0 %vm448_vm0, %v433_v13  ;;  %v438_v16 = vld [vmem:[%s399_s12 + $0x38] sm:$0xff]  ;;  %vm426_vm13 = vmor %vm422_vm9, %vm425_vm10  ;;  %s3627_s12 = smov 32   ;;  %vm1690_vm9 = vcmask 56320   ;;  %vm1692_vm10 = vcmask 64512  }
  0x22   : > { %3375 = vmatpush3.bf16.msra.mxu1 %v3760_v6  ;;  %3258 = vmatprep.mubr.msk.f32.mxu1 %vm448_vm0, %v437_v14  ;;  %vm429_vm14 = vmand %vm427_vm11, %vm428_vm12  ;;  %vm1694_vm11 = vcmask 72704   ;;  %vm1696_vm12 = vcmask 80896   ;;  %p3561_p12 = pnand %p3560_p11, %p3729_p5 }
  0x23   : > { %3376 = vmatprep.subr.bf16.mxu1 %v3623_v5  ;;  %3387 = vmatpush3.bf16.msra.mxu0 %v3760_v6  ;;  %vm430_vm15 = vmor %vm426_vm13, %vm429_vm14 }
  0x24   : > { %3253 = vmatmul.mubr.msk.f32.gmra.mrb[2].mxu0 %vm448_vm0, %v434_v15  ;;  %3388 = vmatprep.subr.bf16.mxu0 %v3623_v5  ;;  %v590_v30 = vsel %vm430_vm15, 1, %v3626_v29  ;;  %p3562_p13 = pneg %p3561_p12 }
  0x25   : > { %3259 = vmatmul.mubr.msk.f32.gmra.mrb[2].mxu1 %vm448_vm0, %v438_v16  ;;  %3291 = vmatprep.mubr.msk.f32.mxu0 %vm3624_vm1, %v3625_v18  ;;  %vm591_vm0 = vcmp.eq.s32.totalorder %v590_v30, 1 }
  0x26   : > { %3378 = vmatpush3.bf16.msra.mxu1 %v3775_v17  ;;  %3269 = vmatprep.mubr.msk.f32.mxu1 %vm3624_vm1, %v3625_v18 }
  0x27   : > { %3379 = vmatprep.subr.bf16.mxu1 %v3623_v5  ;;  %3390 = vmatpush3.bf16.msra.mxu0 %v3775_v17 }
  0x28   : > { %3397 = vmatprep.subr.bf16.mxu0 %v3623_v5 }
  0x29   : > { %3270 = vmatmul.mubr.msk.f32.vlgmr.msra.gmra.mrb[4].mxu1 %vm593_vm2, %v3149_v19 }
  0x2a   : > { %3381 = vmatpush3.bf16.msra.mxu1 %v3760_v6  ;;  %3280 = vmatprep.mubr.msk.f32.mxu1 %vm3624_vm1, %v3625_v18 }
  0x2b   : > { %3382 = vmatprep.subr.bf16.mxu1 %v3623_v5 }
  0x2e   : > { %3384 = vmatpush3.bf16.msra.mxu1 %v3775_v17 }
  0x2f   : > { %3391 = vmatprep.subr.bf16.mxu1 %v3623_v5 }
  0xf3   : > { %v3251_v24 = vpop.f32.mrb[0].mxu0 }
  0xf4   : > { %v3257_v23 = vpop.f32.mrb[0].mxu1  ;;  %v545_v27 = vadd.f32 %v3251_v24, %v3140_v22  ;;  %v539_v28 = vpop.f32.mrb[1].mxu0 }
  0xf5   : > { %v565_v25 = vadd.f32 %v3257_v23, %v3140_v22  ;;  %v559_v26 = vpop.f32.mrb[1].mxu1  ;;  %v540_v32 = vadd.f32 %v3140_v22, %v539_v28 }
  0xf6   : > { %v560_v31 = vadd.f32 %v3140_v22, %v559_v26 }
  0xf7   : > { %v3254_v33 = vpop.f32.mrb[2].mxu0 }
  0xf8   : > { %v3260_v34 = vpop.f32.mrb[2].mxu1  ;;  %v555_v35 = vadd.f32 %v3254_v33, %v3140_v22  ;;  %v549_v37 = vpop.f32.mrb[3].mxu0 }
  0xf9   : > { %v575_v36 = vadd.f32 %v3260_v34, %v3140_v22  ;;  %v569_v38 = vpop.f32.mrb[3].mxu1  ;;  %v550_v39 = vadd.f32 %v3140_v22, %v549_v37 }
  0xfa   : > { %v570_v40 = vadd.f32 %v3140_v22, %v569_v38  ;;  %v3816_v42 = vsel %vm591_vm0, %v555_v35, %v560_v31  ;;  %v3818_v43 = vsel %vm591_vm0, %v560_v31, %v555_v35 }
  0xfb   : > { %v592_v41 = vsel %vm591_vm0, %v540_v32, %v575_v36  ;;  %v3820_v44 = vsel %vm591_vm0, %v575_v36, %v540_v32  ;;  %v3822_v47 = vsel %vm591_vm0, %v550_v39, %v565_v25  ;;  %v3824_v48 = vsel %vm591_vm0, %v565_v25, %v550_v39 }
  0xfc   : > { %v662_v45 = vpop.f32.mrb[4].mxu1  ;;  %v699_v46 = vsel %vm591_vm0, %v545_v27, %v570_v40  ;;  %v3826_v49 = vsel %vm591_vm0, %v570_v40, %v545_v27 }
  0xfd   : > { %v666_v50 = vadd.f32 %v662_v45, %v592_v41  ;;  %v3271_v51 = vpop.f32.mrb[5].mxu1 }
  0xff   : > { %3493 = vtanh.f32 %v666_v50  ;;  %v3152_v54 = vmul.f32 -1.442695, %v666_v50 }
 0x101   : > { %3495 = vpow2.f32 %v3152_v54 }
 0x109   : > { %v3494_v52 = vpop.eup %3493 }
 0x10a   : > { %679 = vrot.lane.b32.xlu0 %v3494_v52, %s3627_s12 }
 0x10b   : > { %v3496_v55 = vpop.eup %3495 }
 0x10c   : > { %v670_v56 = vadd.f32 1.0, %v3496_v55 }
 0x10e   : > { %674 = vrot.lane.b32.xlu0 %v3150_v53, %s3627_s12  ;;  %3497 = vrcp.f32 %v670_v56 }
 0x118   : > { %v3498_v57 = vpop.eup %3497 }
 0x17c   : > { %v680_v58 = vpop.permute.xlu0 %679 }
 0x17d   : > { %v682_v59 = vmul.f32 %v3498_v57, %v680_v58 }
 0x17f   : > { %684 = vrot.lane.b32.xlu1 %v682_v59, %s3627_s12 }
 0x180   : > { %v675_v60 = vpop.permute.xlu0 %674 }
 0x181   : > { %v677_v61 = vmul.f32 %v3498_v57, %v675_v60 }
 0x1f1   : > { %v685_v62 = vpop.permute.xlu1 %684 }
 0x1f2   : > { %v687_v63 = vadd.f32 %v685_v62, %v677_v61 }
 0x1f4   : > { %3499 = vtanh.f32 %v687_v63 }
 0x1fe   : > { %v3500_v0 = vpop.eup %3499 }
 0x1ff   : > { %690 = vrot.lane.b32.xlu1 %v3500_v0, %s3627_s12 }
 0x271   : > { %v691_v1 = vpop.permute.xlu1 %690 }
 0x272   : > { %v693_v2 = vmul.f32 %v3498_v57, %v691_v1 }
 0x274   : > { %695 = vrot.lane.b32.xlu0 %v693_v2, %s5471_s16 }
 0x2e6   : > { %v696_v3 = vpop.permute.xlu0 %695 }
 0x2e7   : > { %698 = vst.msk [vmem:[#allocation2] sm:$0xff] %vm593_vm2, %v696_v3  ;;  %3281 = vmatmul.mubr.msk.f32.vlgmr.msra.gmra.mrb[6].mxu1 %vm593_vm2, %v696_v3 }
 0x2e8   : > { %3393 = vmatpush3.bf16.msra.mxu1 %v3760_v6  ;;  %3302 = vmatprep.mubr.msk.f32.mxu1 %vm3624_vm1, %v3625_v18 }
 0x2e9   : > { %3394 = vmatprep.subr.bf16.mxu1 %v3623_v5 }
 0x2ec   : > { %3396 = vmatpush3.bf16.msra.mxu1 %v3775_v17 }
 0x2ed   : > { %3403 = vmatprep.subr.bf16.mxu1 %v3623_v5 }
 0x3ba   : > { %v768_v4 = vpop.f32.mrb[6].mxu1 }
 0x3bb   : > { %v772_v7 = vadd.f32 %v768_v4, %v699_v46  ;;  %v3282_v8 = vpop.f32.mrb[7].mxu1 }
 0x3bd   : > { %3501 = vtanh.f32 %v772_v7  ;;  %v3154_v10 = vmul.f32 -1.442695, %v772_v7 }
 0x3bf   : > { %3503 = vpow2.f32 %v3154_v10 }
 0x3c7   : > { %v3502_v9 = vpop.eup %3501 }
 0x3c8   : > { %782 = vrot.lane.b32.xlu1 %v3502_v9, %s3627_s12 }
 0x3c9   : > { %v3504_v11 = vpop.eup %3503 }
 0x3ca   : > { %v776_v12 = vadd.f32 1.0, %v3504_v11 }
 0x3cc   : > { %3505 = vrcp.f32 %v776_v12 }
 0x3d6   : > { %v3506_v13 = vpop.eup %3505 }
 0x3d7   : > { %v780_v16 = vmul.f32 %v3506_v13, %v687_v63 }
 0x43a   : > { %v783_v14 = vpop.permute.xlu1 %782 }
 0x43b   : > { %v785_v15 = vmul.f32 %v3506_v13, %v783_v14 }
 0x43d   : > { %787 = vrot.lane.b32.xlu0 %v785_v15, %s3627_s12 }
 0x4af   : > { %v788_v19 = vpop.permute.xlu0 %787 }
 0x4b0   : > { %v790_v22 = vadd.f32 %v788_v19, %v780_v16 }
 0x4b2   : > { %3507 = vtanh.f32 %v790_v22 }
 0x4bc   : > { %v3508_v23 = vpop.eup %3507 }
 0x4bd   : > { %793 = vrot.lane.b32.xlu1 %v3508_v23, %s3627_s12 }
 0x52f   : > { %v794_v24 = vpop.permute.xlu1 %793 }
 0x530   : > { %v796_v25 = vmul.f32 %v3506_v13, %v794_v24 }
 0x532   : > { %798 = vrot.lane.b32.xlu0 %v796_v25, %s5471_s16 }
 0x5a4   : > { %v799_v26 = vpop.permute.xlu0 %798 }
 0x5a5   : > { %801 = vst.msk [vmem:[#allocation2 + $0x8] sm:$0xff] %vm593_vm2, %v799_v26  ;;  %3292 = vmatmul.mubr.msk.f32.vlgmr.msra.gmra.mrb[4].mxu0 %vm593_vm2, %v799_v26 }
 0x5a6   : > { %3399 = vmatpush3.bf16.msra.mxu0 %v3760_v6  ;;  %3313 = vmatprep.mubr.msk.f32.mxu0 %vm3624_vm1, %v3625_v18 }
 0x5a7   : > { %3400 = vmatprep.subr.bf16.mxu0 %v3623_v5 }
 0x5aa   : > { %3402 = vmatpush3.bf16.msra.mxu0 %v3775_v17 }
 0x5ab   : > { %3409 = vmatprep.subr.bf16.mxu0 %v3623_v5 }
 0x678   : > { %v871_v27 = vpop.f32.mrb[4].mxu0 }
 0x679   : > { %v875_v28 = vadd.f32 %v871_v27, %v3822_v47  ;;  %v3293_v29 = vpop.f32.mrb[5].mxu0 }
 0x67b   : > { %3509 = vtanh.f32 %v875_v28  ;;  %v3156_v31 = vmul.f32 -1.442695, %v875_v28 }
 0x67d   : > { %3511 = vpow2.f32 %v3156_v31 }
 0x685   : > { %v3510_v30 = vpop.eup %3509 }
 0x686   : > { %885 = vrot.lane.b32.xlu1 %v3510_v30, %s3627_s12 }
 0x687   : > { %v3512_v32 = vpop.eup %3511 }
 0x688   : > { %v879_v33 = vadd.f32 1.0, %v3512_v32 }
 0x68a   : > { %3513 = vrcp.f32 %v879_v33 }
 0x694   : > { %v3514_v34 = vpop.eup %3513 }
 0x695   : > { %v883_v37 = vmul.f32 %v3514_v34, %v790_v22 }
 0x6f8   : > { %v886_v35 = vpop.permute.xlu1 %885 }
 0x6f9   : > { %v888_v36 = vmul.f32 %v3514_v34, %v886_v35 }
 0x6fb   : > { %890 = vrot.lane.b32.xlu0 %v888_v36, %s3627_s12 }
 0x76d   : > { %v891_v38 = vpop.permute.xlu0 %890 }
 0x76e   : > { %v893_v39 = vadd.f32 %v891_v38, %v883_v37 }
 0x770   : > { %3515 = vtanh.f32 %v893_v39 }
 0x77a   : > { %v3516_v40 = vpop.eup %3515 }
 0x77b   : > { %896 = vrot.lane.b32.xlu1 %v3516_v40, %s3627_s12 }
 0x7ed   : > { %v897_v41 = vpop.permute.xlu1 %896 }
 0x7ee   : > { %v899_v45 = vmul.f32 %v3514_v34, %v897_v41 }
 0x7f0   : > { %901 = vrot.lane.b32.xlu0 %v899_v45, %s5471_s16 }
 0x862   : > { %v902_v46 = vpop.permute.xlu0 %901 }
 0x863   : > { %904 = vst.msk [vmem:[#allocation2 + $0x10] sm:$0xff] %vm593_vm2, %v902_v46  ;;  %3303 = vmatmul.mubr.msk.f32.vlgmr.msra.gmra.mrb[8].mxu1 %vm593_vm2, %v902_v46 }
 0x864   : > { %3405 = vmatpush3.bf16.msra.mxu1 %v3760_v6  ;;  %3324 = vmatprep.mubr.msk.f32.mxu1 %vm3624_vm1, %v3625_v18 }
 0x865   : > { %3406 = vmatprep.subr.bf16.mxu1 %v3623_v5 }
 0x868   : > { %3408 = vmatpush3.bf16.msra.mxu1 %v3775_v17 }
 0x869   : > { %3415 = vmatprep.subr.bf16.mxu1 %v3623_v5 }
 0x936   : > { %v974_v47 = vpop.f32.mrb[8].mxu1 }
 0x937   : > { %v978_v50 = vadd.f32 %v974_v47, %v3816_v42  ;;  %v3304_v51 = vpop.f32.mrb[9].mxu1 }
 0x939   : > { %3517 = vtanh.f32 %v978_v50  ;;  %v3158_v53 = vmul.f32 -1.442695, %v978_v50 }
 0x93b   : > { %3519 = vpow2.f32 %v3158_v53 }
 0x943   : > { %v3518_v52 = vpop.eup %3517 }
 0x944   : > { %988 = vrot.lane.b32.xlu1 %v3518_v52, %s3627_s12 }
 0x945   : > { %v3520_v54 = vpop.eup %3519 }
 0x946   : > { %v982_v55 = vadd.f32 1.0, %v3520_v54 }
 0x948   : > { %3521 = vrcp.f32 %v982_v55 }
 0x952   : > { %v3522_v56 = vpop.eup %3521 }
 0x953   : > { %v986_v59 = vmul.f32 %v3522_v56, %v893_v39 }
 0x9b6   : > { %v989_v57 = vpop.permute.xlu1 %988 }
 0x9b7   : > { %v991_v58 = vmul.f32 %v3522_v56, %v989_v57 }
 0x9b9   : > { %993 = vrot.lane.b32.xlu0 %v991_v58, %s3627_s12 }
 0xa2b   : > { %v994_v60 = vpop.permute.xlu0 %993 }
 0xa2c   : > { %v996_v61 = vadd.f32 %v994_v60, %v986_v59 }
 0xa2e   : > { %3523 = vtanh.f32 %v996_v61 }
 0xa38   : > { %v3524_v42 = vpop.eup %3523 }
 0xa39   : > { %999 = vrot.lane.b32.xlu1 %v3524_v42, %s3627_s12 }
 0xaab   : > { %v1000_v62 = vpop.permute.xlu1 %999 }
 0xaac   : > { %v1002_v63 = vmul.f32 %v3522_v56, %v1000_v62 }
 0xaae   : > { %1004 = vrot.lane.b32.xlu0 %v1002_v63, %s5471_s16 }
 0xb20   : > { %v1005_v0 = vpop.permute.xlu0 %1004 }
 0xb21   : > { %1007 = vst.msk [vmem:[#allocation2 + $0x18] sm:$0xff] %vm593_vm2, %v1005_v0  ;;  %3314 = vmatmul.mubr.msk.f32.vlgmr.msra.gmra.mrb[6].mxu0 %vm593_vm2, %v1005_v0 }
 0xb22   : > { %3411 = vmatpush3.bf16.msra.mxu0 %v3760_v6  ;;  %3335 = vmatprep.mubr.msk.f32.mxu0 %vm3624_vm1, %v3625_v18 }
 0xb23   : > { %3412 = vmatprep.subr.bf16.mxu0 %v3623_v5 }
 0xb26   : > { %3414 = vmatpush3.bf16.msra.mxu0 %v3775_v17 }
 0xbf4   : > { %v1077_v1 = vpop.f32.mrb[6].mxu0 }
 0xbf5   : > { %v1081_v2 = vadd.f32 %v1077_v1, %v3818_v43  ;;  %v3315_v3 = vpop.f32.mrb[7].mxu0 }
 0xbf7   : > { %3525 = vtanh.f32 %v1081_v2  ;;  %v3160_v7 = vmul.f32 -1.442695, %v1081_v2 }
 0xbf9   : > { %3527 = vpow2.f32 %v3160_v7  ;;  %v1439_v7 = vld [vmem:[%s5465_s6 + $0x8] sm:$0xff] }
 0xc01   : > { %v3526_v4 = vpop.eup %3525 }
 0xc02   : > { %1091 = vrot.lane.b32.xlu1 %v3526_v4, %s3627_s12  ;;  %v1438_v4 = vld [vmem:[%s5465_s6] sm:$0xff] }
 0xc03   : > { %v3528_v8 = vpop.eup %3527 }
 0xc04   : > { %v1085_v9 = vadd.f32 1.0, %v3528_v8  ;;  %v3421_v8 = vpack.c.bf16 %v1439_v7, %v1438_v4 }
 0xc06   : > { %3529 = vrcp.f32 %v1085_v9  ;;  %v1440_v9 = vld [vmem:[%s5465_s6 + $0x10] sm:$0xff]  ;;  %3422 = vmatprep.subr.bf16.mxu0 %v3421_v8 }
 0xc10   : > { %v3530_v10 = vpop.eup %3529 }
 0xc11   : > { %v1089_v13 = vmul.f32 %v3530_v10, %v996_v61 }
 0xc74   : > { %v1092_v11 = vpop.permute.xlu1 %1091 }
 0xc75   : > { %v1094_v12 = vmul.f32 %v3530_v10, %v1092_v11 }
 0xc77   : > { %1096 = vrot.lane.b32.xlu0 %v1094_v12, %s3627_s12 }
 0xce9   : > { %v1097_v14 = vpop.permute.xlu0 %1096 }
 0xcea   : > { %v1099_v15 = vadd.f32 %v1097_v14, %v1089_v13  ;;  %v1591_v14 = vshrl.u32 %v416_v20, 7 }
 0xcec   : > { %3531 = vtanh.f32 %v1099_v15 }
 0xcf6   : > { %v3532_v43 = vpop.eup %3531 }
 0xcf7   : > { %1102 = vrot.lane.b32.xlu1 %v3532_v43, %s3627_s12  ;;  %v1616_v43 = vsub.s32 3, %v1591_v14 }
 0xd69   : > { %v1103_v16 = vpop.permute.xlu1 %1102 }
 0xd6a   : > { %v1105_v19 = vmul.f32 %v3530_v10, %v1103_v16  ;;  %v1441_v10 = vld [vmem:[%s5465_s6 + $0x18] sm:$0xff]  ;;  %v414_v16 = vld [vmem:[%s5467_s8] sm:$0xff] }
 0xd6b   : > { %v3425_v11 = vpack.c.bf16 %v1441_v10, %v1440_v9 }
 0xd6c   : > { %1107 = vrot.lane.b32.xlu0 %v1105_v19, %s5471_s16 }
 0xdde   : > { %v1108_v22 = vpop.permute.xlu0 %1107 }
 0xddf   : > { %1110 = vst.msk [vmem:[#allocation2 + $0x20] sm:$0xff] %vm593_vm2, %v1108_v22  ;;  %3325 = vmatmul.mubr.msk.f32.vlgmr.msra.gmra.mrb[10].mxu1 %vm593_vm2, %v1108_v22  ;;  %v3930_v22 = vrot.slane %v414_v16, %v1616_v43 }
 0xde0   : > { %3417 = vmatpush3.bf16.msra.mxu1 %v3760_v6  ;;  %3346 = vmatprep.mubr.msk.f32.mxu1 %vm3624_vm1, %v3625_v18  ;;  %vm1587_vm1 = vcmp.eq.s32.totalorder %v3802_v21, 9 }
 0xde1   : > { %3418 = vmatprep.subr.bf16.mxu1 %v3623_v5 }
 0xde4   : > { %3420 = vmatpush3.bf16.msra.mxu1 %v3775_v17 }
 0xde6   : > { %v1424_v7 = vld [vmem:[#allocation2 + $0x20] sm:$0xff] }
 0xeb2   : > { %v1180_v23 = vpop.f32.mrb[10].mxu1 }
 0xeb3   : > { %v1184_v24 = vadd.f32 %v1180_v23, %v3824_v48  ;;  %v3326_v25 = vpop.f32.mrb[11].mxu1  ;;  %v1632_v23 = vsub.s32 5, %v1591_v14 }
 0xeb5   : > { %3533 = vtanh.f32 %v1184_v24  ;;  %v3162_v27 = vmul.f32 -1.442695, %v1184_v24  ;;  %v3629_v24 = vmov -10000.0  }
 0xeb6   : > { %v1588_v25 = vsel %vm1587_vm1, 0.0, %v3629_v24 }
 0xeb7   : > { %3535 = vpow2.f32 %v3162_v27  ;;  %v1648_v27 = vsub.s32 7, %v1591_v14  ;;  %1589 = vst.msk [vmem:[#allocation3] sm:$0xff] %vm1578_vm3, %v1588_v25 }
 0xebf   : > { %v3534_v26 = vpop.eup %3533 }
 0xec0   : > { %1194 = vrot.lane.b32.xlu1 %v3534_v26, %s3627_s12  ;;  %v3933_v26 = vrot.slane %v414_v16, %v1632_v23 }
 0xec1   : > { %v3536_v28 = vpop.eup %3535 }
 0xec2   : > { %v1188_v29 = vadd.f32 1.0, %v3536_v28  ;;  %v1618_v28 = vadd.f32 %v3930_v22, %v1588_v25 }
 0xec4   : > { %3537 = vrcp.f32 %v1188_v29 }
 0xece   : > { %v3538_v6 = vpop.eup %3537 }
 0xecf   : > { %v1192_v5 = vmul.f32 %v3538_v6, %v1099_v15  ;;  %v1592_v15 = vsub.s32 0, %v1591_v14 }
 0xed1   : > { %v3928_v19 = vrot.slane %v414_v16, %v1592_v15 }
 0xed3   : > { %v1594_v20 = vadd.f32 %v3928_v19, %v1588_v25 }
 0xed5   : > { %v1595_v29 = vsel %vm1578_vm3, %v1594_v20, -inf }
 0xf32   : > { %v1195_v30 = vpop.permute.xlu1 %1194 }
 0xf33   : > { %v1197_v18 = vmul.f32 %v3538_v6, %v1195_v30  ;;  %v1619_v30 = vsel %vm1578_vm3, %v1618_v28, -inf }
 0xf35   : > { %1199 = vrot.lane.b32.xlu0 %v1197_v18, %s3627_s12  ;;  %v1634_v18 = vadd.f32 %v3933_v26, %v1588_v25 }
 0xfa7   : > { %v1200_v17 = vpop.permute.xlu0 %1199 }
 0xfa8   : > { %v1202_v31 = vadd.f32 %v1200_v17, %v1192_v5  ;;  %v1600_v5 = vsub.s32 1, %v1591_v14  ;;  %v415_v17 = vld [vmem:[%s5467_s8 + $0x8] sm:$0x7] }
 0xfaa   : > { %3539 = vtanh.f32 %v1202_v31 }
 0xfb4   : > { %v3540_v48 = vpop.eup %3539 }
 0xfb5   : > { %1205 = vrot.lane.b32.xlu1 %v3540_v48, %s3627_s12  ;;  %v1635_v48 = vsel %vm1578_vm3, %v1634_v18, -inf }
0x1027   : > { %v1206_v32 = vpop.permute.xlu1 %1205 }
0x1028   : > { %v1208_v33 = vmul.f32 %v3538_v6, %v1206_v32  ;;  %v3939_v6 = vrot.slane %v414_v16, %v1648_v27 }
0x102a   : > { %1210 = vrot.lane.b32.xlu0 %v1208_v33, %s5471_s16  ;;  %v1650_v32 = vadd.f32 %v3939_v6, %v1588_v25  ;;  %v3950_v33 = vrot.slane %v414_v16, %v1600_v5 }
0x109c   : > { %v1211_v34 = vpop.permute.xlu0 %1210 }
0x109d   : > { %1213 = vst.msk [vmem:[#allocation2 + $0x28] sm:$0xff] %vm593_vm2, %v1211_v34  ;;  %3336 = vmatmul.mubr.msk.f32.vlgmr.msra.gmra.mrb[8].mxu0 %vm593_vm2, %v1211_v34  ;;  %v1608_v34 = vsub.s32 2, %v1591_v14 }
0x109e   : > { %3424 = vmatpush3.bf16.msra.mxu0 %v3421_v8  ;;  %v1423_v8 = vld [vmem:[#allocation2 + $0x18] sm:$0xff] }
0x109f   : > { %3426 = vmatprep.subr.bf16.mxu0 %v3425_v11  ;;  %v1433_v9 = vsel %vm418_vm5, %v1423_v8, %v1424_v7  ;;  %v1434_v10 = vsel %vm418_vm5, %v1424_v7, %v1423_v8 }
0x10a2   : > { %3428 = vmatpush3.bf16.msra.mxu0 %v3425_v11 }
0x1170   : > { %v1283_v35 = vpop.f32.mrb[8].mxu0 }
0x1171   : > { %v1287_v36 = vadd.f32 %v1283_v35, %v3826_v49  ;;  %v3337_v37 = vpop.f32.mrb[9].mxu0  ;;  %v1651_v35 = vsel %vm1578_vm3, %v1650_v32, -inf }
0x1172   : > { %v3954_v37 = vrot.slane %v414_v16, %v1608_v34 }
0x1173   : > { %3541 = vtanh.f32 %v1287_v36  ;;  %v3164_v39 = vmul.f32 -1.442695, %v1287_v36 }
0x1175   : > { %3543 = vpow2.f32 %v3164_v39  ;;  %v1602_v39 = vadd.f32 %v3950_v33, %v1588_v25 }
0x117d   : > { %v3542_v38 = vpop.eup %3541 }
0x117e   : > { %1297 = vrot.lane.b32.xlu1 %v3542_v38, %s3627_s12  ;;  %v1624_v38 = vsub.s32 4, %v1591_v14 }
0x117f   : > { %v3544_v40 = vpop.eup %3543 }
0x1180   : > { %v1291_v41 = vadd.f32 1.0, %v3544_v40 }
0x1182   : > { %3545 = vrcp.f32 %v1291_v41  ;;  %v3958_v41 = vrot.slane %v414_v16, %v1624_v38 }
0x118c   : > { %v3546_v45 = vpop.eup %3545 }
0x118d   : > { %v1295_v50 = vmul.f32 %v3546_v45, %v1202_v31  ;;  %v3946_v31 = vrot.slane %v415_v17, %v1600_v5 }
0x118f   : > { %v1666_v36 = vadd.f32 %v3946_v31, %v1588_v25 }
0x1191   : > { %v1667_v40 = vsel %vm1578_vm3, %v1666_v36, -inf }
0x11f0   : > { %v1298_v46 = vpop.permute.xlu1 %1297 }
0x11f1   : > { %v1300_v47 = vmul.f32 %v3546_v45, %v1298_v46  ;;  %v1603_v46 = vsel %vm1578_vm3, %v1602_v39, -inf }
0x11f3   : > { %1302 = vrot.lane.b32.xlu0 %v1300_v47, %s3627_s12  ;;  %v1610_v47 = vadd.f32 %v3954_v37, %v1588_v25 }
0x1265   : > { %v1303_v51 = vpop.permute.xlu0 %1302 }
0x1266   : > { %v1305_v52 = vadd.f32 %v1303_v51, %v1295_v50  ;;  %v1611_v51 = vsel %vm1578_vm3, %v1610_v47, -inf }
0x1268   : > { %3547 = vtanh.f32 %v1305_v52 }
0x1272   : > { %v3548_v49 = vpop.eup %3547 }
0x1273   : > { %1308 = vrot.lane.b32.xlu1 %v3548_v49, %s3627_s12  ;;  %v3966_v49 = vrot.slane %v415_v17, %v1592_v15 }
0x12e5   : > { %v1309_v53 = vpop.permute.xlu1 %1308 }
0x12e6   : > { %v1311_v54 = vmul.f32 %v3546_v45, %v1309_v53  ;;  %v1640_v45 = vsub.s32 6, %v1591_v14 }
0x12e8   : > { %1313 = vrot.lane.b32.xlu0 %v1311_v54, %s5471_s16  ;;  %v3962_v50 = vrot.slane %v414_v16, %v1640_v45  ;;  %s3177_s16 = sshll.u32 %s3712_s21, 7 }
0x12e9   : > { %s5351_s15 = scalar_lea.hbm %s5470_s11, %s3177_s16  ;;  %s3001_s16 = scalar_lea.sflag [#allocation5], %s392_s22 }
0x12ea   : > { %v1642_v54 = vadd.f32 %v3962_v50, %v1588_v25 }
0x135a   : > { %v1314_v55 = vpop.permute.xlu0 %1313 }
0x135b   : > { %1316 = vst.msk [vmem:[#allocation2 + $0x30] sm:$0xff] %vm593_vm2, %v1314_v55  ;;  %3347 = vmatmul.mubr.msk.f32.vlgmr.msra.gmra.mrb[12].mxu1 %vm593_vm2, %v1314_v55  ;;  %v3970_v55 = vrot.slane %v415_v17, %v1608_v34 }
0x142e   : > { %v1386_v56 = vpop.f32.mrb[12].mxu1 }
0x142f   : > { %v1390_v57 = vadd.f32 %v1386_v56, %v3820_v44  ;;  %v3348_v58 = vpop.f32.mrb[13].mxu1  ;;  %v1643_v56 = vsel %vm1578_vm3, %v1642_v54, -inf }
0x1431   : > { %3549 = vtanh.f32 %v1390_v57  ;;  %v3166_v60 = vmul.f32 -1.442695, %v1390_v57  ;;  %v1658_v57 = vadd.f32 %v3966_v49, %v1588_v25 }
0x1433   : > { %3551 = vpow2.f32 %v3166_v60  ;;  %v1659_v58 = vsel %vm1578_vm3, %v1658_v57, -inf }
0x143b   : > { %v3550_v59 = vpop.eup %3549 }
0x143c   : > { %1400 = vrot.lane.b32.xlu1 %v3550_v59, %s3627_s12  ;;  %v1674_v59 = vadd.f32 %v3970_v55, %v1588_v25 }
0x143d   : > { %v3552_v61 = vpop.eup %3551 }
0x143e   : > { %v1394_v42 = vadd.f32 1.0, %v3552_v61  ;;  %v1675_v60 = vsel %vm1578_vm3, %v1674_v59, -inf }
0x1440   : > { %3553 = vrcp.f32 %v1394_v42  ;;  %v1426_v42 = vld [vmem:[#allocation2 + $0x30] sm:$0xff] }
0x144a   : > { %v3554_v62 = vpop.eup %3553 }
0x144b   : > { %v1398_v1 = vmul.f32 %v3554_v62, %v1305_v52  ;;  %v1626_v52 = vadd.f32 %v3958_v41, %v1588_v25 }
0x144d   : > { %v1627_v53 = vsel %vm1578_vm3, %v1626_v52, -inf }
0x14ae   : > { %v1401_v63 = vpop.permute.xlu1 %1400 }
0x14af   : > { %v1403_v0 = vmul.f32 %v3554_v62, %v1401_v63 }
0x14b1   : > { %1405 = vrot.lane.b32.xlu0 %v1403_v0, %s3627_s12  ;;  %v1425_v0 = vld [vmem:[#allocation2 + $0x28] sm:$0xff] }
0x1523   : > { %v1406_v2 = vpop.permute.xlu0 %1405 }
0x1524   : > { %v1408_v3 = vadd.f32 %v1406_v2, %v1398_v1  ;;  %v1421_v2 = vld [vmem:[#allocation2 + $0x8] sm:$0xff] }
0x1526   : > { %3555 = vtanh.f32 %v1408_v3  ;;  %v1431_v3 = vsel %vm418_vm5, %v1421_v2, %v1426_v42 }
0x1530   : > { %v3556_v44 = vpop.eup %3555 }
0x1531   : > { %1411 = vrot.lane.b32.xlu1 %v3556_v44, %s3627_s12  ;;  %s5493_s12 = smov 64   ;;  %v1422_v44 = vld [vmem:[#allocation2 + $0x10] sm:$0xff] }
0x1532   : > { %v1432_v4 = vsel %vm418_vm5, %v1422_v44, %v1425_v0  ;;  %v1435_v11 = vsel %vm418_vm5, %v1425_v0, %v1422_v44 }
0x1555   : > { %1596 = vmax.xlane.f32.xlu1 %v1595_v29 }
0x1559   : > { %1620 = vmax.xlane.f32.xlu1 %v1619_v30 }
0x155d   : > { %1636 = vmax.xlane.f32.xlu1 %v1635_v48 }
0x1561   : > { %1652 = vmax.xlane.f32.xlu1 %v1651_v35  ;;  %v3167_v35 = vld [vmem:[%s5466_s7] ss:$0 sm:$0xff] }
0x1565   : > { %1668 = vmax.xlane.f32.xlu1 %v1667_v40 }
0x15a3   : > { %v1412_v12 = vpop.permute.xlu1 %1411 }
0x15a4   : > { %v1414_v13 = vmul.f32 %v3554_v62, %v1412_v12  ;;  %v1420_v62 = vld [vmem:[#allocation2] sm:$0xff]  ;;  %v1436_v12 = vsel %vm418_vm5, %v1426_v42, %v1421_v2 }
0x15a6   : > { %1416 = vrot.lane.b32.xlu0 %v1414_v13, %s5493_s12  ;;  %s4018_s12 = scalar_lea.vmem %s5468_s9, %s3753_s25  ;;  %s3630_s25 = smov [#allocation4]  }
0x15a7   : > { %s3563_s13 = sshll.u32 %s3630_s25, 4  ;;  %s3564_s13 = int_to_ptr.vmem [resolvable:$false] %s3563_s13 }
0x15a8   : > { %s3565_s21 = scalar_lea.vmem %s3564_s13, 256  ;;  %p3566_p0 = scmp.lt.s32.totalorder %s5353_s29, %s3564_s13 }
0x15a9   : > { %p3567_p1 = scmp.lt.s32.totalorder %s3565_s21, %s3559_s30 }
0x15ab   : > { %p3568_p2 = por %p3567_p1, %p3566_p0 }
0x15ad   : > { %p3569_p3 = pnand %p3568_p2, %p3562_p13 }
0x15c5   : > { %1604 = vmax.xlane.f32.xlu0 %v1603_v46 }
0x15c9   : > { %1612 = vmax.xlane.f32.xlu0 %v1611_v51 }
0x15cd   : > { %1628 = vmax.xlane.f32.xlu0 %v1627_v53 }
0x15d1   : > { %1644 = vmax.xlane.f32.xlu0 %v1643_v56 }
0x15d5   : > { %1660 = vmax.xlane.f32.xlu0 %v1659_v58 }
0x15d9   : > { %1676 = vmax.xlane.f32.xlu0 %v1675_v60 }
0x15e2   : > { %v1597_v15 = vpop.xlane.xlu1 %1596 }
0x15e6   : > { %v1621_v24 = vpop.xlane.xlu1 %1620 }
0x15ea   : > { %v1637_v28 = vpop.xlane.xlu1 %1636 }
0x15ee   : > { %v1653_v5 = vpop.xlane.xlu1 %1652 }
0x15f2   : > { %v1669_v34 = vpop.xlane.xlu1 %1668 }
0x1618   : > { %v1417_v61 = vpop.permute.xlu0 %1416 }
0x1619   : > { %1419 = vst.msk [vmem:[#allocation2 + $0x38] sm:$0xff] %vm593_vm2, %v1417_v61 }
0x1620   : > { %v1427_v63 = vld [vmem:[#allocation2 + $0x38] sm:$0xff] }
0x1621   : > { %v1430_v1 = vsel %vm418_vm5, %v1420_v62, %v1427_v63  ;;  %v1437_v13 = vsel %vm418_vm5, %v1427_v63, %v1420_v62  ;;  %vm1686_vm5 = vcmask 39936  }
0x1622   : > { %3357 = vmatprep.mubr.msk.f32.mxu0 %vm593_vm2, %v1430_v1 }
0x1623   : > { %3358 = vmatmul.mubr.msk.f32.vlgmr.msra.gmra.mrb[10].mxu0 %vm593_vm2, %v1431_v3 }
0x1624   : > { %3360 = vmatprep.mubr.msk.f32.mxu0 %vm593_vm2, %v1432_v4 }
0x1627   : > { %3361 = vmatmul.mubr.msk.f32.gmra.mrb[12].mxu0 %vm593_vm2, %v1433_v9 }
0x1628   : > { %3363 = vmatprep.mubr.msk.f32.mxu0 %vm593_vm2, %v1434_v10 }
0x162b   : > { %3364 = vmatmul.mubr.msk.f32.gmra.mrb[14].mxu0 %vm593_vm2, %v1435_v11 }
0x162c   : > { %3366 = vmatprep.mubr.msk.f32.mxu0 %vm593_vm2, %v1436_v12 }
0x162f   : > { %3367 = vmatmul.mubr.msk.f32.gmra.mrb[16].mxu0 %vm593_vm2, %v1437_v13  ;;  %vm1688_vm2 = vcmask 48128  }
0x1652   : > { %v1605_v14 = vpop.xlane.xlu0 %1604 }
0x1653   : > { %v1679_v43 = vsel %vm1678_vm4, %v1597_v15, %v1605_v14 }
0x1656   : > { %v1613_v16 = vpop.xlane.xlu0 %1612 }
0x1657   : > { %v1681_v23 = vsel %vm1680_vm6, %v1679_v43, %v1613_v16 }
0x1658   : > { %v1683_v25 = vsel %vm1682_vm7, %v1681_v23, %v1621_v24 }
0x165a   : > { %v1629_v27 = vpop.xlane.xlu0 %1628 }
0x165b   : > { %v1685_v20 = vsel %vm1684_vm8, %v1683_v25, %v1629_v27 }
0x165c   : > { %v1687_v29 = vsel %vm1686_vm5, %v1685_v20, %v1637_v28 }
0x165e   : > { %v1645_v30 = vpop.xlane.xlu0 %1644 }
0x165f   : > { %v1689_v18 = vsel %vm1688_vm2, %v1687_v29, %v1645_v30 }
0x1660   : > { %v1691_v17 = vsel %vm1690_vm9, %v1689_v18, %v1653_v5 }
0x1662   : > { %v1661_v48 = vpop.xlane.xlu0 %1660 }
0x1663   : > { %v1693_v32 = vsel %vm1692_vm10, %v1691_v17, %v1661_v48 }
0x1664   : > { %v1695_v36 = vsel %vm1694_vm11, %v1693_v32, %v1669_v34 }
0x1666   : > { %v1677_v38 = vpop.xlane.xlu0 %1676 }
0x1667   : > { %v1697_v47 = vsel %vm1696_vm12, %v1695_v36, %v1677_v38 }
0x16f6   : > { %v3359_v39 = vpop.f32.mrb[10].mxu0 }
0x16f7   : > { %v4020_v40 = vadd.f32 %v3359_v39, %v3167_v35  ;;  %v1539_v45 = vpop.f32.mrb[11].mxu0 }
0x16f8   : > { %v1540_v46 = vadd.f32 %v3167_v35, %v1539_v45 }
0x16f9   : > { %1580 = vst.msk [vmem:[%s4018_s12 + $0x8] sm:$0xff] %vm1578_vm3, %v4020_v40 }
0x16fa   : > { %1579 = vst.msk [vmem:[%s4018_s12] sm:$0xff] %vm1578_vm3, %v1540_v46  ;;  %v1698_v51 = vadd.f32 %v1697_v47, %v1540_v46  ;;  %v3362_v52 = vpop.f32.mrb[12].mxu0 }
0x16fb   : > { %v4028_v53 = vadd.f32 %v3362_v52, %v3167_v35  ;;  %v1549_v54 = vpop.f32.mrb[13].mxu0 }
0x16fc   : > { %1699 = vst.msk [vmem:[#allocation3 + $0x8] sm:$0xff] %vm1578_vm3, %v1698_v51  ;;  %v4031_v56 = vadd.f32 %v3167_v35, %v1549_v54  ;;  %v1704_v57 = vadd.f32 %v1698_v51, %v3950_v33  ;;  %v1700_v58 = vadd.f32 %v1698_v51, %v3928_v19  ;;  %v1712_v42 = vadd.f32 %v1698_v51, %v3930_v22 }
0x16fd   : > { %1582 = vst.msk [vmem:[%s4018_s12 + $0x18] sm:$0xff] %vm1578_vm3, %v4028_v53  ;;  %v1708_v62 = vadd.f32 %v1698_v51, %v3954_v37  ;;  %v1720_v4 = vadd.f32 %v1698_v51, %v3933_v26  ;;  %v1716_v7 = vadd.f32 %v1698_v51, %v3958_v41  ;;  %v1728_v13 = vadd.f32 %v1698_v51, %v3939_v6 }
0x16fe   : > { %1581 = vst.msk [vmem:[%s4018_s12 + $0x10] sm:$0xff] %vm1578_vm3, %v4031_v56  ;;  %v3365_v59 = vpop.f32.mrb[14].mxu0  ;;  %v1705_v60 = vsel %vm1578_vm3, %v1704_v57, -inf  ;;  %v1701_v61 = vsel %vm1578_vm3, %v1700_v58, -inf  ;;  %v1713_v3 = vsel %vm1578_vm3, %v1712_v42, -inf  ;;  %v1724_v14 = vadd.f32 %v1698_v51, %v3962_v50 }
0x16ff   : > { %v4045_v63 = vadd.f32 %v3365_v59, %v3167_v35  ;;  %v1559_v0 = vpop.f32.mrb[15].mxu0  ;;  %1706 = vmax.xlane.f32.xlu0 %v1705_v60  ;;  %1702 = vmax.xlane.f32.xlu1 %v1701_v61  ;;  %v1709_v44 = vsel %vm1578_vm3, %v1708_v62, -inf  ;;  %v1721_v11 = vsel %vm1578_vm3, %v1720_v4, -inf  ;;  %v1717_v12 = vsel %vm1578_vm3, %v1716_v7, -inf }
0x1700   : > { %v4047_v1 = vadd.f32 %v3167_v35, %v1559_v0  ;;  %v1729_v15 = vsel %vm1578_vm3, %v1728_v13, -inf  ;;  %v1725_v43 = vsel %vm1578_vm3, %v1724_v14, -inf  ;;  %v1736_v16 = vadd.f32 %v1698_v51, %v3946_v31 }
0x1701   : > { %1584 = vst.msk [vmem:[%s4018_s12 + $0x28] sm:$0xff] %vm1578_vm3, %v4045_v63  ;;  %v1732_v23 = vadd.f32 %v1698_v51, %v3966_v49  ;;  %v1740_v27 = vadd.f32 %v1698_v51, %v3970_v55 }
0x1702   : > { %1583 = vst.msk [vmem:[%s4018_s12 + $0x20] sm:$0xff] %vm1578_vm3, %v4047_v1  ;;  %v3368_v2 = vpop.f32.mrb[16].mxu0  ;;  %v1737_v24 = vsel %vm1578_vm3, %v1736_v16, -inf }
0x1703   : > { %v4059_v8 = vadd.f32 %v3368_v2, %v3167_v35  ;;  %v1569_v9 = vpop.f32.mrb[17].mxu0  ;;  %1714 = vmax.xlane.f32.xlu0 %v1713_v3  ;;  %1710 = vmax.xlane.f32.xlu1 %v1709_v44  ;;  %v1733_v25 = vsel %vm1578_vm3, %v1732_v23, -inf  ;;  %v1741_v20 = vsel %vm1578_vm3, %v1740_v27, -inf  ;;  %v4111_v16 = vld [vmem:[#allocation3 + $0x8] sm:$0xff]  ;;  %v4113_v23 = vld [vmem:[#allocation3] sm:$0xff] }
0x1704   : > { %v4061_v10 = vadd.f32 %v3167_v35, %v1569_v9 }
0x1705   : > { %5494 = vst [vmem:[#allocation7_spill] sm:$0xff] %v4059_v8  ;;  %1586 = vst.msk [vmem:[%s4018_s12 + $0x38] sm:$0xff] %vm1578_vm3, %v4059_v8 }
0x1706   : > { %1585 = vst.msk [vmem:[%s4018_s12 + $0x30] sm:$0xff] %vm1578_vm3, %v4061_v10 }
0x1707   : > { %1722 = vmax.xlane.f32.xlu0 %v1721_v11  ;;  %1718 = vmax.xlane.f32.xlu1 %v1717_v12 }
0x170b   : > { %1730 = vmax.xlane.f32.xlu0 %v1729_v15  ;;  %1726 = vmax.xlane.f32.xlu1 %v1725_v43 }
0x170f   : > { %1738 = vmax.xlane.f32.xlu0 %v1737_v24  ;;  %1734 = vmax.xlane.f32.xlu1 %v1733_v25 }
0x1713   : > { %1742 = vmax.xlane.f32.xlu1 %v1741_v20  ;;  %v4120_v20 = vadd.f32 %v4111_v16, %v3928_v19 }
0x178c   : > { %v1707_v28 = vpop.xlane.xlu0 %1706  ;;  %v1703_v29 = vpop.xlane.xlu1 %1702 }
0x178d   : > { %v1744_v30 = vsel %vm1678_vm4, %v1703_v29, %v1707_v28  ;;  %v4124_v28 = vadd.f32 %v4113_v23, %v3928_v19 }
0x1790   : > { %v1715_v18 = vpop.xlane.xlu0 %1714  ;;  %v1711_v5 = vpop.xlane.xlu1 %1710 }
0x1791   : > { %v1745_v17 = vsel %vm1680_vm6, %v1744_v30, %v1711_v5  ;;  %v2113_v30 = vsel %vm1578_vm3, %v4120_v20, -inf  ;;  %v2110_v5 = vsel %vm1578_vm3, %v4124_v28, -inf }
0x1792   : > { %v1746_v32 = vsel %vm1682_vm7, %v1745_v17, %v1715_v18 }
0x1794   : > { %v1723_v48 = vpop.xlane.xlu0 %1722  ;;  %v1719_v34 = vpop.xlane.xlu1 %1718 }
0x1795   : > { %v1747_v35 = vsel %vm1684_vm8, %v1746_v32, %v1719_v34 }
0x1796   : > { %v1748_v38 = vsel %vm1686_vm5, %v1747_v35, %v1723_v48 }
0x1798   : > { %v1731_v36 = vpop.xlane.xlu0 %1730  ;;  %v1727_v39 = vpop.xlane.xlu1 %1726 }
0x1799   : > { %v1749_v45 = vsel %vm1688_vm2, %v1748_v38, %v1727_v39 }
0x179a   : > { %v1750_v46 = vsel %vm1690_vm9, %v1749_v45, %v1731_v36 }
0x179c   : > { %v1735_v47 = vpop.xlane.xlu1 %1734  ;;  %v1739_v51 = vpop.xlane.xlu0 %1738 }
0x179d   : > { %v1751_v52 = vsel %vm1692_vm10, %v1750_v46, %v1735_v47 }
0x179e   : > { %v1752_v54 = vsel %vm1694_vm11, %v1751_v52, %v1739_v51 }
0x17a0   : > { %v1743_v57 = vpop.xlane.xlu1 %1742 }
0x17a1   : > { %v1753_v58 = vsel %vm1696_vm12, %v1752_v54, %v1743_v57 }
0x17a2   : > { %v1754_v59 = vadd.f32 %v1753_v58, %v4020_v40 }
0x17a4   : > { %1755 = vst.msk [vmem:[#allocation3 + $0x10] sm:$0xff] %vm1578_vm3, %v1754_v59  ;;  %v1760_v60 = vadd.f32 %v1754_v59, %v3950_v33  ;;  %v1756_v61 = vadd.f32 %v1754_v59, %v3928_v19  ;;  %v1768_v0 = vadd.f32 %v1754_v59, %v3930_v22  ;;  %v1764_v2 = vadd.f32 %v1754_v59, %v3954_v37 }
0x17a5   : > { %v1776_v44 = vadd.f32 %v1754_v59, %v3933_v26  ;;  %v1772_v4 = vadd.f32 %v1754_v59, %v3958_v41  ;;  %v1784_v11 = vadd.f32 %v1754_v59, %v3939_v6  ;;  %v1780_v12 = vadd.f32 %v1754_v59, %v3962_v50 }
0x17a6   : > { %v1761_v42 = vsel %vm1578_vm3, %v1760_v60, -inf  ;;  %v1757_v62 = vsel %vm1578_vm3, %v1756_v61, -inf  ;;  %v1769_v3 = vsel %vm1578_vm3, %v1768_v0, -inf  ;;  %v1765_v40 = vsel %vm1578_vm3, %v1764_v2, -inf }
0x17a7   : > { %1762 = vmax.xlane.f32.xlu1 %v1761_v42  ;;  %1758 = vmax.xlane.f32.xlu0 %v1757_v62  ;;  %v1777_v7 = vsel %vm1578_vm3, %v1776_v44, -inf  ;;  %v1773_v9 = vsel %vm1578_vm3, %v1772_v4, -inf  ;;  %v1785_v13 = vsel %vm1578_vm3, %v1784_v11, -inf  ;;  %v1781_v14 = vsel %vm1578_vm3, %v1780_v12, -inf }
0x17a8   : > { %v1792_v15 = vadd.f32 %v1754_v59, %v3946_v31  ;;  %v1788_v43 = vadd.f32 %v1754_v59, %v3966_v49  ;;  %v1796_v27 = vadd.f32 %v1754_v59, %v3970_v55 }
0x17aa   : > { %v1793_v24 = vsel %vm1578_vm3, %v1792_v15, -inf  ;;  %v1789_v25 = vsel %vm1578_vm3, %v1788_v43, -inf  ;;  %v1797_v29 = vsel %vm1578_vm3, %v1796_v27, -inf }
0x17ab   : > { %1770 = vmax.xlane.f32.xlu1 %v1769_v3  ;;  %1766 = vmax.xlane.f32.xlu0 %v1765_v40  ;;  %v4129_v18 = vld [vmem:[#allocation3 + $0x10] sm:$0xff] }
0x17ac   : > { %v4135_v17 = vadd.f32 %v4129_v18, %v3928_v19 }
0x17ae   : > { %v2116_v48 = vsel %vm1578_vm3, %v4135_v17, -inf }
0x17af   : > { %1778 = vmax.xlane.f32.xlu1 %v1777_v7  ;;  %1774 = vmax.xlane.f32.xlu0 %v1773_v9 }
0x17b3   : > { %1786 = vmax.xlane.f32.xlu1 %v1785_v13  ;;  %1782 = vmax.xlane.f32.xlu0 %v1781_v14 }
0x17b7   : > { %1794 = vmax.xlane.f32.xlu1 %v1793_v24  ;;  %1790 = vmax.xlane.f32.xlu0 %v1789_v25 }
0x17bb   : > { %1798 = vmax.xlane.f32.xlu0 %v1797_v29  ;;  %2114 = vmax.xlane.f32.xlu1 %v2113_v30 }
0x17bf   : > { %2111 = vmax.xlane.f32.xlu0 %v2110_v5 }
0x17c3   : > { %2117 = vmax.xlane.f32.xlu0 %v2116_v48 }
0x1834   : > { %v1763_v32 = vpop.xlane.xlu1 %1762  ;;  %v1759_v34 = vpop.xlane.xlu0 %1758 }
0x1835   : > { %v1800_v35 = vsel %vm1678_vm4, %v1759_v34, %v1763_v32  ;;  %v4171_v34 = vcvt.s32.f32 %v3802_v21 }
0x1838   : > { %v1771_v36 = vpop.xlane.xlu1 %1770  ;;  %v1767_v38 = vpop.xlane.xlu0 %1766 }
0x1839   : > { %v1801_v39 = vsel %vm1680_vm6, %v1800_v35, %v1767_v38 }
0x183a   : > { %v1802_v46 = vsel %vm1682_vm7, %v1801_v39, %v1771_v36 }
0x183c   : > { %v1779_v45 = vpop.xlane.xlu1 %1778  ;;  %v1775_v47 = vpop.xlane.xlu0 %1774 }
0x183d   : > { %v1803_v51 = vsel %vm1684_vm8, %v1802_v46, %v1775_v47  ;;  %v2174_v47 = vadd.f32 %v4113_v23, %v3950_v33 }
0x183e   : > { %v1804_v54 = vsel %vm1686_vm5, %v1803_v51, %v1779_v45 }
0x1840   : > { %v1787_v52 = vpop.xlane.xlu1 %1786  ;;  %v1783_v57 = vpop.xlane.xlu0 %1782 }
0x1841   : > { %v1805_v58 = vsel %vm1688_vm2, %v1804_v54, %v1783_v57  ;;  %v2182_v54 = vsel %vm1578_vm3, %v2174_v47, -inf }
0x1842   : > { %v1806_v59 = vsel %vm1690_vm9, %v1805_v58, %v1787_v52  ;;  %v2176_v58 = vadd.f32 %v4129_v18, %v3950_v33 }
0x1844   : > { %v1791_v60 = vpop.xlane.xlu0 %1790  ;;  %v1795_v61 = vpop.xlane.xlu1 %1794 }
0x1845   : > { %v1807_v42 = vsel %vm1692_vm10, %v1806_v59, %v1791_v60  ;;  %v2188_v59 = vsel %vm1578_vm3, %v2176_v58, -inf }
0x1846   : > { %v1808_v62 = vsel %vm1694_vm11, %v1807_v42, %v1795_v61 }
0x1848   : > { %v1799_v0 = vpop.xlane.xlu0 %1798  ;;  %v2115_v29 = vpop.xlane.xlu1 %2114 }
0x1849   : > { %v1809_v2 = vsel %vm1696_vm12, %v1808_v62, %v1799_v0  ;;  %vm2135_vm14 = vcmp.eq.f32.partialorder %v4120_v20, %v2115_v29 }
0x184a   : > { %v1810_v3 = vadd.f32 %v1809_v2, %v4031_v56  ;;  %v2143_v39 = vsel %vm2135_vm14, %v4171_v34, 11.0 }
0x184b   : > { %v2153_v45 = vsel %vm1578_vm3, %v2143_v39, inf  ;;  %v2247_v39 = vadd.f32 %v4111_v16, %v3954_v37 }
0x184c   : > { %1811 = vst.msk [vmem:[#allocation3 + $0x18] sm:$0xff] %vm1578_vm3, %v1810_v3  ;;  %v1816_v40 = vadd.f32 %v1810_v3, %v3950_v33  ;;  %v1812_v44 = vadd.f32 %v1810_v3, %v3928_v19  ;;  %v1824_v9 = vadd.f32 %v1810_v3, %v3930_v22  ;;  %v1820_v11 = vadd.f32 %v1810_v3, %v3954_v37  ;;  %v2112_v27 = vpop.xlane.xlu0 %2111 }
0x184d   : > { %v1832_v13 = vadd.f32 %v1810_v3, %v3933_v26  ;;  %v1828_v14 = vadd.f32 %v1810_v3, %v3958_v41  ;;  %v1840_v24 = vadd.f32 %v1810_v3, %v3939_v6  ;;  %v1836_v25 = vadd.f32 %v1810_v3, %v3962_v50 }
0x184e   : > { %v1817_v4 = vsel %vm1578_vm3, %v1816_v40, -inf  ;;  %v1813_v7 = vsel %vm1578_vm3, %v1812_v44, -inf  ;;  %v1825_v12 = vsel %vm1578_vm3, %v1824_v9, -inf  ;;  %v1821_v56 = vsel %vm1578_vm3, %v1820_v11, -inf }
0x184f   : > { %1818 = vmax.xlane.f32.xlu0 %v1817_v4  ;;  %1814 = vmax.xlane.f32.xlu1 %v1813_v7  ;;  %v1833_v15 = vsel %vm1578_vm3, %v1832_v13, -inf  ;;  %v1829_v43 = vsel %vm1578_vm3, %v1828_v14, -inf  ;;  %vm2134_vm13 = vcmp.eq.f32.partialorder %v4124_v28, %v2112_v27  ;;  %v1841_v30 = vsel %vm1578_vm3, %v1840_v24, -inf }
0x1850   : > { %v1837_v5 = vsel %vm1578_vm3, %v1836_v25, -inf  ;;  %v1848_v48 = vadd.f32 %v1810_v3, %v3946_v31  ;;  %v1844_v32 = vadd.f32 %v1810_v3, %v3966_v49  ;;  %v2118_v35 = vpop.xlane.xlu0 %2117  ;;  %v2142_v36 = vsel %vm2134_vm13, %v4171_v34, 11.0 }
0x1851   : > { %vm2136_vm15 = vcmp.eq.f32.partialorder %v4135_v17, %v2118_v35  ;;  %v2150_v21 = vsel %vm1578_vm3, %v2142_v36, inf  ;;  %v1852_v46 = vadd.f32 %v1810_v3, %v3970_v55  ;;  %v2175_v17 = vadd.f32 %v4111_v16, %v3950_v33 }
0x1852   : > { %v1849_v28 = vsel %vm1578_vm3, %v1848_v48, -inf  ;;  %v1845_v38 = vsel %vm1578_vm3, %v1844_v32, -inf  ;;  %v2144_v20 = vsel %vm2136_vm15, %v4171_v34, 11.0 }
0x1853   : > { %1826 = vmax.xlane.f32.xlu0 %v1825_v12  ;;  %1822 = vmax.xlane.f32.xlu1 %v1821_v56  ;;  %v2156_v51 = vsel %vm1578_vm3, %v2144_v20, inf  ;;  %v1853_v52 = vsel %vm1578_vm3, %v1852_v46, -inf  ;;  %v2185_v57 = vsel %vm1578_vm3, %v2175_v17, -inf  ;;  %v2257_v20 = vsel %vm1578_vm3, %v2247_v39, -inf }
0x1857   : > { %1834 = vmax.xlane.f32.xlu0 %v1833_v15  ;;  %1830 = vmax.xlane.f32.xlu1 %v1829_v43 }
0x185b   : > { %1842 = vmax.xlane.f32.xlu0 %v1841_v30  ;;  %1838 = vmax.xlane.f32.xlu1 %v1837_v5 }
0x185f   : > { %1850 = vmax.xlane.f32.xlu0 %v1849_v28  ;;  %1846 = vmax.xlane.f32.xlu1 %v1845_v38 }
0x1863   : > { %2151 = vmin.xlane.f32.xlu0 %v2150_v21  ;;  %2154 = vmin.xlane.f32.xlu1 %v2153_v45  ;;  %v2246_v21 = vadd.f32 %v4113_v23, %v3954_v37 }
0x1867   : > { %2157 = vmin.xlane.f32.xlu0 %v2156_v51  ;;  %1854 = vmax.xlane.f32.xlu1 %v1853_v52  ;;  %v2248_v51 = vadd.f32 %v4129_v18, %v3954_v37 }
0x1869   : > { %v2260_v52 = vsel %vm1578_vm3, %v2248_v51, -inf }
0x186b   : > { %2183 = vmax.xlane.f32.xlu0 %v2182_v54  ;;  %2186 = vmax.xlane.f32.xlu1 %v2185_v57 }
0x186f   : > { %2189 = vmax.xlane.f32.xlu0 %v2188_v59 }
0x18dc   : > { %v1819_v60 = vpop.xlane.xlu0 %1818  ;;  %v1815_v61 = vpop.xlane.xlu1 %1814 }
0x18dd   : > { %v1856_v0 = vsel %vm1678_vm4, %v1815_v61, %v1819_v60  ;;  %v2319_v61 = vadd.f32 %v4111_v16, %v3930_v22 }
0x18e0   : > { %v1827_v42 = vpop.xlane.xlu0 %1826  ;;  %v1823_v62 = vpop.xlane.xlu1 %1822 }
0x18e1   : > { %v1857_v40 = vsel %vm1680_vm6, %v1856_v0, %v1823_v62 }
0x18e2   : > { %v1858_v44 = vsel %vm1682_vm7, %v1857_v40, %v1827_v42  ;;  %v2318_v40 = vadd.f32 %v4113_v23, %v3930_v22 }
0x18e4   : > { %v1835_v2 = vpop.xlane.xlu0 %1834  ;;  %v1831_v3 = vpop.xlane.xlu1 %1830 }
0x18e5   : > { %v1859_v9 = vsel %vm1684_vm8, %v1858_v44, %v1831_v3 }
0x18e6   : > { %v1860_v11 = vsel %vm1686_vm5, %v1859_v9, %v1835_v2  ;;  %v2329_v2 = vsel %vm1578_vm3, %v2319_v61, -inf  ;;  %v2320_v9 = vadd.f32 %v4129_v18, %v3930_v22 }
0x18e8   : > { %v1843_v4 = vpop.xlane.xlu0 %1842  ;;  %v1839_v7 = vpop.xlane.xlu1 %1838 }
0x18e9   : > { %v1861_v13 = vsel %vm1688_vm2, %v1860_v11, %v1839_v7  ;;  %v2326_v7 = vsel %vm1578_vm3, %v2318_v40, -inf  ;;  %v2332_v11 = vsel %vm1578_vm3, %v2320_v9, -inf }
0x18ea   : > { %v1862_v14 = vsel %vm1690_vm9, %v1861_v13, %v1843_v4 }
0x18ec   : > { %v1851_v12 = vpop.xlane.xlu0 %1850  ;;  %v1847_v56 = vpop.xlane.xlu1 %1846 }
0x18ed   : > { %v1863_v24 = vsel %vm1692_vm10, %v1862_v14, %v1847_v56 }
0x18ee   : > { %v1864_v27 = vsel %vm1694_vm11, %v1863_v24, %v1851_v12 }
0x18f0   : > { %v4201_v15 = vpop.xlane.xlu0 %2151  ;;  %v4203_v43 = vpop.xlane.xlu1 %2154 }
0x18f1   : > { %5495 = vst [vmem:[#allocation8_spill] sm:$0xff] %v4201_v15 }
0x18f4   : > { %v4206_v25 = vpop.xlane.xlu0 %2157  ;;  %v1855_v29 = vpop.xlane.xlu1 %1854 }
0x18f5   : > { %5496 = vst [vmem:[#allocation9_spill] sm:$0xff] %v4206_v25  ;;  %v1865_v30 = vsel %vm1696_vm12, %v1864_v27, %v1855_v29  ;;  %v4259_v27 = vadd.f32 %v4111_v16, %v3958_v41 }
0x18f6   : > { %v4211_v5 = vadd.f32 %v1865_v30, %v4028_v53  ;;  %v4263_v30 = vld [vmem:[#allocation3 + $0x18] sm:$0xff] }
0x18f8   : > { %1867 = vst.msk [vmem:[#allocation3 + $0x20] sm:$0xff] %vm1578_vm3, %v4211_v5  ;;  %v2184_v48 = vpop.xlane.xlu0 %2183  ;;  %v2187_v32 = vpop.xlane.xlu1 %2186 }
0x18f9   : > { %vm2206_vm0 = vcmp.eq.f32.partialorder %v2174_v47, %v2184_v48  ;;  %vm2207_vm1 = vcmp.eq.f32.partialorder %v2175_v17, %v2187_v32  ;;  %v2254_v47 = vsel %vm1578_vm3, %v2246_v21, -inf  ;;  %v2401_v48 = vsel %vm1578_vm3, %v4259_v27, -inf }
0x18fa   : > { %v2214_v35 = vsel %vm2206_vm0, %v4171_v34, 11.0  ;;  %v2215_v36 = vsel %vm2207_vm1, %v4171_v34, 11.0  ;;  %v2105_v32 = vadd.f32 %v4263_v30, %v3928_v19 }
0x18fb   : > { %v2222_v28 = vsel %vm1578_vm3, %v2214_v35, inf  ;;  %v2225_v38 = vsel %vm1578_vm3, %v2215_v36, inf }
0x18fc   : > { %2223 = vmin.xlane.f32.xlu0 %v2222_v28  ;;  %v2190_v53 = vpop.xlane.xlu0 %2189  ;;  %2226 = vmin.xlane.f32.xlu1 %v2225_v38  ;;  %v2119_v38 = vsel %vm1578_vm3, %v2105_v32, -inf }
0x18fd   : > { %vm2208_vm13 = vcmp.eq.f32.partialorder %v2176_v58, %v2190_v53 }
0x18fe   : > { %v2216_v45 = vsel %vm2208_vm13, %v4171_v34, 11.0 }
0x18ff   : > { %v2228_v46 = vsel %vm1578_vm3, %v2216_v45, inf }
0x1900   : > { %2229 = vmin.xlane.f32.xlu0 %v2228_v46  ;;  %2258 = vmax.xlane.f32.xlu1 %v2257_v20 }
0x1904   : > { %2255 = vmax.xlane.f32.xlu0 %v2254_v47  ;;  %v2249_v47 = vadd.f32 %v4263_v30, %v3954_v37 }
0x1908   : > { %2261 = vmax.xlane.f32.xlu0 %v2260_v52  ;;  %v2263_v52 = vsel %vm1578_vm3, %v2249_v47, -inf }
0x1989   : > { %v4230_v17 = vpop.xlane.xlu0 %2223  ;;  %v4232_v54 = vpop.xlane.xlu1 %2226 }
0x198d   : > { %v4234_v57 = vpop.xlane.xlu0 %2229  ;;  %v2259_v58 = vpop.xlane.xlu1 %2258 }
0x198e   : > { %5497 = vst [vmem:[#allocation10_spill] sm:$0xff] %v4234_v57  ;;  %vm2279_vm14 = vcmp.eq.f32.partialorder %v2247_v39, %v2259_v58  ;;  %v2177_v39 = vadd.f32 %v4263_v30, %v3950_v33  ;;  %v2392_v58 = vadd.f32 %v4129_v18, %v3958_v41 }
0x198f   : > { %v2287_v59 = vsel %vm2279_vm14, %v4171_v34, 11.0 }
0x1990   : > { %v2297_v60 = vsel %vm1578_vm3, %v2287_v59, inf  ;;  %v2191_v20 = vsel %vm1578_vm3, %v2177_v39, -inf  ;;  %v2321_v59 = vadd.f32 %v4263_v30, %v3930_v22 }
0x1991   : > { %v2256_v42 = vpop.xlane.xlu0 %2255  ;;  %2298 = vmin.xlane.f32.xlu1 %v2297_v60  ;;  %v2404_v60 = vsel %vm1578_vm3, %v2392_v58, -inf }
0x1992   : > { %vm2278_vm15 = vcmp.eq.f32.partialorder %v2246_v21, %v2256_v42  ;;  %v2390_v21 = vadd.f32 %v4113_v23, %v3958_v41  ;;  %v1868_v42 = vadd.f32 %v4211_v5, %v3928_v19 }
0x1993   : > { %v2286_v62 = vsel %vm2278_vm15, %v4171_v34, 11.0 }
0x1994   : > { %v2294_v0 = vsel %vm1578_vm3, %v2286_v62, inf  ;;  %v4293_v62 = vadd.f32 %v4263_v30, %v3958_v41 }
0x1995   : > { %2295 = vmin.xlane.f32.xlu0 %v2294_v0  ;;  %v2262_v3 = vpop.xlane.xlu0 %2261  ;;  %2330 = vmax.xlane.f32.xlu1 %v2329_v2  ;;  %v1869_v0 = vsel %vm1578_vm3, %v1868_v42, -inf }
0x1996   : > { %vm2280_vm0 = vcmp.eq.f32.partialorder %v2248_v51, %v2262_v3  ;;  %v2398_v51 = vsel %vm1578_vm3, %v2390_v21, -inf  ;;  %v2407_v2 = vsel %vm1578_vm3, %v4293_v62, -inf  ;;  %v1876_v3 = vadd.f32 %v4211_v5, %v3954_v37 }
0x1997   : > { %v2288_v44 = vsel %vm2280_vm0, %v4171_v34, 11.0 }
0x1998   : > { %v2300_v4 = vsel %vm1578_vm3, %v2288_v44, inf  ;;  %v1884_v44 = vadd.f32 %v4211_v5, %v3958_v41 }
0x1999   : > { %2301 = vmin.xlane.f32.xlu0 %v2300_v4 }
0x199a   : > { %v1885_v4 = vsel %vm1578_vm3, %v1884_v44, -inf }
0x199d   : > { %2327 = vmax.xlane.f32.xlu0 %v2326_v7  ;;  %v1892_v7 = vadd.f32 %v4211_v5, %v3962_v50 }
0x19a1   : > { %2333 = vmax.xlane.f32.xlu0 %v2332_v11  ;;  %v1900_v11 = vadd.f32 %v4211_v5, %v3966_v49 }
0x1a1e   : > { %v4251_v12 = vpop.xlane.xlu1 %2298 }
0x1a22   : > { %v4253_v56 = vpop.xlane.xlu0 %2295  ;;  %v2331_v13 = vpop.xlane.xlu1 %2330 }
0x1a23   : > { %5498 = vst [vmem:[#allocation11_spill] sm:$0xff] %v4253_v56  ;;  %vm2351_vm1 = vcmp.eq.f32.partialorder %v2319_v61, %v2331_v13  ;;  %v2335_v61 = vsel %vm1578_vm3, %v2321_v59, -inf  ;;  %v1901_v13 = vsel %vm1578_vm3, %v1900_v11, -inf }
0x1a24   : > { %v2359_v14 = vsel %vm2351_vm1, %v4171_v34, 11.0 }
0x1a25   : > { %v2369_v24 = vsel %vm1578_vm3, %v2359_v14, inf  ;;  %v1908_v14 = vadd.f32 %v4211_v5, %v3970_v55 }
0x1a26   : > { %v4261_v29 = vpop.xlane.xlu0 %2301  ;;  %2370 = vmin.xlane.f32.xlu1 %v2369_v24 }
0x1a27   : > { %5499 = vst [vmem:[#allocation12_spill] sm:$0xff] %v4261_v29  ;;  %v1909_v24 = vsel %vm1578_vm3, %v1908_v14, -inf  ;;  %v1888_v14 = vadd.f32 %v4211_v5, %v3933_v26 }
0x1a2a   : > { %v2328_v35 = vpop.xlane.xlu0 %2327  ;;  %2402 = vmax.xlane.f32.xlu1 %v2401_v48 }
0x1a2b   : > { %vm2350_vm13 = vcmp.eq.f32.partialorder %v2318_v40, %v2328_v35  ;;  %v1877_v40 = vsel %vm1578_vm3, %v1876_v3, -inf  ;;  %v2462_v3 = vadd.f32 %v4113_v23, %v3933_v26 }
0x1a2c   : > { %v2358_v36 = vsel %vm2350_vm13, %v4171_v34, 11.0 }
0x1a2d   : > { %v2366_v28 = vsel %vm1578_vm3, %v2358_v36, inf }
0x1a2e   : > { %2367 = vmin.xlane.f32.xlu0 %v2366_v28  ;;  %v2334_v53 = vpop.xlane.xlu0 %2333  ;;  %2120 = vmax.xlane.f32.xlu1 %v2119_v38 }
0x1a2f   : > { %vm2352_vm14 = vcmp.eq.f32.partialorder %v2320_v9, %v2334_v53  ;;  %v1893_v9 = vsel %vm1578_vm3, %v1892_v7, -inf  ;;  %v2470_v7 = vsel %vm1578_vm3, %v2462_v3, -inf }
0x1a30   : > { %v2360_v45 = vsel %vm2352_vm14, %v4171_v34, 11.0 }
0x1a31   : > { %v2372_v46 = vsel %vm1578_vm3, %v2360_v45, inf }
0x1a32   : > { %2373 = vmin.xlane.f32.xlu0 %v2372_v46  ;;  %2192 = vmax.xlane.f32.xlu1 %v2191_v20 }
0x1a36   : > { %2399 = vmax.xlane.f32.xlu0 %v2398_v51  ;;  %2264 = vmax.xlane.f32.xlu1 %v2263_v52 }
0x1a3a   : > { %2405 = vmax.xlane.f32.xlu0 %v2404_v60  ;;  %2336 = vmax.xlane.f32.xlu1 %v2335_v61 }
0x1a3e   : > { %1870 = vmax.xlane.f32.xlu0 %v1869_v0  ;;  %2408 = vmax.xlane.f32.xlu1 %v2407_v2 }
0x1a42   : > { %1878 = vmax.xlane.f32.xlu0 %v1877_v40 }
0x1a46   : > { %1886 = vmax.xlane.f32.xlu0 %v1885_v4  ;;  %v1872_v4 = vadd.f32 %v4211_v5, %v3950_v33 }
0x1a4a   : > { %1894 = vmax.xlane.f32.xlu0 %v1893_v9  ;;  %v1880_v9 = vadd.f32 %v4211_v5, %v3930_v22 }
0x1a4e   : > { %1902 = vmax.xlane.f32.xlu0 %v1901_v13  ;;  %v1881_v13 = vsel %vm1578_vm3, %v1880_v9, -inf }
0x1a52   : > { %1910 = vmax.xlane.f32.xlu0 %v1909_v24  ;;  %v1889_v24 = vsel %vm1578_vm3, %v1888_v14, -inf }
0x1ab3   : > { %v4313_v48 = vpop.xlane.xlu1 %2370 }
0x1ab7   : > { %v2403_v35 = vpop.xlane.xlu1 %2402 }
0x1abb   : > { %v4315_v36 = vpop.xlane.xlu0 %2367  ;;  %v2121_v28 = vpop.xlane.xlu1 %2120 }
0x1abc   : > { %5500 = vst [vmem:[#allocation13_spill] sm:$0xff] %v4315_v36  ;;  %vm2137_vm15 = vcmp.eq.f32.partialorder %v2105_v32, %v2121_v28  ;;  %v1896_v28 = vadd.f32 %v4211_v5, %v3939_v6  ;;  %v3558_v36 = vld [vmem:[#allocation3 + $0x10] sm:$0xff] }
0x1abd   : > { %v2145_v38 = vsel %vm2137_vm15, %v4171_v34, 11.0 }
0x1abe   : > { %v2159_v53 = vsel %vm1578_vm3, %v2145_v38, inf  ;;  %v1897_v38 = vsel %vm1578_vm3, %v1896_v28, -inf }
0x1abf   : > { %v4319_v45 = vpop.xlane.xlu0 %2373  ;;  %2160 = vmin.xlane.f32.xlu1 %v2159_v53  ;;  %v2193_v46 = vpop.xlane.xlu1 %2192  ;;  %v1904_v53 = vadd.f32 %v4211_v5, %v3946_v31  ;;  %v4363_v5 = vadd.f32 %v4111_v16, %v3933_v26 }
0x1ac0   : > { %5501 = vst [vmem:[#allocation14_spill] sm:$0xff] %v4319_v45  ;;  %vm2209_vm0 = vcmp.eq.f32.partialorder %v2177_v39, %v2193_v46 }
0x1ac1   : > { %v2217_v20 = vsel %vm2209_vm0, %v4171_v34, 11.0  ;;  %vm2423_vm0 = vcmp.eq.f32.partialorder %v4259_v27, %v2403_v35  ;;  %v2473_v27 = vsel %vm1578_vm3, %v4363_v5, -inf  ;;  %v4369_v35 = vadd.f32 %v4263_v30, %v3933_v26 }
0x1ac2   : > { %v2231_v51 = vsel %vm1578_vm3, %v2217_v20, inf  ;;  %v1905_v20 = vsel %vm1578_vm3, %v1904_v53, -inf }
0x1ac3   : > { %v2400_v52 = vpop.xlane.xlu0 %2399  ;;  %2232 = vmin.xlane.f32.xlu1 %v2231_v51  ;;  %v2265_v60 = vpop.xlane.xlu1 %2264  ;;  %v2431_v51 = vsel %vm2423_vm0, %v4171_v34, 11.0 }
0x1ac4   : > { %vm2422_vm1 = vcmp.eq.f32.partialorder %v2390_v21, %v2400_v52  ;;  %vm2281_vm13 = vcmp.eq.f32.partialorder %v2249_v47, %v2265_v60  ;;  %v2441_v52 = vsel %vm1578_vm3, %v2431_v51, inf }
0x1ac5   : > { %v2430_v32 = vsel %vm2422_vm1, %v4171_v34, 11.0  ;;  %v2289_v61 = vsel %vm2281_vm13, %v4171_v34, 11.0 }
0x1ac6   : > { %v2438_v42 = vsel %vm1578_vm3, %v2430_v32, inf  ;;  %v2303_v0 = vsel %vm1578_vm3, %v2289_v61, inf }
0x1ac7   : > { %v2406_v2 = vpop.xlane.xlu0 %2405  ;;  %2439 = vmin.xlane.f32.xlu0 %v2438_v42  ;;  %2304 = vmin.xlane.f32.xlu1 %v2303_v0  ;;  %v2337_v39 = vpop.xlane.xlu1 %2336 }
0x1ac8   : > { %vm2424_vm14 = vcmp.eq.f32.partialorder %v2392_v58, %v2406_v2  ;;  %vm2353_vm15 = vcmp.eq.f32.partialorder %v2321_v59, %v2337_v39  ;;  %v1873_v58 = vsel %vm1578_vm3, %v1872_v4, -inf  ;;  %v4339_v59 = vadd.f32 %v4129_v18, %v3933_v26 }
0x1ac9   : > { %v2432_v21 = vsel %vm2424_vm14, %v4171_v34, 11.0  ;;  %v2361_v47 = vsel %vm2353_vm15, %v4171_v34, 11.0 }
0x1aca   : > { %v2444_v40 = vsel %vm1578_vm3, %v2432_v21, inf  ;;  %v2375_v44 = vsel %vm1578_vm3, %v2361_v47, inf  ;;  %v2476_v11 = vsel %vm1578_vm3, %v4339_v59, -inf }
0x1acb   : > { %2445 = vmin.xlane.f32.xlu0 %v2444_v40  ;;  %2376 = vmin.xlane.f32.xlu1 %v2375_v44  ;;  %v2409_v46 = vpop.xlane.xlu1 %2408  ;;  %v1871_v61 = vpop.xlane.xlu0 %1870 }
0x1acc   : > { %vm2425_vm1 = vcmp.eq.f32.partialorder %v4293_v62, %v2409_v46  ;;  %v2479_v62 = vsel %vm1578_vm3, %v4369_v35, -inf }
0x1acd   : > { %v2433_v60 = vsel %vm2425_vm1, %v4171_v34, 11.0 }
0x1ace   : > { %v2447_v32 = vsel %vm1578_vm3, %v2433_v60, inf }
0x1acf   : > { %2471 = vmax.xlane.f32.xlu0 %v2470_v7  ;;  %1874 = vmax.xlane.f32.xlu1 %v1873_v58  ;;  %v1879_v42 = vpop.xlane.xlu0 %1878 }
0x1ad3   : > { %2477 = vmax.xlane.f32.xlu0 %v2476_v11  ;;  %1882 = vmax.xlane.f32.xlu1 %v1881_v13  ;;  %v1887_v0 = vpop.xlane.xlu0 %1886  ;;  %v4385_v13 = vld [vmem:[#allocation3 + $0x20] sm:$0xff] }
0x1ad7   : > { %1890 = vmax.xlane.f32.xlu1 %v1889_v24  ;;  %v1895_v2 = vpop.xlane.xlu0 %1894 }
0x1adb   : > { %1898 = vmax.xlane.f32.xlu1 %v1897_v38  ;;  %v1903_v39 = vpop.xlane.xlu0 %1902  ;;  %v4392_v38 = vadd.f32 %v4385_v13, %v3928_v19 }
0x1add   : > { %v2122_v51 = vsel %vm1578_vm3, %v4392_v38, -inf }
0x1adf   : > { %1906 = vmax.xlane.f32.xlu1 %v1905_v20  ;;  %v1911_v47 = vpop.xlane.xlu0 %1910 }
0x1ae3   : > { %2442 = vmin.xlane.f32.xlu1 %v2441_v52 }
0x1ae7   : > { %2448 = vmin.xlane.f32.xlu1 %v2447_v32 }
0x1aeb   : > { %2474 = vmax.xlane.f32.xlu1 %v2473_v27 }
0x1aef   : > { %2480 = vmax.xlane.f32.xlu1 %v2479_v62  ;;  %v4408_v62 = vadd.f32 %v4385_v13, %v3954_v37 }
0x1b4c   : > { %v4373_v21 = vpop.xlane.xlu1 %2160 }
0x1b4d   : > { %5502 = vst [vmem:[#allocation15_spill] sm:$0xff] %v4373_v21 }
0x1b50   : > { %v4375_v40 = vpop.xlane.xlu1 %2232 }
0x1b51   : > { %5503 = vst [vmem:[#allocation16_spill] sm:$0xff] %v4375_v40  ;;  %v4717_v40 = vadd.f32 %v3558_v36, %v3946_v31 }
0x1b53   : > { %5525 = vst [vmem:[#allocation38_spill] sm:$0xff] %v4717_v40 }
0x1b54   : > { %v4377_v44 = vpop.xlane.xlu0 %2439  ;;  %v4379_v4 = vpop.xlane.xlu1 %2304 }
0x1b55   : > { %5504 = vst [vmem:[#allocation17_spill] sm:$0xff] %v4377_v44  ;;  %5505 = vst [vmem:[#allocation18_spill] sm:$0xff] %v4379_v4  ;;  %v4695_v4 = vadd.f32 %v3558_v36, %v3966_v49 }
0x1b57   : > { %v2692_v56 = vsel %vm1578_vm3, %v4695_v4, -inf }
0x1b58   : > { %v4381_v7 = vpop.xlane.xlu0 %2445  ;;  %v4383_v58 = vpop.xlane.xlu1 %2376 }
0x1b59   : > { %5506 = vst [vmem:[#allocation19_spill] sm:$0xff] %v4381_v7  ;;  %5507 = vst [vmem:[#allocation20_spill] sm:$0xff] %v4383_v58 }
0x1b5c   : > { %v2472_v9 = vpop.xlane.xlu0 %2471  ;;  %v1875_v11 = vpop.xlane.xlu1 %1874 }
0x1b5d   : > { %vm2494_vm13 = vcmp.eq.f32.partialorder %v2462_v3, %v2472_v9  ;;  %v1912_v14 = vsel %vm1678_vm4, %v1871_v61, %v1875_v11  ;;  %v4400_v3 = vadd.f32 %v4385_v13, %v3950_v33  ;;  %v2266_v11 = vsel %vm1578_vm3, %v4408_v62, -inf }
0x1b5e   : > { %v2502_v24 = vsel %vm2494_vm13, %v4171_v34, 11.0  ;;  %v1913_v53 = vsel %vm1680_vm6, %v1912_v14, %v1879_v42 }
0x1b5f   : > { %v2510_v28 = vsel %vm1578_vm3, %v2502_v24, inf  ;;  %v2194_v27 = vsel %vm1578_vm3, %v4400_v3, -inf }
0x1b60   : > { %2511 = vmin.xlane.f32.xlu0 %v2510_v28  ;;  %v1883_v46 = vpop.xlane.xlu1 %1882 }
0x1b61   : > { %v1914_v20 = vsel %vm1682_vm7, %v1913_v53, %v1883_v46 }
0x1b62   : > { %v1915_v52 = vsel %vm1684_vm8, %v1914_v20, %v1887_v0  ;;  %v4416_v0 = vadd.f32 %v4385_v13, %v3930_v22  ;;  %v4428_v20 = vadd.f32 %v4385_v13, %v3958_v41 }
0x1b64   : > { %2123 = vmax.xlane.f32.xlu0 %v2122_v51  ;;  %v1891_v60 = vpop.xlane.xlu1 %1890  ;;  %v2338_v46 = vsel %vm1578_vm3, %v4416_v0, -inf }
0x1b65   : > { %v1916_v32 = vsel %vm1686_vm5, %v1915_v52, %v1891_v60 }
0x1b66   : > { %v1917_v61 = vsel %vm1688_vm2, %v1916_v32, %v1895_v2 }
0x1b68   : > { %2195 = vmax.xlane.f32.xlu0 %v2194_v27  ;;  %v1899_v42 = vpop.xlane.xlu1 %1898 }
0x1b69   : > { %v1918_v9 = vsel %vm1690_vm9, %v1917_v61, %v1899_v42 }
0x1b6a   : > { %v1919_v14 = vsel %vm1692_vm10, %v1918_v9, %v1903_v39  ;;  %v2410_v39 = vsel %vm1578_vm3, %v4428_v20, -inf }
0x1b6c   : > { %2267 = vmax.xlane.f32.xlu0 %v2266_v11  ;;  %v1907_v24 = vpop.xlane.xlu1 %1906 }
0x1b6d   : > { %v1920_v28 = vsel %vm1694_vm11, %v1919_v14, %v1907_v24 }
0x1b6e   : > { %v1921_v53 = vsel %vm1696_vm12, %v1920_v28, %v1911_v47 }
0x1b6f   : > { %v4422_v2 = vadd.f32 %v1921_v53, %v4047_v1  ;;  %v4438_v1 = vadd.f32 %v4385_v13, %v3933_v26 }
0x1b70   : > { %2339 = vmax.xlane.f32.xlu0 %v2338_v46  ;;  %v4430_v51 = vpop.xlane.xlu1 %2442 }
0x1b71   : > { %1923 = vst.msk [vmem:[#allocation3 + $0x28] sm:$0xff] %vm1578_vm3, %v4422_v2  ;;  %v2482_v52 = vsel %vm1578_vm3, %v4438_v1, -inf  ;;  %v1924_v61 = vadd.f32 %v4422_v2, %v3928_v19  ;;  %v1932_v9 = vadd.f32 %v4422_v2, %v3954_v37  ;;  %v1940_v14 = vadd.f32 %v4422_v2, %v3958_v41 }
0x1b72   : > { %v1948_v24 = vadd.f32 %v4422_v2, %v3962_v50  ;;  %v1956_v46 = vadd.f32 %v4422_v2, %v3966_v49 }
0x1b73   : > { %v1925_v42 = vsel %vm1578_vm3, %v1924_v61, -inf  ;;  %v1933_v11 = vsel %vm1578_vm3, %v1932_v9, -inf  ;;  %v4473_v61 = vadd.f32 %v4263_v30, %v3962_v50 }
0x1b74   : > { %2411 = vmax.xlane.f32.xlu0 %v2410_v39  ;;  %v4440_v47 = vpop.xlane.xlu1 %2448  ;;  %v1949_v53 = vsel %vm1578_vm3, %v1948_v24, -inf  ;;  %v1957_v39 = vsel %vm1578_vm3, %v1956_v46, -inf  ;;  %v4503_v46 = vadd.f32 %v4111_v16, %v3946_v31 }
0x1b75   : > { %5508 = vst [vmem:[#allocation21_spill] sm:$0xff] %v4440_v47  ;;  %v4681_v47 = vadd.f32 %v4385_v13, %v3939_v6 }
0x1b76   : > { %5510 = vst [vmem:[#allocation23_spill] sm:$0xff] %v4503_v46 }
0x1b78   : > { %2483 = vmax.xlane.f32.xlu0 %v2482_v52  ;;  %v2475_v60 = vpop.xlane.xlu1 %2474 }
0x1b79   : > { %vm2495_vm14 = vcmp.eq.f32.partialorder %v4363_v5, %v2475_v60  ;;  %v1941_v5 = vsel %vm1578_vm3, %v1940_v14, -inf }
0x1b7a   : > { %v2503_v32 = vsel %vm2495_vm14, %v4171_v34, 11.0 }
0x1b7b   : > { %v2513_v27 = vsel %vm1578_vm3, %v2503_v32, inf  ;;  %v4467_v32 = vadd.f32 %v4111_v16, %v3962_v50 }
0x1b7c   : > { %2514 = vmin.xlane.f32.xlu1 %v2513_v27  ;;  %v2481_v28 = vpop.xlane.xlu1 %2480 }
0x1b7d   : > { %vm2497_vm15 = vcmp.eq.f32.partialorder %v4369_v35, %v2481_v28  ;;  %v2545_v27 = vsel %vm1578_vm3, %v4467_v32, -inf  ;;  %v2551_v35 = vsel %vm1578_vm3, %v4473_v61, -inf  ;;  %v4497_v28 = vadd.f32 %v4263_v30, %v3966_v49 }
0x1b7e   : > { %v2505_v52 = vsel %vm2497_vm15, %v4171_v34, 11.0 }
0x1b7f   : > { %v2519_v60 = vsel %vm1578_vm3, %v2505_v52, inf  ;;  %5509 = vst [vmem:[#allocation22_spill] sm:$0xff] %v4497_v28  ;;  %v4509_v52 = vadd.f32 %v4263_v30, %v3946_v31 }
0x1b80   : > { %1926 = vmax.xlane.f32.xlu1 %v1925_v42  ;;  %v4479_v42 = vadd.f32 %v4111_v16, %v3939_v6 }
0x1b81   : > { %5511 = vst [vmem:[#allocation24_spill] sm:$0xff] %v4509_v52 }
0x1b82   : > { %v2617_v9 = vsel %vm1578_vm3, %v4479_v42, -inf }
0x1b84   : > { %1934 = vmax.xlane.f32.xlu1 %v1933_v11  ;;  %v4485_v11 = vadd.f32 %v4263_v30, %v3939_v6 }
0x1b86   : > { %v2623_v14 = vsel %vm1578_vm3, %v4485_v11, -inf }
0x1b88   : > { %1942 = vmax.xlane.f32.xlu1 %v1941_v5  ;;  %v4491_v5 = vadd.f32 %v4111_v16, %v3966_v49 }
0x1b8a   : > { %v2689_v24 = vsel %vm1578_vm3, %v4491_v5, -inf }
0x1b8c   : > { %1950 = vmax.xlane.f32.xlu1 %v1949_v53  ;;  %v2695_v53 = vsel %vm1578_vm3, %v4497_v28, -inf }
0x1b90   : > { %1958 = vmax.xlane.f32.xlu1 %v1957_v39  ;;  %v2761_v39 = vsel %vm1578_vm3, %v4503_v46, -inf }
0x1b94   : > { %2520 = vmin.xlane.f32.xlu1 %v2519_v60  ;;  %v2767_v60 = vsel %vm1578_vm3, %v4509_v52, -inf }
0x1b98   : > { %2546 = vmax.xlane.f32.xlu1 %v2545_v27  ;;  %v4515_v27 = vadd.f32 %v4111_v16, %v3970_v55 }
0x1b9a   : > { %5512 = vst [vmem:[#allocation25_spill] sm:$0xff] %v4515_v27 }
0x1b9c   : > { %2552 = vmax.xlane.f32.xlu1 %v2551_v35  ;;  %v2833_v35 = vsel %vm1578_vm3, %v4515_v27, -inf }
0x1ba0   : > { %2618 = vmax.xlane.f32.xlu1 %v2617_v9  ;;  %v4521_v9 = vadd.f32 %v4263_v30, %v3970_v55 }
0x1ba2   : > { %5513 = vst [vmem:[#allocation26_spill] sm:$0xff] %v4521_v9 }
0x1ba4   : > { %2624 = vmax.xlane.f32.xlu1 %v2623_v14  ;;  %v2839_v14 = vsel %vm1578_vm3, %v4521_v9, -inf }
0x1ba8   : > { %2690 = vmax.xlane.f32.xlu1 %v2689_v24  ;;  %v1964_v24 = vadd.f32 %v4422_v2, %v3970_v55 }
0x1baa   : > { %v1965_v16 = vsel %vm1578_vm3, %v1964_v24, -inf }
0x1bac   : > { %2696 = vmax.xlane.f32.xlu1 %v2695_v53  ;;  %v4527_v53 = vld [vmem:[#allocation3 + $0x28] sm:$0xff] }
0x1bb0   : > { %2762 = vmax.xlane.f32.xlu1 %v2761_v39  ;;  %v4532_v39 = vadd.f32 %v4527_v53, %v3928_v19 }
0x1bb2   : > { %v2125_v30 = vsel %vm1578_vm3, %v4532_v39, -inf }
0x1bb4   : > { %2768 = vmax.xlane.f32.xlu1 %v2767_v60  ;;  %v4538_v60 = vadd.f32 %v4527_v53, %v3950_v33 }
0x1bb8   : > { %2834 = vmax.xlane.f32.xlu1 %v2833_v35  ;;  %v2197_v35 = vsel %vm1578_vm3, %v4538_v60, -inf }
0x1bbc   : > { %2840 = vmax.xlane.f32.xlu1 %v2839_v14  ;;  %v4544_v14 = vadd.f32 %v4527_v53, %v3954_v37 }
0x1bbe   : > { %v2269_v24 = vsel %vm1578_vm3, %v4544_v14, -inf }
0x1bc0   : > { %1966 = vmax.xlane.f32.xlu1 %v1965_v16  ;;  %v4550_v16 = vadd.f32 %v4527_v53, %v3930_v22 }
0x1bc2   : > { %v2341_v8 = vsel %vm1578_vm3, %v4550_v16, -inf }
0x1bc4   : > { %2126 = vmax.xlane.f32.xlu1 %v2125_v30  ;;  %v4556_v30 = vadd.f32 %v4527_v53, %v3958_v41 }
0x1bc6   : > { %v2413_v9 = vsel %vm1578_vm3, %v4556_v30, -inf }
0x1bc8   : > { %2198 = vmax.xlane.f32.xlu1 %v2197_v35  ;;  %v4562_v35 = vadd.f32 %v4527_v53, %v3933_v26 }
0x1bca   : > { %v2485_v27 = vsel %vm1578_vm3, %v4562_v35, -inf }
0x1bcc   : > { %2270 = vmax.xlane.f32.xlu1 %v2269_v24  ;;  %v4568_v24 = vadd.f32 %v4527_v53, %v3962_v50 }
0x1bce   : > { %v2557_v52 = vsel %vm1578_vm3, %v4568_v24, -inf }
0x1bd0   : > { %2342 = vmax.xlane.f32.xlu1 %v2341_v8  ;;  %v4574_v8 = vadd.f32 %v4527_v53, %v3939_v6 }
0x1bd2   : > { %v2629_v46 = vsel %vm1578_vm3, %v4574_v8, -inf }
0x1bd4   : > { %2414 = vmax.xlane.f32.xlu1 %v2413_v9  ;;  %v4580_v9 = vadd.f32 %v4527_v53, %v3966_v49 }
0x1bd6   : > { %5514 = vst [vmem:[#allocation27_spill] sm:$0xff] %v4580_v9  ;;  %v2701_v28 = vsel %vm1578_vm3, %v4580_v9, -inf }
0x1bd8   : > { %2486 = vmax.xlane.f32.xlu1 %v2485_v27  ;;  %v4586_v27 = vadd.f32 %v4527_v53, %v3946_v31 }
0x1bda   : > { %5515 = vst [vmem:[#allocation28_spill] sm:$0xff] %v4586_v27  ;;  %v2773_v7 = vsel %vm1578_vm3, %v4586_v27, -inf }
0x1bdc   : > { %2558 = vmax.xlane.f32.xlu1 %v2557_v52  ;;  %v2478_v52 = vpop.xlane.xlu0 %2477 }
0x1be0   : > { %2630 = vmax.xlane.f32.xlu1 %v2629_v46 }
0x1be4   : > { %2702 = vmax.xlane.f32.xlu1 %v2701_v28 }
0x1be8   : > { %2774 = vmax.xlane.f32.xlu1 %v2773_v7 }
0x1bed   : > { %v4590_v45 = vpop.xlane.xlu0 %2511 }
0x1bee   : > { %5516 = vst [vmem:[#allocation29_spill] sm:$0xff] %v4590_v45 }
0x1bf1   : > { %v2124_v29 = vpop.xlane.xlu0 %2123 }
0x1bf2   : > { %vm2138_vm0 = vcmp.eq.f32.partialorder %v4392_v38, %v2124_v29 }
0x1bf3   : > { %v2146_v46 = vsel %vm2138_vm0, %v4171_v34, 11.0  ;;  %vm2496_vm0 = vcmp.eq.f32.partialorder %v4339_v59, %v2478_v52  ;;  %v4641_v59 = vadd.f32 %v4113_v23, %v3962_v50  ;;  %v4658_v23 = vadd.f32 %v4385_v13, %v3962_v50 }
0x1bf4   : > { %v2162_v25 = vsel %vm1578_vm3, %v2146_v46, inf  ;;  %v1928_v46 = vadd.f32 %v4422_v2, %v3950_v33 }
0x1bf5   : > { %2163 = vmin.xlane.f32.xlu0 %v2162_v25  ;;  %v2196_v9 = vpop.xlane.xlu0 %2195 }
0x1bf6   : > { %vm2210_vm1 = vcmp.eq.f32.partialorder %v4400_v3, %v2196_v9 }
0x1bf7   : > { %v2218_v28 = vsel %vm2210_vm1, %v4171_v34, 11.0 }
0x1bf8   : > { %v2234_v57 = vsel %vm1578_vm3, %v2218_v28, inf }
0x1bf9   : > { %2235 = vmin.xlane.f32.xlu0 %v2234_v57  ;;  %v2268_v7 = vpop.xlane.xlu0 %2267 }
0x1bfa   : > { %vm2282_vm13 = vcmp.eq.f32.partialorder %v4408_v62, %v2268_v7 }
0x1bfb   : > { %v2290_v27 = vsel %vm2282_vm13, %v4171_v34, 11.0 }
0x1bfc   : > { %v2306_v29 = vsel %vm1578_vm3, %v2290_v27, inf  ;;  %v1929_v27 = vsel %vm1578_vm3, %v1928_v46, -inf }
0x1bfd   : > { %2307 = vmin.xlane.f32.xlu0 %v2306_v29  ;;  %v2340_v38 = vpop.xlane.xlu0 %2339 }
0x1bfe   : > { %vm2354_vm14 = vcmp.eq.f32.partialorder %v4416_v0, %v2340_v38  ;;  %v1936_v0 = vadd.f32 %v4422_v2, %v3930_v22 }
0x1bff   : > { %v2362_v25 = vsel %vm2354_vm14, %v4171_v34, 11.0 }
0x1c00   : > { %v2378_v3 = vsel %vm1578_vm3, %v2362_v25, inf  ;;  %v1937_v7 = vsel %vm1578_vm3, %v1936_v0, -inf  ;;  %v1952_v25 = vadd.f32 %v4422_v2, %v3939_v6 }
0x1c01   : > { %2379 = vmin.xlane.f32.xlu0 %v2378_v3  ;;  %v2412_v9 = vpop.xlane.xlu0 %2411 }
0x1c02   : > { %vm2426_vm15 = vcmp.eq.f32.partialorder %v4428_v20, %v2412_v9  ;;  %v1944_v20 = vadd.f32 %v4422_v2, %v3933_v26  ;;  %v1953_v9 = vsel %vm1578_vm3, %v1952_v25, -inf }
0x1c03   : > { %v2434_v57 = vsel %vm2426_vm15, %v4171_v34, 11.0 }
0x1c04   : > { %v2450_v62 = vsel %vm1578_vm3, %v2434_v57, inf  ;;  %v1945_v38 = vsel %vm1578_vm3, %v1944_v20, -inf  ;;  %v1960_v57 = vadd.f32 %v4422_v2, %v3946_v31 }
0x1c05   : > { %2451 = vmin.xlane.f32.xlu0 %v2450_v62  ;;  %v2484_v46 = vpop.xlane.xlu0 %2483 }
0x1c06   : > { %vm2498_vm1 = vcmp.eq.f32.partialorder %v4438_v1, %v2484_v46  ;;  %v4650_v1 = vadd.f32 %v4129_v18, %v3962_v50 }
0x1c07   : > { %v2506_v2 = vsel %vm2498_vm1, %v4171_v34, 11.0 }
0x1c08   : > { %v2522_v52 = vsel %vm1578_vm3, %v2506_v2, inf  ;;  %v2548_v46 = vsel %vm1578_vm3, %v4650_v1, -inf  ;;  %v2554_v2 = vsel %vm1578_vm3, %v4658_v23, -inf }
0x1c09   : > { %1930 = vmax.xlane.f32.xlu0 %v1929_v27  ;;  %v4612_v28 = vpop.xlane.xlu1 %2514  ;;  %v1961_v27 = vsel %vm1578_vm3, %v1960_v57, -inf }
0x1c0a   : > { %5517 = vst [vmem:[#allocation30_spill] sm:$0xff] %v4612_v28  ;;  %v4703_v28 = vadd.f32 %v4385_v13, %v3966_v49 }
0x1c0c   : > { %5521 = vst [vmem:[#allocation34_spill] sm:$0xff] %v4703_v28  ;;  %v2698_v21 = vsel %vm1578_vm3, %v4703_v28, -inf }
0x1c0d   : > { %1938 = vmax.xlane.f32.xlu0 %v1937_v7  ;;  %v4617_v29 = vpop.xlane.xlu1 %1926  ;;  %v2504_v7 = vsel %vm2496_vm0, %v4171_v34, 11.0 }
0x1c0e   : > { %v2516_v20 = vsel %vm1578_vm3, %v2504_v7, inf  ;;  %v3557_v7 = vld [vmem:[#allocation3] sm:$0xff] }
0x1c0f   : > { %v4686_v44 = vadd.f32 %v3557_v7, %v3966_v49  ;;  %v4728_v28 = vadd.f32 %v3557_v7, %v3970_v55 }
0x1c11   : > { %1946 = vmax.xlane.f32.xlu0 %v1945_v38  ;;  %v4622_v3 = vpop.xlane.xlu1 %1934  ;;  %v2686_v58 = vsel %vm1578_vm3, %v4686_v44, -inf  ;;  %5528 = vst [vmem:[#allocation41_spill] sm:$0xff] %v4728_v28 }
0x1c15   : > { %1954 = vmax.xlane.f32.xlu0 %v1953_v9  ;;  %v4627_v62 = vpop.xlane.xlu1 %1942  ;;  %v2542_v9 = vsel %vm1578_vm3, %v4641_v59, -inf }
0x1c19   : > { %1962 = vmax.xlane.f32.xlu0 %v1961_v27  ;;  %v4631_v0 = vpop.xlane.xlu1 %1950 }
0x1c1d   : > { %2517 = vmin.xlane.f32.xlu0 %v2516_v20  ;;  %v4636_v38 = vpop.xlane.xlu1 %1958  ;;  %v4663_v20 = vadd.f32 %v3557_v7, %v3939_v6 }
0x1c21   : > { %2523 = vmin.xlane.f32.xlu0 %v2522_v52  ;;  %v4644_v25 = vpop.xlane.xlu1 %2520 }
0x1c22   : > { %5518 = vst [vmem:[#allocation31_spill] sm:$0xff] %v4644_v25  ;;  %v4673_v25 = vadd.f32 %v4129_v18, %v3939_v6  ;;  %v2626_v18 = vsel %vm1578_vm3, %v4681_v47, -inf }
0x1c24   : > { %v2620_v45 = vsel %vm1578_vm3, %v4673_v25, -inf }
0x1c25   : > { %2543 = vmax.xlane.f32.xlu0 %v2542_v9  ;;  %v4652_v57 = vpop.xlane.xlu1 %2546  ;;  %v2614_v9 = vsel %vm1578_vm3, %v4663_v20, -inf }
0x1c29   : > { %2549 = vmax.xlane.f32.xlu0 %v2548_v46  ;;  %v4660_v27 = vpop.xlane.xlu1 %2552 }
0x1c2d   : > { %2555 = vmax.xlane.f32.xlu0 %v2554_v2  ;;  %v4667_v52 = vpop.xlane.xlu1 %2618 }
0x1c31   : > { %2615 = vmax.xlane.f32.xlu0 %v2614_v9  ;;  %v4675_v46 = vpop.xlane.xlu1 %2624 }
0x1c35   : > { %2621 = vmax.xlane.f32.xlu0 %v2620_v45  ;;  %v4683_v2 = vpop.xlane.xlu1 %2690 }
0x1c39   : > { %2627 = vmax.xlane.f32.xlu0 %v2626_v18  ;;  %v4690_v9 = vpop.xlane.xlu1 %2696 }
0x1c3a   : > { %5519 = vst [vmem:[#allocation32_spill] sm:$0xff] %v4690_v9  ;;  %v4708_v9 = vadd.f32 %v3557_v7, %v3946_v31 }
0x1c3c   : > { %5523 = vst [vmem:[#allocation36_spill] sm:$0xff] %v4708_v9 }
0x1c3d   : > { %2687 = vmax.xlane.f32.xlu0 %v2686_v58  ;;  %v4697_v45 = vpop.xlane.xlu1 %2762 }
0x1c3e   : > { %5520 = vst [vmem:[#allocation33_spill] sm:$0xff] %v4697_v45  ;;  %v2758_v45 = vsel %vm1578_vm3, %v4708_v9, -inf }
0x1c41   : > { %2693 = vmax.xlane.f32.xlu0 %v2692_v56  ;;  %v4705_v18 = vpop.xlane.xlu1 %2768  ;;  %v2764_v56 = vsel %vm1578_vm3, %v4717_v40, -inf }
0x1c42   : > { %5522 = vst [vmem:[#allocation35_spill] sm:$0xff] %v4705_v18  ;;  %v4725_v18 = vadd.f32 %v4385_v13, %v3946_v31 }
0x1c44   : > { %5527 = vst [vmem:[#allocation40_spill] sm:$0xff] %v4725_v18  ;;  %v2770_v9 = vsel %vm1578_vm3, %v4725_v18, -inf }
0x1c45   : > { %2699 = vmax.xlane.f32.xlu0 %v2698_v21  ;;  %v4712_v58 = vpop.xlane.xlu1 %2834 }
0x1c46   : > { %5524 = vst [vmem:[#allocation37_spill] sm:$0xff] %v4712_v58 }
0x1c49   : > { %2759 = vmax.xlane.f32.xlu0 %v2758_v45  ;;  %v4719_v15 = vpop.xlane.xlu1 %2840  ;;  %v2830_v45 = vsel %vm1578_vm3, %v4728_v28, -inf }
0x1c4a   : > { %5526 = vst [vmem:[#allocation39_spill] sm:$0xff] %v4719_v15 }
0x1c4d   : > { %2765 = vmax.xlane.f32.xlu0 %v2764_v56  ;;  %v1967_v21 = vpop.xlane.xlu1 %1966  ;;  %v4738_v56 = vadd.f32 %v3558_v36, %v3970_v55 }
0x1c4f   : > { %5529 = vst [vmem:[#allocation42_spill] sm:$0xff] %v4738_v56 }
0x1c51   : > { %2771 = vmax.xlane.f32.xlu0 %v2770_v9  ;;  %v2127_v58 = vpop.xlane.xlu1 %2126 }
0x1c52   : > { %vm2139_vm13 = vcmp.eq.f32.partialorder %v4532_v39, %v2127_v58  ;;  %v2836_v39 = vsel %vm1578_vm3, %v4738_v56, -inf }
0x1c53   : > { %v2147_v40 = vsel %vm2139_vm13, %v4171_v34, 11.0 }
0x1c54   : > { %v2165_v15 = vsel %vm1578_vm3, %v2147_v40, inf }
0x1c55   : > { %2831 = vmax.xlane.f32.xlu0 %v2830_v45  ;;  %2166 = vmin.xlane.f32.xlu1 %v2165_v15  ;;  %v2199_v7 = vpop.xlane.xlu1 %2198 }
0x1c56   : > { %vm2211_vm14 = vcmp.eq.f32.partialorder %v4538_v60, %v2199_v7 }
0x1c57   : > { %v2219_v9 = vsel %vm2211_vm14, %v4171_v34, 11.0  ;;  %vm2567_vm14 = vcmp.eq.f32.partialorder %v4467_v32, %v4652_v57 }
0x1c58   : > { %v2237_v58 = vsel %vm1578_vm3, %v2219_v9, inf }
0x1c59   : > { %2837 = vmax.xlane.f32.xlu0 %v2836_v39  ;;  %2238 = vmin.xlane.f32.xlu1 %v2237_v58  ;;  %v2271_v28 = vpop.xlane.xlu1 %2270 }
0x1c5a   : > { %vm2283_vm15 = vcmp.eq.f32.partialorder %v4544_v14, %v2271_v28 }
0x1c5b   : > { %v2291_v36 = vsel %vm2283_vm15, %v4171_v34, 11.0 }
0x1c5c   : > { %v2309_v40 = vsel %vm1578_vm3, %v2291_v36, inf }
0x1c5d   : > { %2310 = vmin.xlane.f32.xlu1 %v2309_v40  ;;  %v2343_v15 = vpop.xlane.xlu1 %2342 }
0x1c5e   : > { %vm2355_vm0 = vcmp.eq.f32.partialorder %v4550_v16, %v2343_v15 }
0x1c5f   : > { %v2363_v60 = vsel %vm2355_vm0, %v4171_v34, 11.0  ;;  %vm2569_vm0 = vcmp.eq.f32.partialorder %v4473_v61, %v4660_v27 }
0x1c60   : > { %v2381_v45 = vsel %vm1578_vm3, %v2363_v60, inf }
0x1c61   : > { %2382 = vmin.xlane.f32.xlu1 %v2381_v45  ;;  %v2415_v7 = vpop.xlane.xlu1 %2414 }
0x1c62   : > { %vm2427_vm1 = vcmp.eq.f32.partialorder %v4556_v30, %v2415_v7 }
0x1c63   : > { %v2435_v9 = vsel %vm2427_vm1, %v4171_v34, 11.0 }
0x1c64   : > { %v2453_v14 = vsel %vm1578_vm3, %v2435_v9, inf }
0x1c65   : > { %2454 = vmin.xlane.f32.xlu1 %v2453_v14  ;;  %v2487_v28 = vpop.xlane.xlu1 %2486 }
0x1c66   : > { %vm2499_vm13 = vcmp.eq.f32.partialorder %v4562_v35, %v2487_v28 }
0x1c67   : > { %v2507_v39 = vsel %vm2499_vm13, %v4171_v34, 11.0 }
0x1c68   : > { %v2525_v16 = vsel %vm1578_vm3, %v2507_v39, inf }
0x1c69   : > { %2526 = vmin.xlane.f32.xlu1 %v2525_v16 }
0x1c82   : > { %v4757_v58 = vpop.xlane.xlu0 %2163 }
0x1c86   : > { %v4759_v36 = vpop.xlane.xlu0 %2235 }
0x1c8a   : > { %v4761_v40 = vpop.xlane.xlu0 %2307 }
0x1c8e   : > { %v4763_v30 = vpop.xlane.xlu0 %2379 }
0x1c92   : > { %v4765_v15 = vpop.xlane.xlu0 %2451 }
0x1c93   : > { %5530 = vst [vmem:[#allocation43_spill] sm:$0xff] %v4765_v15 }
0x1c96   : > { %v1931_v60 = vpop.xlane.xlu0 %1930 }
0x1c97   : > { %v1968_v45 = vsel %vm1678_vm4, %v4617_v29, %v1931_v60 }
0x1c98   : > { %v1969_v7 = vsel %vm1680_vm6, %v1968_v45, %v4622_v3 }
0x1c9a   : > { %v1939_v35 = vpop.xlane.xlu0 %1938 }
0x1c9b   : > { %v1970_v9 = vsel %vm1682_vm7, %v1969_v7, %v1939_v35 }
0x1c9c   : > { %v1971_v28 = vsel %vm1684_vm8, %v1970_v9, %v4627_v62 }
0x1c9e   : > { %v1947_v14 = vpop.xlane.xlu0 %1946 }
0x1c9f   : > { %v1972_v39 = vsel %vm1686_vm5, %v1971_v28, %v1947_v14 }
0x1ca0   : > { %v1973_v56 = vsel %vm1688_vm2, %v1972_v39, %v4631_v0 }
0x1ca2   : > { %v1955_v16 = vpop.xlane.xlu0 %1954 }
0x1ca3   : > { %v1974_v18 = vsel %vm1690_vm9, %v1973_v56, %v1955_v16 }
0x1ca4   : > { %v1975_v29 = vsel %vm1692_vm10, %v1974_v18, %v4636_v38 }
0x1ca6   : > { %v1963_v15 = vpop.xlane.xlu0 %1962 }
0x1ca7   : > { %v1976_v3 = vsel %vm1694_vm11, %v1975_v29, %v1963_v15 }
0x1ca8   : > { %v1977_v60 = vsel %vm1696_vm12, %v1976_v3, %v1967_v21 }
0x1ca9   : > { %v1978_v45 = vadd.f32 %v1977_v60, %v4045_v63 }
0x1caa   : > { %v4783_v35 = vpop.xlane.xlu0 %2517 }
0x1cab   : > { %1979 = vst.msk [vmem:[#allocation3 + $0x30] sm:$0xff] %vm1578_vm3, %v1978_v45  ;;  %v1980_v62 = vadd.f32 %v1978_v45, %v3928_v19  ;;  %v1984_v0 = vadd.f32 %v1978_v45, %v3950_v33  ;;  %v1988_v38 = vadd.f32 %v1978_v45, %v3954_v37  ;;  %v1992_v18 = vadd.f32 %v1978_v45, %v3930_v22 }
0x1cac   : > { %v1996_v9 = vadd.f32 %v1978_v45, %v3958_v41  ;;  %v2000_v14 = vadd.f32 %v1978_v45, %v3933_v26  ;;  %v2004_v29 = vadd.f32 %v1978_v45, %v3962_v50  ;;  %v2008_v3 = vadd.f32 %v1978_v45, %v3939_v6 }
0x1cad   : > { %v1981_v56 = vsel %vm1578_vm3, %v1980_v62, -inf  ;;  %v1985_v7 = vsel %vm1578_vm3, %v1984_v0, -inf  ;;  %v1989_v63 = vsel %vm1578_vm3, %v1988_v38, -inf  ;;  %v1993_v21 = vsel %vm1578_vm3, %v1992_v18, -inf }
0x1cae   : > { %v4792_v15 = vpop.xlane.xlu0 %2523  ;;  %1982 = vmax.xlane.f32.xlu0 %v1981_v56  ;;  %1986 = vmax.xlane.f32.xlu1 %v1985_v7  ;;  %v1997_v39 = vsel %vm1578_vm3, %v1996_v9, -inf  ;;  %v2001_v16 = vsel %vm1578_vm3, %v2000_v14, -inf  ;;  %v2005_v62 = vsel %vm1578_vm3, %v2004_v29, -inf  ;;  %v2009_v0 = vsel %vm1578_vm3, %v2008_v3, -inf }
0x1caf   : > { %v2012_v56 = vadd.f32 %v1978_v45, %v3966_v49  ;;  %v2016_v7 = vadd.f32 %v1978_v45, %v3946_v31 }
0x1cb1   : > { %v2013_v38 = vsel %vm1578_vm3, %v2012_v56, -inf  ;;  %v2017_v18 = vsel %vm1578_vm3, %v2016_v7, -inf }
0x1cb2   : > { %v2544_v28 = vpop.xlane.xlu0 %2543  ;;  %1990 = vmax.xlane.f32.xlu0 %v1989_v63  ;;  %1994 = vmax.xlane.f32.xlu1 %v1993_v21  ;;  %v2020_v63 = vadd.f32 %v1978_v45, %v3970_v55  ;;  %v4811_v21 = vadd.f32 %v4527_v53, %v3970_v55  ;;  %v4821_v45 = vadd.f32 %v4385_v13, %v3970_v55  ;;  %v2575_v53 = vsel %vm2567_vm14, %v4171_v34, 11.0 }
0x1cb3   : > { %vm2566_vm15 = vcmp.eq.f32.partialorder %v4641_v59, %v2544_v28  ;;  %v2585_v28 = vsel %vm1578_vm3, %v2575_v53, inf  ;;  %v2577_v13 = vsel %vm2569_vm0, %v4171_v34, 11.0  ;;  %vm2639_vm14 = vcmp.eq.f32.partialorder %v4479_v42, %v4667_v52 }
0x1cb4   : > { %v2021_v14 = vsel %vm1578_vm3, %v2020_v63, -inf  ;;  %5531 = vst [vmem:[#allocation44_spill] sm:$0xff] %v4821_v45  ;;  %v2574_v59 = vsel %vm2566_vm15, %v4171_v34, 11.0  ;;  %v2842_v57 = vsel %vm1578_vm3, %v4821_v45, -inf  ;;  %v2591_v61 = vsel %vm1578_vm3, %v2577_v13, inf }
0x1cb5   : > { %v2582_v29 = vsel %vm1578_vm3, %v2574_v59, inf }
0x1cb6   : > { %1998 = vmax.xlane.f32.xlu0 %v1997_v39  ;;  %2002 = vmax.xlane.f32.xlu1 %v2001_v16  ;;  %v2550_v60 = vpop.xlane.xlu0 %2549  ;;  %v2845_v39 = vsel %vm1578_vm3, %v4811_v21, -inf  ;;  %v2559_v16 = vpop.xlane.xlu1 %2558 }
0x1cb7   : > { %vm2571_vm1 = vcmp.eq.f32.partialorder %v4568_v24, %v2559_v16  ;;  %vm2568_vm13 = vcmp.eq.f32.partialorder %v4650_v1, %v2550_v60 }
0x1cb8   : > { %v2576_v3 = vsel %vm2568_vm13, %v4171_v34, 11.0 }
0x1cb9   : > { %v2588_v24 = vsel %vm1578_vm3, %v2576_v3, inf }
0x1cba   : > { %2006 = vmax.xlane.f32.xlu0 %v2005_v62  ;;  %2010 = vmax.xlane.f32.xlu1 %v2009_v0  ;;  %v2556_v9 = vpop.xlane.xlu0 %2555  ;;  %v2579_v62 = vsel %vm2571_vm1, %v4171_v34, 11.0  ;;  %v2647_v0 = vsel %vm2639_vm14, %v4171_v34, 11.0  ;;  %vm2641_vm1 = vcmp.eq.f32.partialorder %v4485_v11, %v4675_v46  ;;  %v2631_v56 = vpop.xlane.xlu1 %2630  ;;  %vm2711_vm14 = vcmp.eq.f32.partialorder %v4491_v5, %v4683_v2  ;;  %v2099_v2 = vld [vmem:[#allocation3 + $0x30] sm:$0xff] }
0x1cbb   : > { %vm2570_vm15 = vcmp.eq.f32.partialorder %v4658_v23, %v2556_v9  ;;  %v2597_v1 = vsel %vm1578_vm3, %v2579_v62, inf  ;;  %v2649_v52 = vsel %vm2641_vm1, %v4171_v34, 11.0  ;;  %vm2643_vm13 = vcmp.eq.f32.partialorder %v4574_v8, %v2631_v56 }
0x1cbc   : > { %v2578_v60 = vsel %vm2570_vm15, %v4171_v34, 11.0  ;;  %v2663_v11 = vsel %vm1578_vm3, %v2649_v52, inf  ;;  %v2651_v63 = vsel %vm2643_vm13, %v4171_v34, 11.0  ;;  %v4873_v59 = vadd.f32 %v2099_v2, %v3928_v19 }
0x1cbd   : > { %v2594_v23 = vsel %vm1578_vm3, %v2578_v60, inf  ;;  %v4883_v13 = vadd.f32 %v2099_v2, %v3954_v37  ;;  %v4893_v3 = vadd.f32 %v2099_v2, %v3958_v41  ;;  %v4903_v60 = vadd.f32 %v2099_v2, %v3962_v50 }
0x1cbe   : > { %2014 = vmax.xlane.f32.xlu0 %v2013_v38  ;;  %2018 = vmax.xlane.f32.xlu1 %v2017_v18  ;;  %v2616_v32 = vpop.xlane.xlu0 %2615  ;;  %v4908_v56 = vadd.f32 %v2099_v2, %v3939_v6 }
0x1cbf   : > { %vm2638_vm0 = vcmp.eq.f32.partialorder %v4663_v20, %v2616_v32  ;;  %v2657_v20 = vsel %vm1578_vm3, %v2647_v0, inf  ;;  %v2416_v62 = vsel %vm1578_vm3, %v4893_v3, -inf  ;;  %v2560_v0 = vsel %vm1578_vm3, %v4903_v60, -inf }
0x1cc0   : > { %v2646_v42 = vsel %vm2638_vm0, %v4171_v34, 11.0 }
0x1cc1   : > { %v2654_v38 = vsel %vm1578_vm3, %v2646_v42, inf  ;;  %v4913_v42 = vadd.f32 %v2099_v2, %v3966_v49 }
0x1cc2   : > { %2022 = vmax.xlane.f32.xlu0 %v2021_v14  ;;  %2846 = vmax.xlane.f32.xlu1 %v2845_v39  ;;  %v2622_v27 = vpop.xlane.xlu0 %2621  ;;  %v2719_v14 = vsel %vm2711_vm14, %v4171_v34, 11.0 }
0x1cc3   : > { %vm2640_vm15 = vcmp.eq.f32.partialorder %v4673_v25, %v2622_v27  ;;  %v2669_v25 = vsel %vm1578_vm3, %v2651_v63, inf  ;;  %v2729_v5 = vsel %vm1578_vm3, %v2719_v14, inf }
0x1cc4   : > { %v2648_v18 = vsel %vm2640_vm15, %v4171_v34, 11.0 }
0x1cc5   : > { %v2660_v8 = vsel %vm1578_vm3, %v2648_v18, inf }
0x1cc6   : > { %2843 = vmax.xlane.f32.xlu0 %v2842_v57  ;;  %2586 = vmin.xlane.f32.xlu1 %v2585_v28  ;;  %v2628_v7 = vpop.xlane.xlu0 %2627  ;;  %v2128_v57 = vsel %vm1578_vm3, %v4873_v59, -inf  ;;  %v4878_v28 = vadd.f32 %v2099_v2, %v3950_v33 }
0x1cc7   : > { %vm2642_vm0 = vcmp.eq.f32.partialorder %v4681_v47, %v2628_v7  ;;  %v2632_v7 = vsel %vm1578_vm3, %v4908_v56, -inf }
0x1cc8   : > { %v2650_v9 = vsel %vm2642_vm0, %v4171_v34, 11.0 }
0x1cc9   : > { %v2666_v16 = vsel %vm1578_vm3, %v2650_v9, inf }
0x1cca   : > { %2583 = vmin.xlane.f32.xlu0 %v2582_v29  ;;  %2592 = vmin.xlane.f32.xlu1 %v2591_v61  ;;  %v2688_v46 = vpop.xlane.xlu0 %2687  ;;  %v2272_v29 = vsel %vm1578_vm3, %v4883_v13, -inf  ;;  %v4888_v61 = vadd.f32 %v2099_v2, %v3930_v22 }
0x1ccb   : > { %vm2710_vm1 = vcmp.eq.f32.partialorder %v4686_v44, %v2688_v46 }
0x1ccc   : > { %v2718_v53 = vsel %vm2710_vm1, %v4171_v34, 11.0  ;;  %v2344_v27 = vsel %vm1578_vm3, %v4888_v61, -inf }
0x1ccd   : > { %v2726_v44 = vsel %vm1578_vm3, %v2718_v53, inf }
0x1cce   : > { %2589 = vmin.xlane.f32.xlu0 %v2588_v24  ;;  %2598 = vmin.xlane.f32.xlu1 %v2597_v1  ;;  %v2694_v39 = vpop.xlane.xlu0 %2693  ;;  %v4898_v24 = vadd.f32 %v2099_v2, %v3933_v26 }
0x1ccf   : > { %vm2712_vm13 = vcmp.eq.f32.partialorder %v4695_v4, %v2694_v39  ;;  %v2200_v4 = vsel %vm1578_vm3, %v4878_v28, -inf }
0x1cd0   : > { %v2720_v47 = vsel %vm2712_vm13, %v4171_v34, 11.0  ;;  %v2488_v1 = vsel %vm1578_vm3, %v4898_v24, -inf }
0x1cd1   : > { %v2732_v32 = vsel %vm1578_vm3, %v2720_v47, inf }
0x1cd2   : > { %2595 = vmin.xlane.f32.xlu0 %v2594_v23  ;;  %2658 = vmin.xlane.f32.xlu1 %v2657_v20  ;;  %v2704_v23 = vsel %vm1578_vm3, %v4913_v42, -inf  ;;  %v4918_v20 = vadd.f32 %v2099_v2, %v3946_v31  ;;  %v4931_v63 = vpop.xlane.xlu0 %2699 }
0x1cd4   : > { %5532 = vst [vmem:[#allocation45_spill] sm:$0xff] %v4918_v20  ;;  %v2776_v52 = vsel %vm1578_vm3, %v4918_v20, -inf }
0x1cd6   : > { %2655 = vmin.xlane.f32.xlu0 %v2654_v38  ;;  %2664 = vmin.xlane.f32.xlu1 %v2663_v11  ;;  %v4923_v38 = vadd.f32 %v2099_v2, %v3970_v55  ;;  %v4925_v11 = vpop.xlane.xlu1 %2702 }
0x1cd8   : > { %5533 = vst [vmem:[#allocation46_spill] sm:$0xff] %v4923_v38  ;;  %v2848_v46 = vsel %vm1578_vm3, %v4923_v38, -inf }
0x1cda   : > { %2661 = vmin.xlane.f32.xlu0 %v2660_v8  ;;  %2670 = vmin.xlane.f32.xlu1 %v2669_v25  ;;  %v4929_v18 = vpop.xlane.xlu1 %2774  ;;  %v4935_v25 = vpop.xlane.xlu0 %2759 }
0x1cde   : > { %2667 = vmin.xlane.f32.xlu0 %v2666_v16  ;;  %2730 = vmin.xlane.f32.xlu1 %v2729_v5  ;;  %v4939_v14 = vpop.xlane.xlu0 %2765 }
0x1cdf   : > { %5534 = vst [vmem:[#allocation47_spill] sm:$0xff] %v4939_v14  ;;  %v5545_v14 = vld [vmem:[#allocation13_spill] sm:$0xff] }
0x1ce2   : > { %2727 = vmin.xlane.f32.xlu0 %v2726_v44  ;;  %v4933_v8 = vpop.xlane.xlu1 %2166  ;;  %v4943_v53 = vpop.xlane.xlu0 %2771 }
0x1ce3   : > { %5535 = vst [vmem:[#allocation48_spill] sm:$0xff] %v4943_v53 }
0x1ce6   : > { %2733 = vmin.xlane.f32.xlu0 %v2732_v32  ;;  %v4937_v9 = vpop.xlane.xlu1 %2238  ;;  %v4947_v5 = vpop.xlane.xlu0 %2831 }
0x1ce7   : > { %5536 = vst [vmem:[#allocation49_spill] sm:$0xff] %v4947_v5 }
0x1cea   : > { %2129 = vmax.xlane.f32.xlu0 %v2128_v57  ;;  %v4941_v39 = vpop.xlane.xlu1 %2310  ;;  %v4951_v47 = vpop.xlane.xlu0 %2837 }
0x1ceb   : > { %5537 = vst [vmem:[#allocation50_spill] sm:$0xff] %v4951_v47 }
0x1cee   : > { %2201 = vmax.xlane.f32.xlu0 %v2200_v4  ;;  %v4945_v16 = vpop.xlane.xlu1 %2382 }
0x1cf2   : > { %2273 = vmax.xlane.f32.xlu0 %v2272_v29  ;;  %v4949_v44 = vpop.xlane.xlu1 %2454 }
0x1cf6   : > { %2345 = vmax.xlane.f32.xlu0 %v2344_v27  ;;  %v4953_v2 = vpop.xlane.xlu1 %2526 }
0x1cfa   : > { %2417 = vmax.xlane.f32.xlu0 %v2416_v62 }
0x1cfe   : > { %2489 = vmax.xlane.f32.xlu0 %v2488_v1 }
0x1d02   : > { %2561 = vmax.xlane.f32.xlu0 %v2560_v0 }
0x1d06   : > { %2633 = vmax.xlane.f32.xlu0 %v2632_v7 }
0x1d0a   : > { %2705 = vmax.xlane.f32.xlu0 %v2704_v23 }
0x1d0e   : > { %2777 = vmax.xlane.f32.xlu0 %v2776_v52 }
0x1d12   : > { %2849 = vmax.xlane.f32.xlu0 %v2848_v46 }
0x1d3b   : > { %v1983_v32 = vpop.xlane.xlu0 %1982  ;;  %v1987_v57 = vpop.xlane.xlu1 %1986 }
0x1d3c   : > { %v2024_v4 = vsel %vm1678_vm4, %v1983_v32, %v1987_v57 }
0x1d3f   : > { %v1991_v29 = vpop.xlane.xlu0 %1990  ;;  %v1995_v27 = vpop.xlane.xlu1 %1994 }
0x1d40   : > { %v2025_v62 = vsel %vm1680_vm6, %v2024_v4, %v1991_v29 }
0x1d41   : > { %v2026_v1 = vsel %vm1682_vm7, %v2025_v62, %v1995_v27 }
0x1d43   : > { %v1999_v0 = vpop.xlane.xlu0 %1998  ;;  %v2003_v7 = vpop.xlane.xlu1 %2002 }
0x1d44   : > { %v2027_v23 = vsel %vm1684_vm8, %v2026_v1, %v1999_v0 }
0x1d45   : > { %v2028_v52 = vsel %vm1686_vm5, %v2027_v23, %v2003_v7 }
0x1d47   : > { %v2007_v46 = vpop.xlane.xlu0 %2006  ;;  %v2011_v38 = vpop.xlane.xlu1 %2010 }
0x1d48   : > { %v2029_v45 = vsel %vm1688_vm2, %v2028_v52, %v2007_v46  ;;  %v2895_v46 = vsel %vm1678_vm4, %v4203_v43, %v4232_v54  ;;  %v5540_v54 = vld [vmem:[#allocation16_spill] sm:$0xff] }
0x1d49   : > { %v2030_v47 = vsel %vm1690_vm9, %v2029_v45, %v2011_v38 }
0x1d4b   : > { %v2015_v5 = vpop.xlane.xlu0 %2014  ;;  %v2019_v32 = vpop.xlane.xlu1 %2018 }
0x1d4c   : > { %v2031_v57 = vsel %vm1692_vm10, %v2030_v47, %v2015_v5 }
0x1d4d   : > { %v2032_v4 = vsel %vm1694_vm11, %v2031_v57, %v2019_v32  ;;  %v2903_v32 = vsel %vm1680_vm6, %v2895_v46, %v4251_v12  ;;  %v5542_v46 = vld [vmem:[#allocation30_spill] sm:$0xff] }
0x1d4f   : > { %v2023_v29 = vpop.xlane.xlu0 %2022  ;;  %v4964_v27 = vpop.xlane.xlu1 %2846 }
0x1d50   : > { %v2033_v62 = vsel %vm1696_vm12, %v2032_v4, %v2023_v29  ;;  %v2911_v29 = vsel %vm1682_vm7, %v2903_v32, %v4313_v48  ;;  %v5543_v48 = vld [vmem:[#allocation11_spill] sm:$0xff]  ;;  %v5544_v32 = vld [vmem:[#allocation18_spill] sm:$0xff] }
0x1d51   : > { %v4968_v1 = vadd.f32 %v2033_v62, %v4061_v10  ;;  %v2919_v62 = vsel %vm1684_vm8, %v2911_v29, %v4430_v51 }
0x1d53   : > { %2035 = vst.msk [vmem:[#allocation3 + $0x38] sm:$0xff] %vm1578_vm3, %v4968_v1  ;;  %v4972_v0 = vpop.xlane.xlu0 %2843  ;;  %v2587_v45 = vpop.xlane.xlu1 %2586  ;;  %v2036_v38 = vadd.f32 %v4968_v1, %v3928_v19  ;;  %v2044_v47 = vadd.f32 %v4968_v1, %v3954_v37  ;;  %v2052_v52 = vadd.f32 %v4968_v1, %v3958_v41 }
0x1d54   : > { %5538 = vst [vmem:[#allocation51_spill] sm:$0xff] %v4972_v0  ;;  %v2927_v0 = vsel %vm1686_vm5, %v2919_v62, %v5542_v46  ;;  %v5547_v62 = vld [vmem:[#allocation17_spill] sm:$0xff] }
0x1d55   : > { %v2037_v5 = vsel %vm1578_vm3, %v2036_v38, -inf  ;;  %v2045_v10 = vsel %vm1578_vm3, %v2044_v47, -inf  ;;  %v2053_v38 = vsel %vm1578_vm3, %v2052_v52, -inf  ;;  %v5539_v47 = vld [vmem:[#allocation8_spill] sm:$0xff]  ;;  %v2935_v29 = vsel %vm1688_vm2, %v2927_v0, %v2587_v45  ;;  %v5549_v45 = vld [vmem:[#allocation10_spill] sm:$0xff] }
0x1d56   : > { %2038 = vmax.xlane.f32.xlu1 %v2037_v5  ;;  %v2060_v5 = vadd.f32 %v4968_v1, %v3962_v50  ;;  %v2894_v43 = vsel %vm1678_vm4, %v5539_v47, %v4230_v17  ;;  %v5546_v47 = vld [vmem:[#allocation20_spill] sm:$0xff]  ;;  %v2068_v0 = vadd.f32 %v4968_v1, %v3966_v49 }
0x1d57   : > { %v2584_v7 = vpop.xlane.xlu0 %2583  ;;  %v2593_v23 = vpop.xlane.xlu1 %2592  ;;  %v2902_v51 = vsel %vm1680_vm6, %v2894_v43, %v5543_v48  ;;  %v5548_v43 = vld [vmem:[#allocation21_spill] sm:$0xff] }
0x1d58   : > { %v2910_v17 = vsel %vm1682_vm7, %v2902_v51, %v5545_v14  ;;  %v5550_v48 = vld [vmem:[#allocation9_spill] sm:$0xff] }
0x1d59   : > { %v2896_v14 = vsel %vm1678_vm4, %v5550_v48, %v5549_v45  ;;  %v5551_v51 = vld [vmem:[#allocation29_spill] sm:$0xff]  ;;  %v5554_v45 = vld [vmem:[#allocation14_spill] sm:$0xff] }
0x1d5a   : > { %2046 = vmax.xlane.f32.xlu1 %v2045_v10  ;;  %v5541_v10 = vld [vmem:[#allocation15_spill] sm:$0xff] }
0x1d5b   : > { %v2590_v57 = vpop.xlane.xlu0 %2589  ;;  %v2599_v4 = vpop.xlane.xlu1 %2598  ;;  %v2897_v12 = vsel %vm1678_vm4, %v5541_v10, %v5540_v54 }
0x1d5c   : > { %v2905_v52 = vsel %vm1680_vm6, %v2897_v12, %v5544_v32  ;;  %v2061_v12 = vsel %vm1578_vm3, %v2060_v5, -inf }
0x1d5d   : > { %v2913_v54 = vsel %vm1682_vm7, %v2905_v52, %v5546_v47 }
0x1d5e   : > { %2054 = vmax.xlane.f32.xlu1 %v2053_v38  ;;  %v2918_v38 = vsel %vm1684_vm8, %v2910_v17, %v5547_v62  ;;  %v2921_v46 = vsel %vm1684_vm8, %v2913_v54, %v5548_v43  ;;  %v5553_v17 = vld [vmem:[#allocation12_spill] sm:$0xff] }
0x1d5f   : > { %v2596_v20 = vpop.xlane.xlu0 %2595  ;;  %v2659_v53 = vpop.xlane.xlu1 %2658  ;;  %v2926_v32 = vsel %vm1686_vm5, %v2918_v38, %v5551_v51  ;;  %v2904_v5 = vsel %vm1680_vm6, %v2896_v14, %v5553_v17  ;;  %v2076_v14 = vadd.f32 %v4968_v1, %v3970_v55 }
0x1d60   : > { %v5012_v10 = vsel %vm1690_vm9, %v2935_v29, %v2659_v53  ;;  %v5552_v53 = vld [vmem:[#allocation31_spill] sm:$0xff]  ;;  %v2899_v29 = vsel %vm1678_vm4, %v4933_v8, %v4937_v9  ;;  %v2934_v54 = vsel %vm1688_vm2, %v2926_v32, %v2584_v7 }
0x1d61   : > { %v2929_v52 = vsel %vm1686_vm5, %v2921_v46, %v5552_v53  ;;  %v2907_v47 = vsel %vm1680_vm6, %v2899_v29, %v4941_v39  ;;  %v2912_v46 = vsel %vm1682_vm7, %v2904_v5, %v5554_v45  ;;  %v5059_v53 = vld [vmem:[#allocation3 + $0x38] sm:$0xff] }
0x1d62   : > { %2062 = vmax.xlane.f32.xlu1 %v2061_v12  ;;  %v2937_v62 = vsel %vm1688_vm2, %v2929_v52, %v2593_v23  ;;  %v2915_v48 = vsel %vm1682_vm7, %v2907_v47, %v4945_v16  ;;  %v5555_v12 = vld [vmem:[#allocation19_spill] sm:$0xff]  ;;  %v2069_v23 = vsel %vm1578_vm3, %v2068_v0, -inf  ;;  %v2898_v16 = vsel %vm1678_vm4, %v4757_v58, %v4759_v36 }
0x1d63   : > { %v2656_v43 = vpop.xlane.xlu0 %2655  ;;  %v2665_v38 = vpop.xlane.xlu1 %2664  ;;  %v2920_v39 = vsel %vm1684_vm8, %v2912_v46, %v5555_v12  ;;  %v2923_v7 = vsel %vm1684_vm8, %v2915_v48, %v4949_v44  ;;  %v2906_v44 = vsel %vm1680_vm6, %v2898_v16, %v4761_v40  ;;  %v2077_v47 = vsel %vm1578_vm3, %v2076_v14, -inf }
0x1d64   : > { %v2942_v8 = vsel %vm1690_vm9, %v2934_v54, %v2656_v43  ;;  %v5043_v9 = vsel %vm1690_vm9, %v2937_v62, %v2665_v38  ;;  %v2928_v51 = vsel %vm1686_vm5, %v2920_v39, %v4783_v35  ;;  %v2931_v32 = vsel %vm1686_vm5, %v2923_v7, %v4953_v2  ;;  %v5556_v2 = vld [vmem:[#allocation43_spill] sm:$0xff] }
0x1d65   : > { %v2936_v0 = vsel %vm1688_vm2, %v2928_v51, %v2590_v57  ;;  %v2939_v52 = vsel %vm1688_vm2, %v2931_v32, %v2599_v4  ;;  %v2914_v58 = vsel %vm1682_vm7, %v2906_v44, %v4763_v30  ;;  %v5076_v40 = vadd.f32 %v5059_v53, %v3928_v19 }
0x1d66   : > { %2070 = vmax.xlane.f32.xlu1 %v2069_v23  ;;  %v2922_v5 = vsel %vm1684_vm8, %v2914_v58, %v5556_v2  ;;  %v5088_v43 = vadd.f32 %v5059_v53, %v3950_v33  ;;  %v5106_v12 = vadd.f32 %v5059_v53, %v3930_v22  ;;  %v5114_v7 = vadd.f32 %v5059_v53, %v3958_v41 }
0x1d67   : > { %v2662_v29 = vpop.xlane.xlu0 %2661  ;;  %v2671_v17 = vpop.xlane.xlu1 %2670  ;;  %v2930_v57 = vsel %vm1686_vm5, %v2922_v5, %v4792_v15  ;;  %v2131_v62 = vsel %vm1578_vm3, %v5076_v40, -inf  ;;  %v5123_v51 = vadd.f32 %v5059_v53, %v3933_v26  ;;  %v5141_v58 = vadd.f32 %v5059_v53, %v3939_v6 }
0x1d68   : > { %v2944_v36 = vsel %vm1690_vm9, %v2936_v0, %v2662_v29  ;;  %v5069_v35 = vsel %vm1690_vm9, %v2939_v52, %v2671_v17  ;;  %v2938_v30 = vsel %vm1688_vm2, %v2930_v57, %v2596_v20  ;;  %v2203_v15 = vsel %vm1578_vm3, %v5088_v43, -inf }
0x1d69   : > { %v5097_v20 = vadd.f32 %v5059_v53, %v3954_v37  ;;  %v2347_v37 = vsel %vm1578_vm3, %v5106_v12, -inf  ;;  %v5132_v0 = vadd.f32 %v5059_v53, %v3962_v50  ;;  %v5150_v5 = vadd.f32 %v5059_v53, %v3966_v49 }
0x1d6a   : > { %2078 = vmax.xlane.f32.xlu1 %v2077_v47 }
0x1d6b   : > { %v2668_v4 = vpop.xlane.xlu0 %2667  ;;  %v2275_v48 = vsel %vm1578_vm3, %v5097_v20, -inf }
0x1d6c   : > { %v5082_v54 = vsel %vm1690_vm9, %v2938_v30, %v2668_v4  ;;  %v5159_v4 = vadd.f32 %v5059_v53, %v3946_v31 }
0x1d6e   : > { %2132 = vmax.xlane.f32.xlu1 %v2131_v62 }
0x1d6f   : > { %v2728_v19 = vpop.xlane.xlu0 %2727 }
0x1d70   : > { %v5091_v38 = vsel %vm1692_vm10, %v2942_v8, %v2728_v19 }
0x1d72   : > { %2204 = vmax.xlane.f32.xlu1 %v2203_v15  ;;  %v5168_v15 = vadd.f32 %v5059_v53, %v3970_v55 }
0x1d73   : > { %v2734_v45 = vpop.xlane.xlu0 %2733 }
0x1d74   : > { %v5100_v46 = vsel %vm1692_vm10, %v2944_v36, %v2734_v45 }
0x1d76   : > { %2276 = vmax.xlane.f32.xlu1 %v2275_v48  ;;  %v5557_v48 = vld [vmem:[#allocation32_spill] sm:$0xff] }
0x1d77   : > { %v2130_v8 = vpop.xlane.xlu0 %2129 }
0x1d78   : > { %vm2140_vm15 = vcmp.eq.f32.partialorder %v4873_v59, %v2130_v8  ;;  %v2419_v59 = vsel %vm1578_vm3, %v5114_v7, -inf  ;;  %v5558_v8 = vld [vmem:[#allocation22_spill] sm:$0xff] }
0x1d79   : > { %v2148_v39 = vsel %vm2140_vm15, %v4171_v34, 11.0 }
0x1d7a   : > { %2348 = vmax.xlane.f32.xlu1 %v2347_v37  ;;  %v2168_v23 = vsel %vm1578_vm3, %v2148_v39, inf  ;;  %v2851_v37 = vsel %vm1578_vm3, %v5168_v15, -inf }
0x1d7b   : > { %2169 = vmin.xlane.f32.xlu0 %v2168_v23  ;;  %v2202_v14 = vpop.xlane.xlu0 %2201 }
0x1d7c   : > { %vm2212_vm14 = vcmp.eq.f32.partialorder %v4878_v28, %v2202_v14  ;;  %v2491_v28 = vsel %vm1578_vm3, %v5123_v51, -inf  ;;  %v2040_v14 = vadd.f32 %v4968_v1, %v3950_v33 }
0x1d7d   : > { %v2220_v16 = vsel %vm2212_vm14, %v4171_v34, 11.0 }
0x1d7e   : > { %2420 = vmax.xlane.f32.xlu1 %v2419_v59  ;;  %v2240_v41 = vsel %vm1578_vm3, %v2220_v16, inf  ;;  %v5559_v16 = vld [vmem:[#allocation27_spill] sm:$0xff] }
0x1d7f   : > { %2241 = vmin.xlane.f32.xlu0 %v2240_v41  ;;  %v2274_v32 = vpop.xlane.xlu0 %2273 }
0x1d80   : > { %vm2284_vm0 = vcmp.eq.f32.partialorder %v4883_v13, %v2274_v32  ;;  %v2563_v13 = vsel %vm1578_vm3, %v5132_v0, -inf  ;;  %v2048_v32 = vadd.f32 %v4968_v1, %v3930_v22 }
0x1d81   : > { %v2292_v44 = vsel %vm2284_vm0, %v4171_v34, 11.0  ;;  %vm2713_vm0 = vcmp.eq.f32.partialorder %v5558_v8, %v5557_v48  ;;  %v5569_v48 = vld [vmem:[#allocation26_spill] sm:$0xff] }
0x1d82   : > { %2492 = vmax.xlane.f32.xlu1 %v2491_v28  ;;  %v2312_v52 = vsel %vm1578_vm3, %v2292_v44, inf  ;;  %v2721_v53 = vsel %vm2713_vm0, %v4171_v34, 11.0  ;;  %v5560_v44 = vld [vmem:[#allocation33_spill] sm:$0xff]  ;;  %v5561_v28 = vld [vmem:[#allocation23_spill] sm:$0xff] }
0x1d83   : > { %2313 = vmin.xlane.f32.xlu0 %v2312_v52  ;;  %v2346_v29 = vpop.xlane.xlu0 %2345  ;;  %v2735_v59 = vsel %vm1578_vm3, %v2721_v53, inf }
0x1d84   : > { %vm2356_vm1 = vcmp.eq.f32.partialorder %v4888_v61, %v2346_v29  ;;  %v2635_v61 = vsel %vm1578_vm3, %v5141_v58, -inf  ;;  %v2056_v29 = vadd.f32 %v4968_v1, %v3933_v26 }
0x1d85   : > { %v2364_v17 = vsel %vm2356_vm1, %v4171_v34, 11.0 }
0x1d86   : > { %2564 = vmax.xlane.f32.xlu1 %v2563_v13  ;;  %v2384_v50 = vsel %vm1578_vm3, %v2364_v17, inf  ;;  %v5562_v17 = vld [vmem:[#allocation35_spill] sm:$0xff]  ;;  %v5563_v13 = vld [vmem:[#allocation24_spill] sm:$0xff] }
0x1d87   : > { %2385 = vmin.xlane.f32.xlu0 %v2384_v50  ;;  %v2418_v36 = vpop.xlane.xlu0 %2417  ;;  %v2057_v50 = vsel %vm1578_vm3, %v2056_v29, -inf  ;;  %v5577_v29 = vld [vmem:[#allocation41_spill] sm:$0xff] }
0x1d88   : > { %vm2428_vm13 = vcmp.eq.f32.partialorder %v4893_v3, %v2418_v36  ;;  %v2707_v3 = vsel %vm1578_vm3, %v5150_v5, -inf }
0x1d89   : > { %v2436_v2 = vsel %vm2428_vm13, %v4171_v34, 11.0  ;;  %vm2715_vm13 = vcmp.eq.f32.partialorder %v5559_v16, %v4925_v11  ;;  %v2049_v11 = vsel %vm1578_vm3, %v2048_v32, -inf  ;;  %v5572_v16 = vld [vmem:[#allocation38_spill] sm:$0xff] }
0x1d8a   : > { %2636 = vmax.xlane.f32.xlu1 %v2635_v61  ;;  %v2456_v47 = vsel %vm1578_vm3, %v2436_v2, inf  ;;  %v2723_v41 = vsel %vm2715_vm13, %v4171_v34, 11.0  ;;  %v2064_v2 = vadd.f32 %v4968_v1, %v3939_v6  ;;  %v5564_v61 = vld [vmem:[#allocation28_spill] sm:$0xff]  ;;  %v5567_v6 = vld [vmem:[#allocation34_spill] sm:$0xff] }
0x1d8b   : > { %2457 = vmin.xlane.f32.xlu0 %v2456_v47  ;;  %v2490_v57 = vpop.xlane.xlu0 %2489  ;;  %v2741_v33 = vsel %vm1578_vm3, %v2723_v41, inf  ;;  %vm2787_vm0 = vcmp.eq.f32.partialorder %v5564_v61, %v4929_v18  ;;  %vm2714_vm13 = vcmp.eq.f32.partialorder %v5567_v6, %v4931_v63  ;;  %v5580_v61 = vld [vmem:[#allocation51_spill] sm:$0xff] }
0x1d8c   : > { %vm2500_vm15 = vcmp.eq.f32.partialorder %v4898_v24, %v2490_v57  ;;  %v2779_v24 = vsel %vm1578_vm3, %v5159_v4, -inf  ;;  %v2065_v47 = vsel %vm1578_vm3, %v2064_v2, -inf  ;;  %v2795_v57 = vsel %vm2787_vm0, %v4171_v34, 11.0 }
0x1d8d   : > { %v2508_v30 = vsel %vm2500_vm15, %v4171_v34, 11.0  ;;  %vm2783_vm15 = vcmp.eq.f32.partialorder %v5561_v28, %v5560_v44  ;;  %v2813_v18 = vsel %vm1578_vm3, %v2795_v57, inf  ;;  %vm2859_vm0 = vcmp.eq.f32.partialorder %v4811_v21, %v4964_v27  ;;  %v5575_v28 = vld [vmem:[#allocation45_spill] sm:$0xff] }
0x1d8e   : > { %2708 = vmax.xlane.f32.xlu1 %v2707_v3  ;;  %v2528_v49 = vsel %vm1578_vm3, %v2508_v30, inf  ;;  %v2791_v52 = vsel %vm2783_vm15, %v4171_v34, 11.0  ;;  %v2072_v30 = vadd.f32 %v4968_v1, %v3946_v31  ;;  %v5565_v3 = vld [vmem:[#allocation37_spill] sm:$0xff]  ;;  %v2722_v31 = vsel %vm2714_vm13, %v4171_v34, 11.0 }
0x1d8f   : > { %2529 = vmin.xlane.f32.xlu0 %v2528_v49  ;;  %v2562_v62 = vpop.xlane.xlu0 %2561  ;;  %v2801_v22 = vsel %vm1578_vm3, %v2791_v52, inf  ;;  %v5566_v49 = vld [vmem:[#allocation25_spill] sm:$0xff]  ;;  %v2738_v63 = vsel %vm1578_vm3, %v2722_v31, inf }
0x1d90   : > { %vm2572_vm14 = vcmp.eq.f32.partialorder %v4903_v60, %v2562_v62  ;;  %v5576_v52 = vld [vmem:[#allocation49_spill] sm:$0xff] }
0x1d91   : > { %v2580_v19 = vsel %vm2572_vm14, %v4171_v34, 11.0  ;;  %vm2785_vm14 = vcmp.eq.f32.partialorder %v5563_v13, %v5562_v17 }
0x1d92   : > { %2780 = vmax.xlane.f32.xlu1 %v2779_v24  ;;  %v2600_v45 = vsel %vm1578_vm3, %v2580_v19, inf  ;;  %v2793_v36 = vsel %vm2785_vm14, %v4171_v34, 11.0  ;;  %v2073_v19 = vsel %vm1578_vm3, %v2072_v30, -inf }
0x1d93   : > { %2601 = vmin.xlane.f32.xlu0 %v2600_v45  ;;  %v2634_v39 = vpop.xlane.xlu0 %2633  ;;  %v2807_v26 = vsel %vm1578_vm3, %v2793_v36, inf  ;;  %v5568_v45 = vld [vmem:[#allocation39_spill] sm:$0xff] }
0x1d94   : > { %vm2644_vm1 = vcmp.eq.f32.partialorder %v4908_v56, %v2634_v39  ;;  %v2041_v56 = vsel %vm1578_vm3, %v2040_v14, -inf  ;;  %vm2857_vm15 = vcmp.eq.f32.partialorder %v5569_v48, %v5568_v45  ;;  %v5571_v14 = vld [vmem:[#allocation47_spill] sm:$0xff] }
0x1d95   : > { %v2652_v60 = vsel %vm2644_vm1, %v4171_v34, 11.0  ;;  %vm2855_vm1 = vcmp.eq.f32.partialorder %v5566_v49, %v5565_v3  ;;  %v2865_v8 = vsel %vm2857_vm15, %v4171_v34, 11.0  ;;  %vm2784_vm13 = vcmp.eq.f32.partialorder %v5572_v16, %v5571_v14  ;;  %v5582_v3 = vld [vmem:[#allocation46_spill] sm:$0xff] }
0x1d96   : > { %2852 = vmax.xlane.f32.xlu1 %v2851_v37  ;;  %v2672_v23 = vsel %vm1578_vm3, %v2652_v60, inf  ;;  %v2863_v24 = vsel %vm2855_vm1, %v4171_v34, 11.0  ;;  %v5570_v60 = vld [vmem:[#allocation36_spill] sm:$0xff]  ;;  %v2879_v37 = vsel %vm1578_vm3, %v2865_v8, inf }
0x1d97   : > { %2673 = vmin.xlane.f32.xlu0 %v2672_v23  ;;  %v2706_v62 = vpop.xlane.xlu0 %2705  ;;  %v2873_v1 = vsel %vm1578_vm3, %v2863_v24, inf  ;;  %vm2782_vm1 = vcmp.eq.f32.partialorder %v5570_v60, %v4935_v25  ;;  %v2792_v25 = vsel %vm2784_vm13, %v4171_v34, 11.0 }
0x1d98   : > { %vm2716_vm14 = vcmp.eq.f32.partialorder %v4913_v42, %v2706_v62  ;;  %v2867_v42 = vsel %vm2859_vm0, %v4171_v34, 11.0  ;;  %v2790_v53 = vsel %vm2782_vm1, %v4171_v34, 11.0  ;;  %v2804_v32 = vsel %vm1578_vm3, %v2792_v25, inf }
0x1d99   : > { %v2724_v39 = vsel %vm2716_vm14, %v4171_v34, 11.0  ;;  %v2885_v21 = vsel %vm1578_vm3, %v2867_v42, inf  ;;  %v2798_v27 = vsel %vm1578_vm3, %v2790_v53, inf  ;;  %vm2854_vm0 = vcmp.eq.f32.partialorder %v5577_v29, %v5576_v52 }
0x1d9a   : > { %2736 = vmin.xlane.f32.xlu1 %v2735_v59  ;;  %v2744_v23 = vsel %vm1578_vm3, %v2724_v39, inf  ;;  %v5573_v59 = vld [vmem:[#allocation48_spill] sm:$0xff]  ;;  %v2862_v13 = vsel %vm2854_vm0, %v4171_v34, 11.0 }
0x1d9b   : > { %2042 = vmax.xlane.f32.xlu0 %v2041_v56  ;;  %v5574_v56 = vld [vmem:[#allocation40_spill] sm:$0xff]  ;;  %v2778_v41 = vpop.xlane.xlu0 %2777  ;;  %v2870_v36 = vsel %vm1578_vm3, %v2862_v13, inf }
0x1d9c   : > { %vm2786_vm15 = vcmp.eq.f32.partialorder %v5574_v56, %v5573_v59  ;;  %vm2788_vm14 = vcmp.eq.f32.partialorder %v5575_v28, %v2778_v41 }
0x1d9d   : > { %v2794_v44 = vsel %vm2786_vm15, %v4171_v34, 11.0 }
0x1d9e   : > { %2742 = vmin.xlane.f32.xlu1 %v2741_v33  ;;  %v2810_v33 = vsel %vm1578_vm3, %v2794_v44, inf }
0x1d9f   : > { %2050 = vmax.xlane.f32.xlu0 %v2049_v11  ;;  %v2796_v11 = vsel %vm2788_vm14, %v4171_v34, 11.0 }
0x1da0   : > { %v2816_v17 = vsel %vm1578_vm3, %v2796_v11, inf }
0x1da2   : > { %2802 = vmin.xlane.f32.xlu1 %v2801_v22  ;;  %v5578_v22 = vld [vmem:[#allocation50_spill] sm:$0xff] }
0x1da3   : > { %2058 = vmax.xlane.f32.xlu0 %v2057_v50  ;;  %v5579_v50 = vld [vmem:[#allocation42_spill] sm:$0xff] }
0x1da4   : > { %vm2856_vm1 = vcmp.eq.f32.partialorder %v5579_v50, %v5578_v22 }
0x1da5   : > { %v2864_v2 = vsel %vm2856_vm1, %v4171_v34, 11.0 }
0x1da6   : > { %2808 = vmin.xlane.f32.xlu1 %v2807_v26  ;;  %v5581_v26 = vld [vmem:[#allocation44_spill] sm:$0xff]  ;;  %v2876_v57 = vsel %vm1578_vm3, %v2864_v2, inf }
0x1da7   : > { %2066 = vmax.xlane.f32.xlu0 %v2065_v47  ;;  %vm2858_vm13 = vcmp.eq.f32.partialorder %v5581_v26, %v5580_v61  ;;  %v2850_v47 = vpop.xlane.xlu0 %2849 }
0x1da8   : > { %v2866_v30 = vsel %vm2858_vm13, %v4171_v34, 11.0  ;;  %vm2860_vm15 = vcmp.eq.f32.partialorder %v5582_v3, %v2850_v47 }
0x1da9   : > { %v2882_v49 = vsel %vm1578_vm3, %v2866_v30, inf  ;;  %v2868_v6 = vsel %vm2860_vm15, %v4171_v34, 11.0 }
0x1daa   : > { %2814 = vmin.xlane.f32.xlu1 %v2813_v18  ;;  %v2888_v62 = vsel %vm1578_vm3, %v2868_v6, inf  ;;  %v5260_v18 = vpop.xlane.xlu1 %2730 }
0x1dab   : > { %2074 = vmax.xlane.f32.xlu0 %v2073_v19 }
0x1dae   : > { %2874 = vmin.xlane.f32.xlu1 %v2873_v1 }
0x1daf   : > { %2739 = vmin.xlane.f32.xlu0 %v2738_v63 }
0x1db2   : > { %2880 = vmin.xlane.f32.xlu1 %v2879_v37 }
0x1db3   : > { %2745 = vmin.xlane.f32.xlu0 %v2744_v23 }
0x1db6   : > { %2886 = vmin.xlane.f32.xlu1 %v2885_v21 }
0x1db7   : > { %2799 = vmin.xlane.f32.xlu0 %v2798_v27 }
0x1dbb   : > { %2805 = vmin.xlane.f32.xlu0 %v2804_v32 }
0x1dbf   : > { %2811 = vmin.xlane.f32.xlu0 %v2810_v33 }
0x1dc3   : > { %2817 = vmin.xlane.f32.xlu0 %v2816_v17 }
0x1dc7   : > { %2871 = vmin.xlane.f32.xlu0 %v2870_v36 }
0x1dcb   : > { %2877 = vmin.xlane.f32.xlu0 %v2876_v57 }
0x1dcf   : > { %2883 = vmin.xlane.f32.xlu0 %v2882_v49 }
0x1dd3   : > { %2889 = vmin.xlane.f32.xlu0 %v2888_v62 }
0x1de3   : > { %v5262_v19 = vpop.xlane.xlu1 %2038 }
0x1de7   : > { %v5264_v24 = vpop.xlane.xlu1 %2046 }
0x1deb   : > { %v5266_v45 = vpop.xlane.xlu1 %2054 }
0x1def   : > { %v5268_v48 = vpop.xlane.xlu1 %2062 }
0x1df3   : > { %v5270_v31 = vpop.xlane.xlu1 %2070 }
0x1df7   : > { %v5272_v1 = vpop.xlane.xlu1 %2078 }
0x1dfb   : > { %v2133_v63 = vpop.xlane.xlu1 %2132 }
0x1dfc   : > { %vm2141_vm14 = vcmp.eq.f32.partialorder %v5076_v40, %v2133_v63 }
0x1dfd   : > { %v2149_v8 = vsel %vm2141_vm14, %v4171_v34, 11.0 }
0x1dfe   : > { %v2171_v39 = vsel %vm1578_vm3, %v2149_v8, inf }
0x1dff   : > { %2172 = vmin.xlane.f32.xlu1 %v2171_v39  ;;  %v2205_v60 = vpop.xlane.xlu1 %2204 }
0x1e00   : > { %vm2213_vm0 = vcmp.eq.f32.partialorder %v5088_v43, %v2205_v60 }
0x1e01   : > { %v2221_v37 = vsel %vm2213_vm0, %v4171_v34, 11.0 }
0x1e02   : > { %v2243_v42 = vsel %vm1578_vm3, %v2221_v37, inf }
0x1e03   : > { %2244 = vmin.xlane.f32.xlu1 %v2243_v42  ;;  %v2277_v23 = vpop.xlane.xlu1 %2276 }
0x1e04   : > { %vm2285_vm1 = vcmp.eq.f32.partialorder %v5097_v20, %v2277_v23 }
0x1e05   : > { %v2293_v53 = vsel %vm2285_vm1, %v4171_v34, 11.0 }
0x1e06   : > { %v2315_v40 = vsel %vm1578_vm3, %v2293_v53, inf }
0x1e07   : > { %2316 = vmin.xlane.f32.xlu1 %v2315_v40  ;;  %v2349_v14 = vpop.xlane.xlu1 %2348 }
0x1e08   : > { %vm2357_vm13 = vcmp.eq.f32.partialorder %v5106_v12, %v2349_v14  ;;  %v2170_v16 = vpop.xlane.xlu0 %2169 }
0x1e09   : > { %v2365_v21 = vsel %vm2357_vm13, %v4171_v34, 11.0 }
0x1e0a   : > { %v2387_v43 = vsel %vm1578_vm3, %v2365_v21, inf  ;;  %v2951_v21 = vsel %vm1692_vm10, %v5012_v10, %v5260_v18 }
0x1e0b   : > { %2388 = vmin.xlane.f32.xlu1 %v2387_v43  ;;  %v2421_v27 = vpop.xlane.xlu1 %2420 }
0x1e0c   : > { %vm2429_vm15 = vcmp.eq.f32.partialorder %v5114_v7, %v2421_v27  ;;  %v2242_v25 = vpop.xlane.xlu0 %2241  ;;  %v5583_v27 = vld [vmem:[#allocation7_spill] sm:$0xff] }
0x1e0d   : > { %v2437_v20 = vsel %vm2429_vm15, %v4171_v34, 11.0  ;;  %v2900_v59 = vsel %vm1678_vm4, %v2170_v16, %v2242_v25 }
0x1e0e   : > { %v2459_v56 = vsel %vm1578_vm3, %v2437_v20, inf }
0x1e0f   : > { %2460 = vmin.xlane.f32.xlu1 %v2459_v56  ;;  %v2493_v41 = vpop.xlane.xlu1 %2492 }
0x1e10   : > { %vm2501_vm14 = vcmp.eq.f32.partialorder %v5123_v51, %v2493_v41  ;;  %v2314_v12 = vpop.xlane.xlu0 %2313 }
0x1e11   : > { %v2509_v32 = vsel %vm2501_vm14, %v4171_v34, 11.0  ;;  %v2908_v44 = vsel %vm1680_vm6, %v2900_v59, %v2314_v12 }
0x1e12   : > { %v2531_v28 = vsel %vm1578_vm3, %v2509_v32, inf }
0x1e13   : > { %2532 = vmin.xlane.f32.xlu1 %v2531_v28  ;;  %v2565_v7 = vpop.xlane.xlu1 %2564 }
0x1e14   : > { %vm2573_vm0 = vcmp.eq.f32.partialorder %v5132_v0, %v2565_v7  ;;  %v2386_v33 = vpop.xlane.xlu0 %2385 }
0x1e15   : > { %v2581_v11 = vsel %vm2573_vm0, %v4171_v34, 11.0  ;;  %v2916_v52 = vsel %vm1682_vm7, %v2908_v44, %v2386_v33 }
0x1e16   : > { %v2603_v29 = vsel %vm1578_vm3, %v2581_v11, inf }
0x1e17   : > { %2604 = vmin.xlane.f32.xlu1 %v2603_v29  ;;  %v2637_v51 = vpop.xlane.xlu1 %2636 }
0x1e18   : > { %vm2645_vm1 = vcmp.eq.f32.partialorder %v5141_v58, %v2637_v51  ;;  %v2458_v17 = vpop.xlane.xlu0 %2457 }
0x1e19   : > { %v2653_v13 = vsel %vm2645_vm1, %v4171_v34, 11.0  ;;  %v5301_v22 = vsel %vm1684_vm8, %v2916_v52, %v2458_v17 }
0x1e1a   : > { %v2675_v50 = vsel %vm1578_vm3, %v2653_v13, inf }
0x1e1b   : > { %2676 = vmin.xlane.f32.xlu1 %v2675_v50  ;;  %v2709_v0 = vpop.xlane.xlu1 %2708 }
0x1e1c   : > { %vm2717_vm13 = vcmp.eq.f32.partialorder %v5150_v5, %v2709_v0  ;;  %v5305_v36 = vpop.xlane.xlu0 %2529 }
0x1e1d   : > { %v2725_v2 = vsel %vm2717_vm13, %v4171_v34, 11.0 }
0x1e1e   : > { %v2747_v61 = vsel %vm1578_vm3, %v2725_v2, inf }
0x1e1f   : > { %2748 = vmin.xlane.f32.xlu1 %v2747_v61  ;;  %v2781_v58 = vpop.xlane.xlu1 %2780 }
0x1e20   : > { %vm2789_vm15 = vcmp.eq.f32.partialorder %v5159_v4, %v2781_v58  ;;  %v5310_v26 = vpop.xlane.xlu0 %2601 }
0x1e21   : > { %v2797_v47 = vsel %vm2789_vm15, %v4171_v34, 11.0 }
0x1e22   : > { %v2819_v57 = vsel %vm1578_vm3, %v2797_v47, inf }
0x1e23   : > { %2820 = vmin.xlane.f32.xlu1 %v2819_v57  ;;  %v2853_v30 = vpop.xlane.xlu1 %2852 }
0x1e24   : > { %vm2861_vm14 = vcmp.eq.f32.partialorder %v5168_v15, %v2853_v30  ;;  %v5315_v5 = vpop.xlane.xlu0 %2673 }
0x1e25   : > { %v2869_v3 = vsel %vm2861_vm14, %v4171_v34, 11.0 }
0x1e26   : > { %v2891_v49 = vsel %vm1578_vm3, %v2869_v3, inf }
0x1e27   : > { %2892 = vmin.xlane.f32.xlu1 %v2891_v49  ;;  %v2737_v6 = vpop.xlane.xlu1 %2736 }
0x1e28   : > { %v2043_v4 = vpop.xlane.xlu0 %2042  ;;  %v2953_v10 = vsel %vm1692_vm10, %v5043_v9, %v2737_v6 }
0x1e29   : > { %v2080_v62 = vsel %vm1678_vm4, %v5262_v19, %v2043_v4 }
0x1e2a   : > { %v2081_v39 = vsel %vm1680_vm6, %v2080_v62, %v5264_v24 }
0x1e2b   : > { %v5321_v63 = vpop.xlane.xlu1 %2742 }
0x1e2c   : > { %v2051_v8 = vpop.xlane.xlu0 %2050 }
0x1e2d   : > { %v2082_v15 = vsel %vm1682_vm7, %v2081_v39, %v2051_v8 }
0x1e2e   : > { %v2083_v34 = vsel %vm1684_vm8, %v2082_v15, %v5266_v45 }
0x1e2f   : > { %v2803_v60 = vpop.xlane.xlu1 %2802 }
0x1e30   : > { %v2059_v37 = vpop.xlane.xlu0 %2058  ;;  %v2959_v43 = vsel %vm1694_vm11, %v2951_v21, %v2803_v60 }
0x1e31   : > { %v2084_v42 = vsel %vm1686_vm5, %v2083_v34, %v2059_v37 }
0x1e32   : > { %v2085_v23 = vsel %vm1688_vm2, %v2084_v42, %v5268_v48 }
0x1e33   : > { %v2809_v19 = vpop.xlane.xlu1 %2808 }
0x1e34   : > { %v2067_v53 = vpop.xlane.xlu0 %2066 }
0x1e35   : > { %v2086_v40 = vsel %vm1690_vm9, %v2085_v23, %v2067_v53 }
0x1e36   : > { %v2087_v24 = vsel %vm1692_vm10, %v2086_v40, %v5270_v31 }
0x1e37   : > { %v2815_v14 = vpop.xlane.xlu1 %2814 }
0x1e38   : > { %v2075_v16 = vpop.xlane.xlu0 %2074 }
0x1e39   : > { %v2088_v45 = vsel %vm1694_vm11, %v2087_v24, %v2075_v16 }
0x1e3a   : > { %v2089_v48 = vsel %vm1696_vm12, %v2088_v45, %v5272_v1 }
0x1e3b   : > { %v2090_v25 = vadd.f32 %v2089_v48, %v5583_v27  ;;  %v2875_v20 = vpop.xlane.xlu1 %2874 }
0x1e3c   : > { %v2967_v31 = vsel %vm1696_vm12, %v2959_v43, %v2875_v20  ;;  %v5345_v59 = vpop.xlane.xlu0 %2739 }
0x1e3d   : > { %v2091_v56 = vadd.f32 %v2090_v25, %v3970_v55  ;;  %v3433_v41 = vtrunc.f32 %v2967_v31  ;;  %v2961_v55 = vsel %vm1694_vm11, %v2953_v10, %v2809_v19 }
0x1e3f   : > { %v3434_v18 = vcvt.f32.s32 %v3433_v41  ;;  %v2881_v1 = vpop.xlane.xlu1 %2880  ;;  %2092 = vst.msk [vmem:[%s394_s24] sm:$0xff] %vm1578_vm3, %v2091_v56 }
0x1e40   : > { %v2969_v12 = vsel %vm1696_vm12, %v2961_v55, %v2881_v1  ;;  %v5366_v32 = vpop.xlane.xlu0 %2745 }
0x1e41   : > { %3572 = shalt.err (!%p3569_p3)
}
0x1e42   : > { %s3573_s22 = scalar_lea.hbm %s5351_s15, 128  ;;  %s3577_s25 = scalar_lea.hbm %s5470_s11, 256 }
0x1e43   : > { %p3574_p4 = scmp.ne.s32.totalorder %s5351_s15, %s3573_s22  ;;  %p3578_p9 = scmp.lt.u32.totalorder %s5351_s15, %s5470_s11 }
0x1e44   : > { %p3579_p10 = scmp.lt.u32.totalorder %s3577_s25, %s3573_s22  ;;  %p3581_p12 = scmp.lt.u32.totalorder %s3573_s22, %s5351_s15 }
0x1e45   : > { %p3575_p7 = pnand %p3574_p4, %p3729_p5 }
0x1e46   : > { %p3580_p11 = por %p3579_p10, %p3578_p9 }
0x1e47   : > { %p3576_p8 = pneg %p3575_p7 }
0x1e48   : > { %p3582_p13 = por %p3581_p12, %p3580_p11 }
0x1e4a   : > { %p3583_p0 = pnand %p3582_p13, %p3576_p8 }
0x1e4c   : > { %3586 = shalt.err (!%p3583_p0)
}
0x1e4d   : > { %3447 = dma.vmem_to_hbm [thread:$0]  (%p3729_p5), %s5353_s29, 128, %s5351_s15, %s3001_s16   ;;  %2983 = vst.msk [vmem:[%s5359_s14 + $0x8] sm:$0xff] %vm1578_vm3, %v3434_v18  ;;  %v3437_v9 = vtrunc.f32 %v2969_v12  ;;  %v2955_v44 = vsel %vm1692_vm10, %v5069_v35, %v5321_v63  ;;  %v2887_v33 = vpop.xlane.xlu1 %2886  ;;  %v2800_v52 = vpop.xlane.xlu0 %2799  ;;  %v2932_v49 = vsel %vm1686_vm5, %v5301_v22, %v5305_v36 }
0x1e4e   : > { %v2963_v28 = vsel %vm1694_vm11, %v2955_v44, %v2815_v14  ;;  %v2958_v35 = vsel %vm1694_vm11, %v5091_v38, %v2800_v52  ;;  %v2954_v38 = vsel %vm1692_vm10, %v5082_v54, %v5345_v59  ;;  %v2940_v62 = vsel %vm1688_vm2, %v2932_v49, %v5310_v26 }
0x1e4f   : > { %v3438_v7 = vcvt.f32.s32 %v3437_v9  ;;  %v2971_v11 = vsel %vm1696_vm12, %v2963_v28, %v2887_v33  ;;  %v2948_v8 = vsel %vm1690_vm9, %v2940_v62, %v5315_v5 }
0x1e50   : > { %v3441_v29 = vtrunc.f32 %v2971_v11  ;;  %v2956_v39 = vsel %vm1692_vm10, %v2948_v8, %v5366_v32 }
0x1e51   : > { %2985 = vst.msk [vmem:[%s5359_s14 + $0x18] sm:$0xff] %vm1578_vm3, %v3438_v7  ;;  %v2806_v17 = vpop.xlane.xlu0 %2805 }
0x1e52   : > { %v3442_v51 = vcvt.f32.s32 %v3441_v29  ;;  %v2960_v58 = vsel %vm1694_vm11, %v5100_v46, %v2806_v17 }
0x1e54   : > { %2987 = vst.msk [vmem:[%s5359_s14 + $0x28] sm:$0xff] %vm1578_vm3, %v3442_v51 }
0x1e55   : > { %v2812_v13 = vpop.xlane.xlu0 %2811 }
0x1e56   : > { %v2962_v6 = vsel %vm1694_vm11, %v2954_v38, %v2812_v13 }
0x1e59   : > { %v2818_v50 = vpop.xlane.xlu0 %2817 }
0x1e5a   : > { %v2964_v22 = vsel %vm1694_vm11, %v2956_v39, %v2818_v50 }
0x1e5d   : > { %v2872_v0 = vpop.xlane.xlu0 %2871 }
0x1e5e   : > { %v2966_v2 = vsel %vm1696_vm12, %v2958_v35, %v2872_v0 }
0x1e5f   : > { %v3431_v61 = vtrunc.f32 %v2966_v2 }
0x1e61   : > { %v3432_v47 = vcvt.f32.s32 %v3431_v61  ;;  %v2878_v57 = vpop.xlane.xlu0 %2877 }
0x1e62   : > { %v2968_v30 = vsel %vm1696_vm12, %v2960_v58, %v2878_v57 }
0x1e63   : > { %2982 = vst.msk [vmem:[%s5359_s14] sm:$0xff] %vm1578_vm3, %v3432_v47  ;;  %v3435_v3 = vtrunc.f32 %v2968_v30 }
0x1e65   : > { %v3436_v46 = vcvt.f32.s32 %v3435_v3  ;;  %v2884_v4 = vpop.xlane.xlu0 %2883 }
0x1e66   : > { %v2970_v63 = vsel %vm1696_vm12, %v2962_v6, %v2884_v4 }
0x1e67   : > { %2984 = vst.msk [vmem:[%s5359_s14 + $0x10] sm:$0xff] %vm1578_vm3, %v3436_v46  ;;  %v3439_v54 = vtrunc.f32 %v2970_v63 }
0x1e69   : > { %v3440_v36 = vcvt.f32.s32 %v3439_v54  ;;  %v2890_v15 = vpop.xlane.xlu0 %2889 }
0x1e6a   : > { %v2972_v34 = vsel %vm1696_vm12, %v2964_v22, %v2890_v15 }
0x1e6b   : > { %2986 = vst.msk [vmem:[%s5359_s14 + $0x20] sm:$0xff] %vm1578_vm3, %v3440_v36  ;;  %v3443_v26 = vtrunc.f32 %v2972_v34 }
0x1e6d   : > { %v3444_v60 = vcvt.f32.s32 %v3443_v26 }
0x1e6f   : > { %2988 = vst.msk [vmem:[%s5359_s14 + $0x30] sm:$0xff] %vm1578_vm3, %v3444_v60 }
0x1e8c   : > { %v2173_v37 = vpop.xlane.xlu1 %2172 }
0x1e90   : > { %v2245_v5 = vpop.xlane.xlu1 %2244 }
0x1e91   : > { %v2901_v14 = vsel %vm1678_vm4, %v2173_v37, %v2245_v5 }
0x1e94   : > { %v2317_v42 = vpop.xlane.xlu1 %2316 }
0x1e95   : > { %v2909_v45 = vsel %vm1680_vm6, %v2901_v14, %v2317_v42 }
0x1e98   : > { %v2389_v23 = vpop.xlane.xlu1 %2388 }
0x1e99   : > { %v2917_v21 = vsel %vm1682_vm7, %v2909_v45, %v2389_v23 }
0x1e9c   : > { %v2461_v19 = vpop.xlane.xlu1 %2460 }
0x1e9d   : > { %v2925_v48 = vsel %vm1684_vm8, %v2917_v21, %v2461_v19 }
0x1ea0   : > { %v2533_v53 = vpop.xlane.xlu1 %2532 }
0x1ea1   : > { %v2933_v43 = vsel %vm1686_vm5, %v2925_v48, %v2533_v53 }
0x1ea4   : > { %v2605_v40 = vpop.xlane.xlu1 %2604 }
0x1ea5   : > { %v2941_v25 = vsel %vm1688_vm2, %v2933_v43, %v2605_v40 }
0x1ea8   : > { %v2677_v24 = vpop.xlane.xlu1 %2676 }
0x1ea9   : > { %v2949_v20 = vsel %vm1690_vm9, %v2941_v25, %v2677_v24 }
0x1eac   : > { %v2749_v16 = vpop.xlane.xlu1 %2748 }
0x1ead   : > { %v2957_v31 = vsel %vm1692_vm10, %v2949_v20, %v2749_v16 }
0x1eb0   : > { %v2821_v27 = vpop.xlane.xlu1 %2820 }
0x1eb1   : > { %v2965_v59 = vsel %vm1694_vm11, %v2957_v31, %v2821_v27 }
0x1eb4   : > { %v2893_v56 = vpop.xlane.xlu1 %2892 }
0x1eb5   : > { %v2973_v41 = vsel %vm1696_vm12, %v2965_v59, %v2893_v56 }
0x1eb6   : > { %v3445_v10 = vtrunc.f32 %v2973_v41 }
0x1eb8   : > { %v3446_v55 = vcvt.f32.s32 %v3445_v10 }
0x1eba   : > { %2989 = vst.msk [vmem:[%s5359_s14 + $0x38] sm:$0xff] %vm1578_vm3, %v3446_v55 }
0x1ebb PF: > { %p3453_p5 = scmp.ge.s32.totalorder %s3621_s20, 2  ;;  %s3048_s0 = sand.u32 1, %s3609_s17  }
0x1ebc   : > { %s3049_s27 = scalar_lea.sflag [#allocation5], %s3048_s0 }
0x1ebd   : > { %p3450_p1 = pnand %p3453_p5, %p3733_p6 }
0x1ebf   : > { %3604 = dma.done.wait (!%p3450_p1), %s3049_s27, 128  }
0x1ec0   : > { %3606 = vsyncadd (!%p3450_p1), %s3049_s27, 4294967168  ;;  %p22_p2 = scmp.ge.s32.totalorder %s3716_s23, 4   ;;  %s5584_s17 = smov %s3613_s18 }
0x1ec1   : > { %s5585_s18 = smov %s3617_s19  ;;  %s5586_s19 = smov %s3727_s26 }
0x1ec2   : > { %s5587_s20 = smov %s3716_s23  ;;  %24 = sbr.rel (!%p22_p2) target bundleno = 5 (0x5), region = 115 }
0x1ec9   :  { %3054 = vsyncpa [#allocation5], 1 }
0x1eca   :  { %3056 = vsyncpa [#allocation5 + $0x1], 1 }

</bundles_post_ra>
